<compile_context>
chip_gen: v7x
topology: tpu7x:2x2x1
jax: 0.10.0
libtpu: 0.0.40
codegen_flags: <defaults>
</compile_context>

<pallas_src>
import jax
import jax.numpy as jnp
from jax import lax
from jax.experimental import pallas as pl
from jax.experimental.pallas import tpu as pltpu

_BN_EPS = 1e-5
_VMEM_LIMIT = 32 * 1024 * 1024          # safe on v5e/v6e/v7x at these tile sizes
_TILE_TARGET_BYTES = 2 * 1024 * 1024    # per-input-window VMEM budget for a tile


# ----------------------------------------------------------------- helpers ---

def _round_up(x, m):
    return ((x + m - 1) // m) * m


def _pick_row_tile(H, Wp, C, itemsize=4, target_bytes=_TILE_TARGET_BYTES):
    """Largest divisor of H whose haloed row window fits the byte budget."""
    denom = max((Wp + 2) * C * itemsize, 1)
    th = int(max(1, min(H, target_bytes // denom)))
    while th > 1 and H % th != 0:
        th -= 1
    return th


def _halo_windows(x, TH, Wp):
    """(N,H,W,C) f32 -> (N, H//TH, TH+2, Wp+2, C) haloed (and width-padded) windows."""
    N, H, W, C = x.shape
    xp = jnp.pad(x, ((0, 0), (1, 1), (1, 1 + Wp - W), (0, 0)))
    num_h = H // TH
    if num_h == 1:
        return xp[:, None]                       # no copy beyond padding
    wins = [xp[:, i * TH:i * TH + TH + 2] for i in range(num_h)]
    return jnp.stack(wins, axis=1)


def maxpool2x2(x):
    """XLA-level 2x2/stride-2 max pool on NHWC."""
    N, H, W, C = x.shape
    return jnp.max(x.reshape(N, H // 2, 2, W // 2, 2, C), axis=(2, 4))


# ----------------------------------------------------------------- kernels ---

def _accumulate_taps(x_ref, w_ref):
    """9-tap 3x3 conv on one haloed row tile -> f32 (TH*Wp, Cout)."""
    thp2, wp2, cin = x_ref.shape[2], x_ref.shape[3], x_ref.shape[4]
    th, wp = thp2 - 2, wp2 - 2
    cout = w_ref.shape[2]
    acc = jnp.zeros((th * wp, cout), jnp.float32)
    for t in range(9):                                   # unrolled tap reduction
        dy, dx = divmod(t, 3)
        xs = x_ref[0, 0, dy:dy + th, dx:dx + wp, :]      # (TH, Wp, Cin) f32
        xs = xs.reshape(th * wp, cin).astype(jnp.bfloat16)
        acc = acc + jnp.dot(xs, w_ref[t], preferred_element_type=jnp.float32)
    return acc, th, wp, cout


def _conv_relu_kernel(x_ref, w_ref, b_ref, o_ref):
    acc, th, wp, cout = _accumulate_taps(x_ref, w_ref)
    y = jnp.maximum(acc + b_ref[...], 0.0)
    o_ref[...] = y.reshape(o_ref.shape)


def _make_conv_stats_kernel(w_real):
    """Conv (no bias - cancelled by BN) + per-channel sum / sumsq accumulation."""
    def kernel(x_ref, w_ref, o_ref, sum_ref, sq_ref):
        acc, th, wp, cout = _accumulate_taps(x_ref, w_ref)
        if wp != w_real:                                 # zero width-padding cols
            col = lax.broadcasted_iota(jnp.int32, (th * wp, 1), 0) % wp
            acc = jnp.where(col < w_real, acc, 0.0)
        o_ref[...] = acc.reshape(o_ref.shape)

        @pl.when((pl.program_id(0) == 0) & (pl.program_id(1) == 0))
        def _init():
            sum_ref[...] = jnp.zeros_like(sum_ref)
            sq_ref[...] = jnp.zeros_like(sq_ref)

        sum_ref[...] = sum_ref[...] + jnp.sum(acc, axis=0, keepdims=True)
        sq_ref[...] = sq_ref[...] + jnp.sum(acc * acc, axis=0, keepdims=True)
    return kernel


def _bn_relu_kernel(y_ref, scale_ref, shift_ref, o_ref):
    y = y_ref[0]                                         # (TH, Wp, C) f32
    z = jnp.maximum(y * scale_ref[...] + shift_ref[...], 0.0)
    o_ref[...] = z.reshape(o_ref.shape)


# ----------------------------------------------------------- layer wrappers --

def conv3x3_relu(x, w9, bias):
    """x: (N,H,W,Cin) f32; w9: (9,Cin,Cout) bf16; bias: (1,Cout) f32 -> (N,H,W,Cout)."""
    N, H, W, Cin = x.shape
    Cout = w9.shape[2]
    Wp = _round_up(W, 8)
    TH = _pick_row_tile(H, Wp, Cin)
    num_h = H // TH
    xw = _halo_windows(x, TH, Wp)
    y = pl.pallas_call(
        _conv_relu_kernel,
        grid=(N, num_h),
        in_specs=[
            pl.BlockSpec((1, 1, TH + 2, Wp + 2, Cin), lambda n, i: (n, i, 0, 0, 0)),
            pl.BlockSpec((9, Cin, Cout), lambda n, i: (0, 0, 0)),
            pl.BlockSpec((1, Cout), lambda n, i: (0, 0)),
        ],
        out_specs=pl.BlockSpec((1, TH, Wp, Cout), lambda n, i: (n, i, 0, 0)),
        out_shape=jax.ShapeDtypeStruct((N, H, Wp, Cout), jnp.float32),
        compiler_params=pltpu.CompilerParams(
            dimension_semantics=("parallel", "parallel"),
            vmem_limit_bytes=_VMEM_LIMIT),
    )(xw, w9, bias)
    return y[:, :, :W, :]


def conv3x3_stats(x, w9):
    """Conv (no bias) + per-channel (sum, sumsq). Returns (y_padded_width, sum, sumsq)."""
    N, H, W, Cin = x.shape
    Cout = w9.shape[2]
    Wp = _round_up(W, 8)
    TH = _pick_row_tile(H, Wp, Cin)
    num_h = H // TH
    xw = _halo_windows(x, TH, Wp)
    y, s, ss = pl.pallas_call(
        _make_conv_stats_kernel(W),
        grid=(N, num_h),
        in_specs=[
            pl.BlockSpec((1, 1, TH + 2, Wp + 2, Cin), lambda n, i: (n, i, 0, 0, 0)),
            pl.BlockSpec((9, Cin, Cout), lambda n, i: (0, 0, 0)),
        ],
        out_specs=[
            pl.BlockSpec((1, TH, Wp, Cout), lambda n, i: (n, i, 0, 0)),
            pl.BlockSpec((1, Cout), lambda n, i: (0, 0)),   # grid-resident accumulators
            pl.BlockSpec((1, Cout), lambda n, i: (0, 0)),
        ],
        out_shape=[
            jax.ShapeDtypeStruct((N, H, Wp, Cout), jnp.float32),
            jax.ShapeDtypeStruct((1, Cout), jnp.float32),
            jax.ShapeDtypeStruct((1, Cout), jnp.float32),
        ],
        compiler_params=pltpu.CompilerParams(
            dimension_semantics=("arbitrary", "arbitrary"),
            vmem_limit_bytes=_VMEM_LIMIT),
    )(xw, w9)
    return y, s, ss


def bn_relu(y, scale, shift, w_real):
    """Per-channel scale/shift + ReLU on a width-padded NHWC tensor; crops to w_real."""
    N, H, Wp, C = y.shape
    TH = _pick_row_tile(H, Wp, C)
    num_h = H // TH
    out = pl.pallas_call(
        _bn_relu_kernel,
        grid=(N, num_h),
        in_specs=[
            pl.BlockSpec((1, TH, Wp, C), lambda n, i: (n, i, 0, 0)),
            pl.BlockSpec((1, C), lambda n, i: (0, 0)),
            pl.BlockSpec((1, C), lambda n, i: (0, 0)),
        ],
        out_specs=pl.BlockSpec((1, TH, Wp, C), lambda n, i: (n, i, 0, 0)),
        out_shape=jax.ShapeDtypeStruct((N, H, Wp, C), jnp.float32),
        compiler_params=pltpu.CompilerParams(
            dimension_semantics=("parallel", "parallel"),
            vmem_limit_bytes=_VMEM_LIMIT),
    )(y, scale, shift)
    return out[:, :, :w_real, :]


# ------------------------------------------------------------------- params --

def _init_conv(key, cin, cout):
    kw, kb = jax.random.split(key)
    bound = 1.0 / float((cin * 9) ** 0.5)
    w = jax.random.uniform(kw, (cout, cin, 3, 3), jnp.float32, -bound, bound)
    b = jax.random.uniform(kb, (cout,), jnp.float32, -bound, bound)
    w9 = jnp.transpose(w, (2, 3, 1, 0)).reshape(9, cin, cout).astype(jnp.bfloat16)
    return w9, b[None, :]


def init_block(key, cin, hidden, cout, use_bn):
    k1, k2 = jax.random.split(key)
    p = {}
    p['w1'], p['b1'] = _init_conv(k1, cin, hidden)
    p['w2'], p['b2'] = _init_conv(k2, hidden, cout)
    if use_bn:
        p['gamma'] = jnp.ones((1, cout), jnp.float32)    # fresh BatchNorm2d defaults
        p['beta'] = jnp.zeros((1, cout), jnp.float32)
    return p


def init_encoder(key, input_channels=3, first_block_channels=64, layer_depth=5):
    if layer_depth < 1:
        raise ValueError(
            f'layer_depth is smaller than 2 ({layer_depth}), which is the minimum possible.')
    keys = jax.random.split(key, max(layer_depth, 2))
    params, cfgs = [], []
    params.append(init_block(keys[0], input_channels, first_block_channels,
                             first_block_channels, True))
    cfgs.append(dict(use_bn=True, downsample=True))
    n = first_block_channels
    ki = 1
    for _ in range(1, layer_depth - 1):
        params.append(init_block(keys[ki], n, 2 * n, 2 * n, True)); ki += 1
        cfgs.append(dict(use_bn=True, downsample=True))
        n *= 2
    params.append(init_block(keys[ki], n, 2 * n, 2 * n, False))
    cfgs.append(dict(use_bn=False, downsample=False))
    return params, cfgs


# ------------------------------------------------------------------ forward --

def block_forward(p, x, *, use_bn, downsample):
    # conv1 -> ReLU
    h = conv3x3_relu(x, p['w1'], p['b1'])
    if use_bn:
        # conv2 (bias dropped: cancelled by batch-mean subtraction) + stats pass 1
        y, s, ss = conv3x3_stats(h, p['w2'])
        n_elems = float(h.shape[0] * h.shape[1] * h.shape[2])
        mean = s[0] / n_elems
        var = jnp.maximum(ss[0] / n_elems - mean * mean, 0.0)   # biased var (training BN)
        inv = lax.rsqrt(var + _BN_EPS)
        scale = (p['gamma'][0] * inv)[None, :]
        shift = (p['beta'][0] - p['gamma'][0] * inv * mean)[None, :]
        # pass 2: BN-apply + ReLU
        feats = bn_relu(y, scale, shift, w_real=h.shape[2])
    else:
        feats = conv3x3_relu(h, p['w2'], p['b2'])
    down = maxpool2x2(feats) if downsample else None
    return feats, down


def encoder_forward(params, cfgs, x_nchw):
    feats = jnp.transpose(x_nchw, (0, 2, 3, 1)).astype(jnp.float32)   # NCHW -> NHWC
    skips = []
    for p, cfg in zip(params[:-1], cfgs[:-1]):
        skip, feats = block_forward(p, feats, **cfg)
        skips.append(skip)
    feats, _ = block_forward(params[-1], feats, **cfgs[-1])
    to_nchw = lambda t: jnp.transpose(t, (0, 3, 1, 2))
    return to_nchw(feats), [to_nchw(s) for s in skips]


# --------------------------------------------------------------------- main --

if __name__ == "__main__":
    key = jax.random.PRNGKey(0)
    pkey, xkey = jax.random.split(key)

    # Encoder(input_channels=3, first_block_channels=4, layer_depth=3)
    params, cfgs = init_encoder(pkey, input_channels=3,
                                first_block_channels=4, layer_depth=3)
    x = jax.random.normal(xkey, (2, 3, 16, 16), jnp.float32)   # NCHW like PyTorch

    fwd = jax.jit(lambda p, xx: encoder_forward(p, cfgs, xx))
    feats, skips = fwd(params, x)
    feats = jax.block_until_ready(feats)

    assert feats.shape == (2, 16, 4, 4), feats.shape
    assert [tuple(s.shape) for s in skips] == [(2, 4, 16, 16), (2, 8, 8, 8)], \
        [s.shape for s in skips]
    assert bool(jnp.all(jnp.isfinite(feats)))
    assert all(bool(jnp.all(jnp.isfinite(s))) for s in skips)
    print("KERNEL_OK")
</pallas_src>

<mosaic_0001>
module attributes {stable_mosaic.version = 11 : i64} {
  func.func @_conv_relu_kernel(%arg0: i32, %arg1: i32, %arg2: memref<1x1x18x18x3xf32, #tpu.memory_space<vmem>>, %arg3: memref<9x3x4xbf16, #tpu.memory_space<vmem>>, %arg4: memref<1x4xf32, #tpu.memory_space<vmem>>, %arg5: memref<1x16x16x4xf32, #tpu.memory_space<vmem>>) attributes {dimension_semantics = [#tpu.dimension_semantics<parallel>, #tpu.dimension_semantics<parallel>], iteration_bounds = array<i64: 2, 1>, scalar_prefetch = 0 : i64, scratch_operands = 0 : i64, tpu.core_type = #tpu.core_type<tc>, window_params = [{transform_indices = @transform_0, window_bounds = array<i64: 1, 1, 18, 18, 3>}, {pipeline_mode = #tpu.pipeline_mode<synchronous>, transform_indices = @transform_1, window_bounds = array<i64: 9, 3, 4>}, {pipeline_mode = #tpu.pipeline_mode<synchronous>, transform_indices = @transform_2, window_bounds = array<i64: 1, 4>}, {transform_indices = @transform_3, window_bounds = array<i64: 1, 16, 16, 4>}]} {
    %cst = arith.constant 0.000000e+00 : f32
    %0 = vector.broadcast %cst : f32 to vector<256x4xf32>
    %c0 = arith.constant 0 : index
    %c0_0 = arith.constant 0 : index
    %c0_1 = arith.constant 0 : index
    %c0_2 = arith.constant 0 : index
    %c0_3 = arith.constant 0 : index
    %1 = vector.load %arg2[%c0, %c0_0, %c0_1, %c0_2, %c0_3] : memref<1x1x18x18x3xf32, #tpu.memory_space<vmem>>, vector<1x1x16x16x3xf32>
    %2 = vector.shape_cast %1 : vector<1x1x16x16x3xf32> to vector<16x16x3xf32>
    %3 = vector.shape_cast %2 : vector<16x16x3xf32> to vector<256x3xf32>
    %4 = arith.truncf %3 : vector<256x3xf32> to vector<256x3xbf16>
    %c0_4 = arith.constant 0 : index
    %c0_5 = arith.constant 0 : index
    %c0_6 = arith.constant 0 : index
    %5 = vector.load %arg3[%c0_4, %c0_5, %c0_6] : memref<9x3x4xbf16, #tpu.memory_space<vmem>>, vector<1x3x4xbf16>
    %6 = vector.shape_cast %5 : vector<1x3x4xbf16> to vector<3x4xbf16>
    %cst_7 = arith.constant dense<0.000000e+00> : vector<256x4xf32>
    %7 = tpu.matmul %4, %6, %cst_7 {dimension_numbers = #tpu.dot_dimension_numbers<[1], [0], [0], [1], [0, 0, 1, 1], [], []>} : vector<256x3xbf16>, vector<3x4xbf16>, vector<256x4xf32> -> vector<256x4xf32>
    %8 = arith.addf %0, %7 : vector<256x4xf32>
    %c0_8 = arith.constant 0 : index
    %c0_9 = arith.constant 0 : index
    %c0_10 = arith.constant 0 : index
    %c1 = arith.constant 1 : index
    %c0_11 = arith.constant 0 : index
    %9 = vector.load %arg2[%c0_8, %c0_9, %c0_10, %c1, %c0_11] : memref<1x1x18x18x3xf32, #tpu.memory_space<vmem>>, vector<1x1x16x16x3xf32>
    %10 = vector.shape_cast %9 : vector<1x1x16x16x3xf32> to vector<16x16x3xf32>
    %11 = vector.shape_cast %10 : vector<16x16x3xf32> to vector<256x3xf32>
    %12 = arith.truncf %11 : vector<256x3xf32> to vector<256x3xbf16>
    %c1_12 = arith.constant 1 : index
    %c0_13 = arith.constant 0 : index
    %c0_14 = arith.constant 0 : index
    %13 = vector.load %arg3[%c1_12, %c0_13, %c0_14] : memref<9x3x4xbf16, #tpu.memory_space<vmem>>, vector<1x3x4xbf16>
    %14 = vector.shape_cast %13 : vector<1x3x4xbf16> to vector<3x4xbf16>
    %cst_15 = arith.constant dense<0.000000e+00> : vector<256x4xf32>
    %15 = tpu.matmul %12, %14, %cst_15 {dimension_numbers = #tpu.dot_dimension_numbers<[1], [0], [0], [1], [0, 0, 1, 1], [], []>} : vector<256x3xbf16>, vector<3x4xbf16>, vector<256x4xf32> -> vector<256x4xf32>
    %16 = arith.addf %8, %15 : vector<256x4xf32>
    %c0_16 = arith.constant 0 : index
    %c0_17 = arith.constant 0 : index
    %c0_18 = arith.constant 0 : index
    %c2 = arith.constant 2 : index
    %c0_19 = arith.constant 0 : index
    %17 = vector.load %arg2[%c0_16, %c0_17, %c0_18, %c2, %c0_19] : memref<1x1x18x18x3xf32, #tpu.memory_space<vmem>>, vector<1x1x16x16x3xf32>
    %18 = vector.shape_cast %17 : vector<1x1x16x16x3xf32> to vector<16x16x3xf32>
    %19 = vector.shape_cast %18 : vector<16x16x3xf32> to vector<256x3xf32>
    %20 = arith.truncf %19 : vector<256x3xf32> to vector<256x3xbf16>
    %c2_20 = arith.constant 2 : index
    %c0_21 = arith.constant 0 : index
    %c0_22 = arith.constant 0 : index
    %21 = vector.load %arg3[%c2_20, %c0_21, %c0_22] : memref<9x3x4xbf16, #tpu.memory_space<vmem>>, vector<1x3x4xbf16>
    %22 = vector.shape_cast %21 : vector<1x3x4xbf16> to vector<3x4xbf16>
    %cst_23 = arith.constant dense<0.000000e+00> : vector<256x4xf32>
    %23 = tpu.matmul %20, %22, %cst_23 {dimension_numbers = #tpu.dot_dimension_numbers<[1], [0], [0], [1], [0, 0, 1, 1], [], []>} : vector<256x3xbf16>, vector<3x4xbf16>, vector<256x4xf32> -> vector<256x4xf32>
    %24 = arith.addf %16, %23 : vector<256x4xf32>
    %c0_24 = arith.constant 0 : index
    %c0_25 = arith.constant 0 : index
    %c1_26 = arith.constant 1 : index
    %c0_27 = arith.constant 0 : index
    %c0_28 = arith.constant 0 : index
    %25 = vector.load %arg2[%c0_24, %c0_25, %c1_26, %c0_27, %c0_28] : memref<1x1x18x18x3xf32, #tpu.memory_space<vmem>>, vector<1x1x16x16x3xf32>
    %26 = vector.shape_cast %25 : vector<1x1x16x16x3xf32> to vector<16x16x3xf32>
    %27 = vector.shape_cast %26 : vector<16x16x3xf32> to vector<256x3xf32>
    %28 = arith.truncf %27 : vector<256x3xf32> to vector<256x3xbf16>
    %c3 = arith.constant 3 : index
    %c0_29 = arith.constant 0 : index
    %c0_30 = arith.constant 0 : index
    %29 = vector.load %arg3[%c3, %c0_29, %c0_30] : memref<9x3x4xbf16, #tpu.memory_space<vmem>>, vector<1x3x4xbf16>
    %30 = vector.shape_cast %29 : vector<1x3x4xbf16> to vector<3x4xbf16>
    %cst_31 = arith.constant dense<0.000000e+00> : vector<256x4xf32>
    %31 = tpu.matmul %28, %30, %cst_31 {dimension_numbers = #tpu.dot_dimension_numbers<[1], [0], [0], [1], [0, 0, 1, 1], [], []>} : vector<256x3xbf16>, vector<3x4xbf16>, vector<256x4xf32> -> vector<256x4xf32>
    %32 = arith.addf %24, %31 : vector<256x4xf32>
    %c0_32 = arith.constant 0 : index
    %c0_33 = arith.constant 0 : index
    %c1_34 = arith.constant 1 : index
    %c1_35 = arith.constant 1 : index
    %c0_36 = arith.constant 0 : index
    %33 = vector.load %arg2[%c0_32, %c0_33, %c1_34, %c1_35, %c0_36] : memref<1x1x18x18x3xf32, #tpu.memory_space<vmem>>, vector<1x1x16x16x3xf32>
    %34 = vector.shape_cast %33 : vector<1x1x16x16x3xf32> to vector<16x16x3xf32>
    %35 = vector.shape_cast %34 : vector<16x16x3xf32> to vector<256x3xf32>
    %36 = arith.truncf %35 : vector<256x3xf32> to vector<256x3xbf16>
    %c4 = arith.constant 4 : index
    %c0_37 = arith.constant 0 : index
    %c0_38 = arith.constant 0 : index
    %37 = vector.load %arg3[%c4, %c0_37, %c0_38] : memref<9x3x4xbf16, #tpu.memory_space<vmem>>, vector<1x3x4xbf16>
    %38 = vector.shape_cast %37 : vector<1x3x4xbf16> to vector<3x4xbf16>
    %cst_39 = arith.constant dense<0.000000e+00> : vector<256x4xf32>
    %39 = tpu.matmul %36, %38, %cst_39 {dimension_numbers = #tpu.dot_dimension_numbers<[1], [0], [0], [1], [0, 0, 1, 1], [], []>} : vector<256x3xbf16>, vector<3x4xbf16>, vector<256x4xf32> -> vector<256x4xf32>
    %40 = arith.addf %32, %39 : vector<256x4xf32>
    %c0_40 = arith.constant 0 : index
    %c0_41 = arith.constant 0 : index
    %c1_42 = arith.constant 1 : index
    %c2_43 = arith.constant 2 : index
    %c0_44 = arith.constant 0 : index
    %41 = vector.load %arg2[%c0_40, %c0_41, %c1_42, %c2_43, %c0_44] : memref<1x1x18x18x3xf32, #tpu.memory_space<vmem>>, vector<1x1x16x16x3xf32>
    %42 = vector.shape_cast %41 : vector<1x1x16x16x3xf32> to vector<16x16x3xf32>
    %43 = vector.shape_cast %42 : vector<16x16x3xf32> to vector<256x3xf32>
    %44 = arith.truncf %43 : vector<256x3xf32> to vector<256x3xbf16>
    %c5 = arith.constant 5 : index
    %c0_45 = arith.constant 0 : index
    %c0_46 = arith.constant 0 : index
    %45 = vector.load %arg3[%c5, %c0_45, %c0_46] : memref<9x3x4xbf16, #tpu.memory_space<vmem>>, vector<1x3x4xbf16>
    %46 = vector.shape_cast %45 : vector<1x3x4xbf16> to vector<3x4xbf16>
    %cst_47 = arith.constant dense<0.000000e+00> : vector<256x4xf32>
    %47 = tpu.matmul %44, %46, %cst_47 {dimension_numbers = #tpu.dot_dimension_numbers<[1], [0], [0], [1], [0, 0, 1, 1], [], []>} : vector<256x3xbf16>, vector<3x4xbf16>, vector<256x4xf32> -> vector<256x4xf32>
    %48 = arith.addf %40, %47 : vector<256x4xf32>
    %c0_48 = arith.constant 0 : index
    %c0_49 = arith.constant 0 : index
    %c2_50 = arith.constant 2 : index
    %c0_51 = arith.constant 0 : index
    %c0_52 = arith.constant 0 : index
    %49 = vector.load %arg2[%c0_48, %c0_49, %c2_50, %c0_51, %c0_52] : memref<1x1x18x18x3xf32, #tpu.memory_space<vmem>>, vector<1x1x16x16x3xf32>
    %50 = vector.shape_cast %49 : vector<1x1x16x16x3xf32> to vector<16x16x3xf32>
    %51 = vector.shape_cast %50 : vector<16x16x3xf32> to vector<256x3xf32>
    %52 = arith.truncf %51 : vector<256x3xf32> to vector<256x3xbf16>
    %c6 = arith.constant 6 : index
    %c0_53 = arith.constant 0 : index
    %c0_54 = arith.constant 0 : index
    %53 = vector.load %arg3[%c6, %c0_53, %c0_54] : memref<9x3x4xbf16, #tpu.memory_space<vmem>>, vector<1x3x4xbf16>
    %54 = vector.shape_cast %53 : vector<1x3x4xbf16> to vector<3x4xbf16>
    %cst_55 = arith.constant dense<0.000000e+00> : vector<256x4xf32>
    %55 = tpu.matmul %52, %54, %cst_55 {dimension_numbers = #tpu.dot_dimension_numbers<[1], [0], [0], [1], [0, 0, 1, 1], [], []>} : vector<256x3xbf16>, vector<3x4xbf16>, vector<256x4xf32> -> vector<256x4xf32>
    %56 = arith.addf %48, %55 : vector<256x4xf32>
    %c0_56 = arith.constant 0 : index
    %c0_57 = arith.constant 0 : index
    %c2_58 = arith.constant 2 : index
    %c1_59 = arith.constant 1 : index
    %c0_60 = arith.constant 0 : index
    %57 = vector.load %arg2[%c0_56, %c0_57, %c2_58, %c1_59, %c0_60] : memref<1x1x18x18x3xf32, #tpu.memory_space<vmem>>, vector<1x1x16x16x3xf32>
    %58 = vector.shape_cast %57 : vector<1x1x16x16x3xf32> to vector<16x16x3xf32>
    %59 = vector.shape_cast %58 : vector<16x16x3xf32> to vector<256x3xf32>
    %60 = arith.truncf %59 : vector<256x3xf32> to vector<256x3xbf16>
    %c7 = arith.constant 7 : index
    %c0_61 = arith.constant 0 : index
    %c0_62 = arith.constant 0 : index
    %61 = vector.load %arg3[%c7, %c0_61, %c0_62] : memref<9x3x4xbf16, #tpu.memory_space<vmem>>, vector<1x3x4xbf16>
    %62 = vector.shape_cast %61 : vector<1x3x4xbf16> to vector<3x4xbf16>
    %cst_63 = arith.constant dense<0.000000e+00> : vector<256x4xf32>
    %63 = tpu.matmul %60, %62, %cst_63 {dimension_numbers = #tpu.dot_dimension_numbers<[1], [0], [0], [1], [0, 0, 1, 1], [], []>} : vector<256x3xbf16>, vector<3x4xbf16>, vector<256x4xf32> -> vector<256x4xf32>
    %64 = arith.addf %56, %63 : vector<256x4xf32>
    %c0_64 = arith.constant 0 : index
    %c0_65 = arith.constant 0 : index
    %c2_66 = arith.constant 2 : index
    %c2_67 = arith.constant 2 : index
    %c0_68 = arith.constant 0 : index
    %65 = vector.load %arg2[%c0_64, %c0_65, %c2_66, %c2_67, %c0_68] : memref<1x1x18x18x3xf32, #tpu.memory_space<vmem>>, vector<1x1x16x16x3xf32>
    %66 = vector.shape_cast %65 : vector<1x1x16x16x3xf32> to vector<16x16x3xf32>
    %67 = vector.shape_cast %66 : vector<16x16x3xf32> to vector<256x3xf32>
    %68 = arith.truncf %67 : vector<256x3xf32> to vector<256x3xbf16>
    %c8 = arith.constant 8 : index
    %c0_69 = arith.constant 0 : index
    %c0_70 = arith.constant 0 : index
    %69 = vector.load %arg3[%c8, %c0_69, %c0_70] : memref<9x3x4xbf16, #tpu.memory_space<vmem>>, vector<1x3x4xbf16>
    %70 = vector.shape_cast %69 : vector<1x3x4xbf16> to vector<3x4xbf16>
    %cst_71 = arith.constant dense<0.000000e+00> : vector<256x4xf32>
    %71 = tpu.matmul %68, %70, %cst_71 {dimension_numbers = #tpu.dot_dimension_numbers<[1], [0], [0], [1], [0, 0, 1, 1], [], []>} : vector<256x3xbf16>, vector<3x4xbf16>, vector<256x4xf32> -> vector<256x4xf32>
    %72 = arith.addf %64, %71 : vector<256x4xf32>
    %c0_72 = arith.constant 0 : index
    %c0_73 = arith.constant 0 : index
    %73 = vector.load %arg4[%c0_72, %c0_73] : memref<1x4xf32, #tpu.memory_space<vmem>>, vector<1x4xf32>
    %74 = vector.broadcast %73 : vector<1x4xf32> to vector<256x4xf32>
    %75 = arith.addf %72, %74 : vector<256x4xf32>
    %cst_74 = arith.constant 0.000000e+00 : f32
    %76 = vector.broadcast %cst_74 : f32 to vector<256x4xf32>
    %77 = arith.maximumf %75, %76 : vector<256x4xf32>
    %78 = vector.shape_cast %77 : vector<256x4xf32> to vector<1x16x16x4xf32>
    %c0_75 = arith.constant 0 : index
    %c0_76 = arith.constant 0 : index
    %c0_77 = arith.constant 0 : index
    %c0_78 = arith.constant 0 : index
    %79 = vector.load %arg5[%c0_75, %c0_76, %c0_77, %c0_78] : memref<1x16x16x4xf32, #tpu.memory_space<vmem>>, vector<1x16x16x4xf32>
    tpu.vector_store %arg5[%c0_75, %c0_76, %c0_77, %c0_78], %78 {strides = array<i32>} : memref<1x16x16x4xf32, #tpu.memory_space<vmem>>, vector<1x16x16x4xf32>,
    return
  }
  func.func @transform_0(%arg0: i32, %arg1: i32) -> (i32, i32, i32, i32, i32) {
    %c0_i32 = arith.constant 0 : i32
    %c0_i32_0 = arith.constant 0 : i32
    %c0_i32_1 = arith.constant 0 : i32
    %c0_i32_2 = arith.constant 0 : i32
    return %arg0, %arg1, %c0_i32, %c0_i32_0, %c0_i32_1 : i32, i32, i32, i32, i32
  }
  func.func @transform_1(%arg0: i32, %arg1: i32) -> (i32, i32, i32) {
    %c0_i32 = arith.constant 0 : i32
    %c0_i32_0 = arith.constant 0 : i32
    %c0_i32_1 = arith.constant 0 : i32
    %c0_i32_2 = arith.constant 0 : i32
    return %c0_i32, %c0_i32_0, %c0_i32_1 : i32, i32, i32
  }
  func.func @transform_2(%arg0: i32, %arg1: i32) -> (i32, i32) {
    %c0_i32 = arith.constant 0 : i32
    %c0_i32_0 = arith.constant 0 : i32
    %c0_i32_1 = arith.constant 0 : i32
    return %c0_i32, %c0_i32_0 : i32, i32
  }
  func.func @transform_3(%arg0: i32, %arg1: i32) -> (i32, i32, i32, i32) {
    %c0_i32 = arith.constant 0 : i32
    %c0_i32_0 = arith.constant 0 : i32
    %c0_i32_1 = arith.constant 0 : i32
    return %arg0, %arg1, %c0_i32, %c0_i32_0 : i32, i32, i32, i32
  }
}

module attributes {stable_mosaic.version = 11 : i64} {
  func.func @kernel(%arg0: i32, %arg1: i32, %arg2: memref<1x1x18x18x4xf32, #tpu.memory_space<vmem>>, %arg3: memref<9x4x4xbf16, #tpu.memory_space<vmem>>, %arg4: memref<1x16x16x4xf32, #tpu.memory_space<vmem>>, %arg5: memref<1x4xf32, #tpu.memory_space<vmem>>, %arg6: memref<1x4xf32, #tpu.memory_space<vmem>>) attributes {dimension_semantics = [#tpu.dimension_semantics<arbitrary>, #tpu.dimension_semantics<arbitrary>], iteration_bounds = array<i64: 2, 1>, scalar_prefetch = 0 : i64, scratch_operands = 0 : i64, tpu.core_type = #tpu.core_type<tc>, window_params = [{transform_indices = @transform_0, window_bounds = array<i64: 1, 1, 18, 18, 4>}, {pipeline_mode = #tpu.pipeline_mode<synchronous>, transform_indices = @transform_1, window_bounds = array<i64: 9, 4, 4>}, {transform_indices = @transform_2, window_bounds = array<i64: 1, 16, 16, 4>}, {pipeline_mode = #tpu.pipeline_mode<synchronous>, transform_indices = @transform_3, window_bounds = array<i64: 1, 4>}, {pipeline_mode = #tpu.pipeline_mode<synchronous>, transform_indices = @transform_4, window_bounds = array<i64: 1, 4>}]} {
    %cst = arith.constant 0.000000e+00 : f32
    %0 = vector.broadcast %cst : f32 to vector<256x4xf32>
    %c0 = arith.constant 0 : index
    %c0_0 = arith.constant 0 : index
    %c0_1 = arith.constant 0 : index
    %c0_2 = arith.constant 0 : index
    %c0_3 = arith.constant 0 : index
    %1 = vector.load %arg2[%c0, %c0_0, %c0_1, %c0_2, %c0_3] : memref<1x1x18x18x4xf32, #tpu.memory_space<vmem>>, vector<1x1x16x16x4xf32>
    %2 = vector.shape_cast %1 : vector<1x1x16x16x4xf32> to vector<16x16x4xf32>
    %3 = vector.shape_cast %2 : vector<16x16x4xf32> to vector<256x4xf32>
    %4 = arith.truncf %3 : vector<256x4xf32> to vector<256x4xbf16>
    %c0_4 = arith.constant 0 : index
    %c0_5 = arith.constant 0 : index
    %c0_6 = arith.constant 0 : index
    %5 = vector.load %arg3[%c0_4, %c0_5, %c0_6] : memref<9x4x4xbf16, #tpu.memory_space<vmem>>, vector<1x4x4xbf16>
    %6 = vector.shape_cast %5 : vector<1x4x4xbf16> to vector<4x4xbf16>
    %cst_7 = arith.constant dense<0.000000e+00> : vector<256x4xf32>
    %7 = tpu.matmul %4, %6, %cst_7 {dimension_numbers = #tpu.dot_dimension_numbers<[1], [0], [0], [1], [0, 0, 1, 1], [], []>} : vector<256x4xbf16>, vector<4x4xbf16>, vector<256x4xf32> -> vector<256x4xf32>
    %8 = arith.addf %0, %7 : vector<256x4xf32>
    %c0_8 = arith.constant 0 : index
    %c0_9 = arith.constant 0 : index
    %c0_10 = arith.constant 0 : index
    %c1 = arith.constant 1 : index
    %c0_11 = arith.constant 0 : index
    %9 = vector.load %arg2[%c0_8, %c0_9, %c0_10, %c1, %c0_11] : memref<1x1x18x18x4xf32, #tpu.memory_space<vmem>>, vector<1x1x16x16x4xf32>
    %10 = vector.shape_cast %9 : vector<1x1x16x16x4xf32> to vector<16x16x4xf32>
    %11 = vector.shape_cast %10 : vector<16x16x4xf32> to vector<256x4xf32>
    %12 = arith.truncf %11 : vector<256x4xf32> to vector<256x4xbf16>
    %c1_12 = arith.constant 1 : index
    %c0_13 = arith.constant 0 : index
    %c0_14 = arith.constant 0 : index
    %13 = vector.load %arg3[%c1_12, %c0_13, %c0_14] : memref<9x4x4xbf16, #tpu.memory_space<vmem>>, vector<1x4x4xbf16>
    %14 = vector.shape_cast %13 : vector<1x4x4xbf16> to vector<4x4xbf16>
    %cst_15 = arith.constant dense<0.000000e+00> : vector<256x4xf32>
    %15 = tpu.matmul %12, %14, %cst_15 {dimension_numbers = #tpu.dot_dimension_numbers<[1], [0], [0], [1], [0, 0, 1, 1], [], []>} : vector<256x4xbf16>, vector<4x4xbf16>, vector<256x4xf32> -> vector<256x4xf32>
    %16 = arith.addf %8, %15 : vector<256x4xf32>
    %c0_16 = arith.constant 0 : index
    %c0_17 = arith.constant 0 : index
    %c0_18 = arith.constant 0 : index
    %c2 = arith.constant 2 : index
    %c0_19 = arith.constant 0 : index
    %17 = vector.load %arg2[%c0_16, %c0_17, %c0_18, %c2, %c0_19] : memref<1x1x18x18x4xf32, #tpu.memory_space<vmem>>, vector<1x1x16x16x4xf32>
    %18 = vector.shape_cast %17 : vector<1x1x16x16x4xf32> to vector<16x16x4xf32>
    %19 = vector.shape_cast %18 : vector<16x16x4xf32> to vector<256x4xf32>
    %20 = arith.truncf %19 : vector<256x4xf32> to vector<256x4xbf16>
    %c2_20 = arith.constant 2 : index
    %c0_21 = arith.constant 0 : index
    %c0_22 = arith.constant 0 : index
    %21 = vector.load %arg3[%c2_20, %c0_21, %c0_22] : memref<9x4x4xbf16, #tpu.memory_space<vmem>>, vector<1x4x4xbf16>
    %22 = vector.shape_cast %21 : vector<1x4x4xbf16> to vector<4x4xbf16>
    %cst_23 = arith.constant dense<0.000000e+00> : vector<256x4xf32>
    %23 = tpu.matmul %20, %22, %cst_23 {dimension_numbers = #tpu.dot_dimension_numbers<[1], [0], [0], [1], [0, 0, 1, 1], [], []>} : vector<256x4xbf16>, vector<4x4xbf16>, vector<256x4xf32> -> vector<256x4xf32>
    %24 = arith.addf %16, %23 : vector<256x4xf32>
    %c0_24 = arith.constant 0 : index
    %c0_25 = arith.constant 0 : index
    %c1_26 = arith.constant 1 : index
    %c0_27 = arith.constant 0 : index
    %c0_28 = arith.constant 0 : index
    %25 = vector.load %arg2[%c0_24, %c0_25, %c1_26, %c0_27, %c0_28] : memref<1x1x18x18x4xf32, #tpu.memory_space<vmem>>, vector<1x1x16x16x4xf32>
    %26 = vector.shape_cast %25 : vector<1x1x16x16x4xf32> to vector<16x16x4xf32>
    %27 = vector.shape_cast %26 : vector<16x16x4xf32> to vector<256x4xf32>
    %28 = arith.truncf %27 : vector<256x4xf32> to vector<256x4xbf16>
    %c3 = arith.constant 3 : index
    %c0_29 = arith.constant 0 : index
    %c0_30 = arith.constant 0 : index
    %29 = vector.load %arg3[%c3, %c0_29, %c0_30] : memref<9x4x4xbf16, #tpu.memory_space<vmem>>, vector<1x4x4xbf16>
    %30 = vector.shape_cast %29 : vector<1x4x4xbf16> to vector<4x4xbf16>
    %cst_31 = arith.constant dense<0.000000e+00> : vector<256x4xf32>
    %31 = tpu.matmul %28, %30, %cst_31 {dimension_numbers = #tpu.dot_dimension_numbers<[1], [0], [0], [1], [0, 0, 1, 1], [], []>} : vector<256x4xbf16>, vector<4x4xbf16>, vector<256x4xf32> -> vector<256x4xf32>
    %32 = arith.addf %24, %31 : vector<256x4xf32>
    %c0_32 = arith.constant 0 : index
    %c0_33 = arith.constant 0 : index
    %c1_34 = arith.constant 1 : index
    %c1_35 = arith.constant 1 : index
    %c0_36 = arith.constant 0 : index
    %33 = vector.load %arg2[%c0_32, %c0_33, %c1_34, %c1_35, %c0_36] : memref<1x1x18x18x4xf32, #tpu.memory_space<vmem>>, vector<1x1x16x16x4xf32>
    %34 = vector.shape_cast %33 : vector<1x1x16x16x4xf32> to vector<16x16x4xf32>
    %35 = vector.shape_cast %34 : vector<16x16x4xf32> to vector<256x4xf32>
    %36 = arith.truncf %35 : vector<256x4xf32> to vector<256x4xbf16>
    %c4 = arith.constant 4 : index
    %c0_37 = arith.constant 0 : index
    %c0_38 = arith.constant 0 : index
    %37 = vector.load %arg3[%c4, %c0_37, %c0_38] : memref<9x4x4xbf16, #tpu.memory_space<vmem>>, vector<1x4x4xbf16>
    %38 = vector.shape_cast %37 : vector<1x4x4xbf16> to vector<4x4xbf16>
    %cst_39 = arith.constant dense<0.000000e+00> : vector<256x4xf32>
    %39 = tpu.matmul %36, %38, %cst_39 {dimension_numbers = #tpu.dot_dimension_numbers<[1], [0], [0], [1], [0, 0, 1, 1], [], []>} : vector<256x4xbf16>, vector<4x4xbf16>, vector<256x4xf32> -> vector<256x4xf32>
    %40 = arith.addf %32, %39 : vector<256x4xf32>
    %c0_40 = arith.constant 0 : index
    %c0_41 = arith.constant 0 : index
    %c1_42 = arith.constant 1 : index
    %c2_43 = arith.constant 2 : index
    %c0_44 = arith.constant 0 : index
    %41 = vector.load %arg2[%c0_40, %c0_41, %c1_42, %c2_43, %c0_44] : memref<1x1x18x18x4xf32, #tpu.memory_space<vmem>>, vector<1x1x16x16x4xf32>
    %42 = vector.shape_cast %41 : vector<1x1x16x16x4xf32> to vector<16x16x4xf32>
    %43 = vector.shape_cast %42 : vector<16x16x4xf32> to vector<256x4xf32>
    %44 = arith.truncf %43 : vector<256x4xf32> to vector<256x4xbf16>
    %c5 = arith.constant 5 : index
    %c0_45 = arith.constant 0 : index
    %c0_46 = arith.constant 0 : index
    %45 = vector.load %arg3[%c5, %c0_45, %c0_46] : memref<9x4x4xbf16, #tpu.memory_space<vmem>>, vector<1x4x4xbf16>
    %46 = vector.shape_cast %45 : vector<1x4x4xbf16> to vector<4x4xbf16>
    %cst_47 = arith.constant dense<0.000000e+00> : vector<256x4xf32>
    %47 = tpu.matmul %44, %46, %cst_47 {dimension_numbers = #tpu.dot_dimension_numbers<[1], [0], [0], [1], [0, 0, 1, 1], [], []>} : vector<256x4xbf16>, vector<4x4xbf16>, vector<256x4xf32> -> vector<256x4xf32>
    %48 = arith.addf %40, %47 : vector<256x4xf32>
    %c0_48 = arith.constant 0 : index
    %c0_49 = arith.constant 0 : index
    %c2_50 = arith.constant 2 : index
    %c0_51 = arith.constant 0 : index
    %c0_52 = arith.constant 0 : index
    %49 = vector.load %arg2[%c0_48, %c0_49, %c2_50, %c0_51, %c0_52] : memref<1x1x18x18x4xf32, #tpu.memory_space<vmem>>, vector<1x1x16x16x4xf32>
    %50 = vector.shape_cast %49 : vector<1x1x16x16x4xf32> to vector<16x16x4xf32>
    %51 = vector.shape_cast %50 : vector<16x16x4xf32> to vector<256x4xf32>
    %52 = arith.truncf %51 : vector<256x4xf32> to vector<256x4xbf16>
    %c6 = arith.constant 6 : index
    %c0_53 = arith.constant 0 : index
    %c0_54 = arith.constant 0 : index
    %53 = vector.load %arg3[%c6, %c0_53, %c0_54] : memref<9x4x4xbf16, #tpu.memory_space<vmem>>, vector<1x4x4xbf16>
    %54 = vector.shape_cast %53 : vector<1x4x4xbf16> to vector<4x4xbf16>
    %cst_55 = arith.constant dense<0.000000e+00> : vector<256x4xf32>
    %55 = tpu.matmul %52, %54, %cst_55 {dimension_numbers = #tpu.dot_dimension_numbers<[1], [0], [0], [1], [0, 0, 1, 1], [], []>} : vector<256x4xbf16>, vector<4x4xbf16>, vector<256x4xf32> -> vector<256x4xf32>
    %56 = arith.addf %48, %55 : vector<256x4xf32>
    %c0_56 = arith.constant 0 : index
    %c0_57 = arith.constant 0 : index
    %c2_58 = arith.constant 2 : index
    %c1_59 = arith.constant 1 : index
    %c0_60 = arith.constant 0 : index
    %57 = vector.load %arg2[%c0_56, %c0_57, %c2_58, %c1_59, %c0_60] : memref<1x1x18x18x4xf32, #tpu.memory_space<vmem>>, vector<1x1x16x16x4xf32>
    %58 = vector.shape_cast %57 : vector<1x1x16x16x4xf32> to vector<16x16x4xf32>
    %59 = vector.shape_cast %58 : vector<16x16x4xf32> to vector<256x4xf32>
    %60 = arith.truncf %59 : vector<256x4xf32> to vector<256x4xbf16>
    %c7 = arith.constant 7 : index
    %c0_61 = arith.constant 0 : index
    %c0_62 = arith.constant 0 : index
    %61 = vector.load %arg3[%c7, %c0_61, %c0_62] : memref<9x4x4xbf16, #tpu.memory_space<vmem>>, vector<1x4x4xbf16>
    %62 = vector.shape_cast %61 : vector<1x4x4xbf16> to vector<4x4xbf16>
    %cst_63 = arith.constant dense<0.000000e+00> : vector<256x4xf32>
    %63 = tpu.matmul %60, %62, %cst_63 {dimension_numbers = #tpu.dot_dimension_numbers<[1], [0], [0], [1], [0, 0, 1, 1], [], []>} : vector<256x4xbf16>, vector<4x4xbf16>, vector<256x4xf32> -> vector<256x4xf32>
    %64 = arith.addf %56, %63 : vector<256x4xf32>
    %c0_64 = arith.constant 0 : index
    %c0_65 = arith.constant 0 : index
    %c2_66 = arith.constant 2 : index
    %c2_67 = arith.constant 2 : index
    %c0_68 = arith.constant 0 : index
    %65 = vector.load %arg2[%c0_64, %c0_65, %c2_66, %c2_67, %c0_68] : memref<1x1x18x18x4xf32, #tpu.memory_space<vmem>>, vector<1x1x16x16x4xf32>
    %66 = vector.shape_cast %65 : vector<1x1x16x16x4xf32> to vector<16x16x4xf32>
    %67 = vector.shape_cast %66 : vector<16x16x4xf32> to vector<256x4xf32>
    %68 = arith.truncf %67 : vector<256x4xf32> to vector<256x4xbf16>
    %c8 = arith.constant 8 : index
    %c0_69 = arith.constant 0 : index
    %c0_70 = arith.constant 0 : index
    %69 = vector.load %arg3[%c8, %c0_69, %c0_70] : memref<9x4x4xbf16, #tpu.memory_space<vmem>>, vector<1x4x4xbf16>
    %70 = vector.shape_cast %69 : vector<1x4x4xbf16> to vector<4x4xbf16>
    %cst_71 = arith.constant dense<0.000000e+00> : vector<256x4xf32>
    %71 = tpu.matmul %68, %70, %cst_71 {dimension_numbers = #tpu.dot_dimension_numbers<[1], [0], [0], [1], [0, 0, 1, 1], [], []>} : vector<256x4xbf16>, vector<4x4xbf16>, vector<256x4xf32> -> vector<256x4xf32>
    %72 = arith.addf %64, %71 : vector<256x4xf32>
    %73 = vector.shape_cast %72 : vector<256x4xf32> to vector<1x16x16x4xf32>
    %c0_72 = arith.constant 0 : index
    %c0_73 = arith.constant 0 : index
    %c0_74 = arith.constant 0 : index
    %c0_75 = arith.constant 0 : index
    %74 = vector.load %arg4[%c0_72, %c0_73, %c0_74, %c0_75] : memref<1x16x16x4xf32, #tpu.memory_space<vmem>>, vector<1x16x16x4xf32>
    tpu.vector_store %arg4[%c0_72, %c0_73, %c0_74, %c0_75], %73 {strides = array<i32>} : memref<1x16x16x4xf32, #tpu.memory_space<vmem>>, vector<1x16x16x4xf32>,
    %c0_i32 = arith.constant 0 : i32
    %75 = arith.cmpi eq, %arg0, %c0_i32 : i32
    %c0_i32_76 = arith.constant 0 : i32
    %76 = arith.cmpi eq, %arg1, %c0_i32_76 : i32
    %77 = arith.andi %75, %76 : i1
    %78 = arith.extui %77 : i1 to i32
    %c0_i32_77 = arith.constant 0 : i32
    %79 = arith.cmpi ne, %78, %c0_i32_77 : i32
    scf.if %79 {
      %cst_88 = arith.constant 0.000000e+00 : f32
      %91 = vector.broadcast %cst_88 : f32 to vector<1x4xf32>
      %c0_89 = arith.constant 0 : index
      %c0_90 = arith.constant 0 : index
      %92 = vector.load %arg5[%c0_89, %c0_90] : memref<1x4xf32, #tpu.memory_space<vmem>>, vector<1x4xf32>
      tpu.vector_store %arg5[%c0_89, %c0_90], %91 {strides = array<i32>} : memref<1x4xf32, #tpu.memory_space<vmem>>, vector<1x4xf32>,
      %cst_91 = arith.constant 0.000000e+00 : f32
      %93 = vector.broadcast %cst_91 : f32 to vector<1x4xf32>
      %c0_92 = arith.constant 0 : index
      %c0_93 = arith.constant 0 : index
      %94 = vector.load %arg6[%c0_92, %c0_93] : memref<1x4xf32, #tpu.memory_space<vmem>>, vector<1x4xf32>
      tpu.vector_store %arg6[%c0_92, %c0_93], %93 {strides = array<i32>} : memref<1x4xf32, #tpu.memory_space<vmem>>, vector<1x4xf32>,
    } else {
    }
    %c0_78 = arith.constant 0 : index
    %c0_79 = arith.constant 0 : index
    %80 = vector.load %arg5[%c0_78, %c0_79] : memref<1x4xf32, #tpu.memory_space<vmem>>, vector<1x4xf32>
    %cst_80 = arith.constant dense<0.000000e+00> : vector<4xf32>
    %81 = vector.multi_reduction <add>, %72, %cst_80 [0] : vector<256x4xf32> to vector<4xf32>
    %82 = vector.shape_cast %81 : vector<4xf32> to vector<1x4xf32>
    %83 = arith.addf %80, %82 : vector<1x4xf32>
    %c0_81 = arith.constant 0 : index
    %c0_82 = arith.constant 0 : index
    %84 = vector.load %arg5[%c0_81, %c0_82] : memref<1x4xf32, #tpu.memory_space<vmem>>, vector<1x4xf32>
    tpu.vector_store %arg5[%c0_81, %c0_82], %83 {strides = array<i32>} : memref<1x4xf32, #tpu.memory_space<vmem>>, vector<1x4xf32>,
    %c0_83 = arith.constant 0 : index
    %c0_84 = arith.constant 0 : index
    %85 = vector.load %arg6[%c0_83, %c0_84] : memref<1x4xf32, #tpu.memory_space<vmem>>, vector<1x4xf32>
    %86 = arith.mulf %72, %72 : vector<256x4xf32>
    %cst_85 = arith.constant dense<0.000000e+00> : vector<4xf32>
    %87 = vector.multi_reduction <add>, %86, %cst_85 [0] : vector<256x4xf32> to vector<4xf32>
    %88 = vector.shape_cast %87 : vector<4xf32> to vector<1x4xf32>
    %89 = arith.addf %85, %88 : vector<1x4xf32>
    %c0_86 = arith.constant 0 : index
    %c0_87 = arith.constant 0 : index
    %90 = vector.load %arg6[%c0_86, %c0_87] : memref<1x4xf32, #tpu.memory_space<vmem>>, vector<1x4xf32>
    tpu.vector_store %arg6[%c0_86, %c0_87], %89 {strides = array<i32>} : memref<1x4xf32, #tpu.memory_space<vmem>>, vector<1x4xf32>,
    return
  }
  func.func @transform_0(%arg0: i32, %arg1: i32) -> (i32, i32, i32, i32, i32) {
    %c0_i32 = arith.constant 0 : i32
    %c0_i32_0 = arith.constant 0 : i32
    %c0_i32_1 = arith.constant 0 : i32
    %c0_i32_2 = arith.constant 0 : i32
    return %arg0, %arg1, %c0_i32, %c0_i32_0, %c0_i32_1 : i32, i32, i32, i32, i32
  }
  func.func @transform_1(%arg0: i32, %arg1: i32) -> (i32, i32, i32) {
    %c0_i32 = arith.constant 0 : i32
    %c0_i32_0 = arith.constant 0 : i32
    %c0_i32_1 = arith.constant 0 : i32
    %c0_i32_2 = arith.constant 0 : i32
    return %c0_i32, %c0_i32_0, %c0_i32_1 : i32, i32, i32
  }
  func.func @transform_2(%arg0: i32, %arg1: i32) -> (i32, i32, i32, i32) {
    %c0_i32 = arith.constant 0 : i32
    %c0_i32_0 = arith.constant 0 : i32
    %c0_i32_1 = arith.constant 0 : i32
    return %arg0, %arg1, %c0_i32, %c0_i32_0 : i32, i32, i32, i32
  }
  func.func @transform_3(%arg0: i32, %arg1: i32) -> (i32, i32) {
    %c0_i32 = arith.constant 0 : i32
    %c0_i32_0 = arith.constant 0 : i32
    %c0_i32_1 = arith.constant 0 : i32
    return %c0_i32, %c0_i32_0 : i32, i32
  }
  func.func @transform_4(%arg0: i32, %arg1: i32) -> (i32, i32) {
    %c0_i32 = arith.constant 0 : i32
    %c0_i32_0 = arith.constant 0 : i32
    %c0_i32_1 = arith.constant 0 : i32
    return %c0_i32, %c0_i32_0 : i32, i32
  }
}

module attributes {stable_mosaic.version = 11 : i64} {
  func.func @_bn_relu_kernel(%arg0: i32, %arg1: i32, %arg2: memref<1x16x16x4xf32, #tpu.memory_space<vmem>>, %arg3: memref<1x4xf32, #tpu.memory_space<vmem>>, %arg4: memref<1x4xf32, #tpu.memory_space<vmem>>, %arg5: memref<1x16x16x4xf32, #tpu.memory_space<vmem>>) attributes {dimension_semantics = [#tpu.dimension_semantics<parallel>, #tpu.dimension_semantics<parallel>], iteration_bounds = array<i64: 2, 1>, scalar_prefetch = 0 : i64, scratch_operands = 0 : i64, tpu.core_type = #tpu.core_type<tc>, window_params = [{transform_indices = @transform_0, window_bounds = array<i64: 1, 16, 16, 4>}, {pipeline_mode = #tpu.pipeline_mode<synchronous>, transform_indices = @transform_1, window_bounds = array<i64: 1, 4>}, {pipeline_mode = #tpu.pipeline_mode<synchronous>, transform_indices = @transform_2, window_bounds = array<i64: 1, 4>}, {transform_indices = @transform_3, window_bounds = array<i64: 1, 16, 16, 4>}]} {
    %c0 = arith.constant 0 : index
    %c0_0 = arith.constant 0 : index
    %c0_1 = arith.constant 0 : index
    %c0_2 = arith.constant 0 : index
    %0 = vector.load %arg2[%c0, %c0_0, %c0_1, %c0_2] : memref<1x16x16x4xf32, #tpu.memory_space<vmem>>, vector<1x16x16x4xf32>
    %1 = vector.shape_cast %0 : vector<1x16x16x4xf32> to vector<16x16x4xf32>
    %c0_3 = arith.constant 0 : index
    %c0_4 = arith.constant 0 : index
    %2 = vector.load %arg3[%c0_3, %c0_4] : memref<1x4xf32, #tpu.memory_space<vmem>>, vector<1x4xf32>
    %3 = vector.shape_cast %2 : vector<1x4xf32> to vector<1x1x4xf32>
    %4 = vector.broadcast %3 : vector<1x1x4xf32> to vector<16x16x4xf32>
    %5 = arith.mulf %1, %4 : vector<16x16x4xf32>
    %c0_5 = arith.constant 0 : index
    %c0_6 = arith.constant 0 : index
    %6 = vector.load %arg4[%c0_5, %c0_6] : memref<1x4xf32, #tpu.memory_space<vmem>>, vector<1x4xf32>
    %7 = vector.shape_cast %6 : vector<1x4xf32> to vector<1x1x4xf32>
    %8 = vector.broadcast %7 : vector<1x1x4xf32> to vector<16x16x4xf32>
    %9 = arith.addf %5, %8 : vector<16x16x4xf32>
    %cst = arith.constant 0.000000e+00 : f32
    %10 = vector.broadcast %cst : f32 to vector<16x16x4xf32>
    %11 = arith.maximumf %9, %10 : vector<16x16x4xf32>
    %12 = vector.shape_cast %11 : vector<16x16x4xf32> to vector<1x16x16x4xf32>
    %c0_7 = arith.constant 0 : index
    %c0_8 = arith.constant 0 : index
    %c0_9 = arith.constant 0 : index
    %c0_10 = arith.constant 0 : index
    %13 = vector.load %arg5[%c0_7, %c0_8, %c0_9, %c0_10] : memref<1x16x16x4xf32, #tpu.memory_space<vmem>>, vector<1x16x16x4xf32>
    tpu.vector_store %arg5[%c0_7, %c0_8, %c0_9, %c0_10], %12 {strides = array<i32>} : memref<1x16x16x4xf32, #tpu.memory_space<vmem>>, vector<1x16x16x4xf32>,
    return
  }
  func.func @transform_0(%arg0: i32, %arg1: i32) -> (i32, i32, i32, i32) {
    %c0_i32 = arith.constant 0 : i32
    %c0_i32_0 = arith.constant 0 : i32
    %c0_i32_1 = arith.constant 0 : i32
    return %arg0, %arg1, %c0_i32, %c0_i32_0 : i32, i32, i32, i32
  }
  func.func @transform_1(%arg0: i32, %arg1: i32) -> (i32, i32) {
    %c0_i32 = arith.constant 0 : i32
    %c0_i32_0 = arith.constant 0 : i32
    %c0_i32_1 = arith.constant 0 : i32
    return %c0_i32, %c0_i32_0 : i32, i32
  }
  func.func @transform_2(%arg0: i32, %arg1: i32) -> (i32, i32) {
    %c0_i32 = arith.constant 0 : i32
    %c0_i32_0 = arith.constant 0 : i32
    %c0_i32_1 = arith.constant 0 : i32
    return %c0_i32, %c0_i32_0 : i32, i32
  }
  func.func @transform_3(%arg0: i32, %arg1: i32) -> (i32, i32, i32, i32) {
    %c0_i32 = arith.constant 0 : i32
    %c0_i32_0 = arith.constant 0 : i32
    %c0_i32_1 = arith.constant 0 : i32
    return %arg0, %arg1, %c0_i32, %c0_i32_0 : i32, i32, i32, i32
  }
}

module attributes {stable_mosaic.version = 11 : i64} {
  func.func @_conv_relu_kernel(%arg0: i32, %arg1: i32, %arg2: memref<1x1x10x10x4xf32, #tpu.memory_space<vmem>>, %arg3: memref<9x4x8xbf16, #tpu.memory_space<vmem>>, %arg4: memref<1x8xf32, #tpu.memory_space<vmem>>, %arg5: memref<1x8x8x8xf32, #tpu.memory_space<vmem>>) attributes {dimension_semantics = [#tpu.dimension_semantics<parallel>, #tpu.dimension_semantics<parallel>], iteration_bounds = array<i64: 2, 1>, scalar_prefetch = 0 : i64, scratch_operands = 0 : i64, tpu.core_type = #tpu.core_type<tc>, window_params = [{transform_indices = @transform_0, window_bounds = array<i64: 1, 1, 10, 10, 4>}, {pipeline_mode = #tpu.pipeline_mode<synchronous>, transform_indices = @transform_1, window_bounds = array<i64: 9, 4, 8>}, {pipeline_mode = #tpu.pipeline_mode<synchronous>, transform_indices = @transform_2, window_bounds = array<i64: 1, 8>}, {transform_indices = @transform_3, window_bounds = array<i64: 1, 8, 8, 8>}]} {
    %cst = arith.constant 0.000000e+00 : f32
    %0 = vector.broadcast %cst : f32 to vector<64x8xf32>
    %c0 = arith.constant 0 : index
    %c0_0 = arith.constant 0 : index
    %c0_1 = arith.constant 0 : index
    %c0_2 = arith.constant 0 : index
    %c0_3 = arith.constant 0 : index
    %1 = vector.load %arg2[%c0, %c0_0, %c0_1, %c0_2, %c0_3] : memref<1x1x10x10x4xf32, #tpu.memory_space<vmem>>, vector<1x1x8x8x4xf32>
    %2 = vector.shape_cast %1 : vector<1x1x8x8x4xf32> to vector<8x8x4xf32>
    %3 = vector.shape_cast %2 : vector<8x8x4xf32> to vector<64x4xf32>
    %4 = arith.truncf %3 : vector<64x4xf32> to vector<64x4xbf16>
    %c0_4 = arith.constant 0 : index
    %c0_5 = arith.constant 0 : index
    %c0_6 = arith.constant 0 : index
    %5 = vector.load %arg3[%c0_4, %c0_5, %c0_6] : memref<9x4x8xbf16, #tpu.memory_space<vmem>>, vector<1x4x8xbf16>
    %6 = vector.shape_cast %5 : vector<1x4x8xbf16> to vector<4x8xbf16>
    %cst_7 = arith.constant dense<0.000000e+00> : vector<64x8xf32>
    %7 = tpu.matmul %4, %6, %cst_7 {dimension_numbers = #tpu.dot_dimension_numbers<[1], [0], [0], [1], [0, 0, 1, 1], [], []>} : vector<64x4xbf16>, vector<4x8xbf16>, vector<64x8xf32> -> vector<64x8xf32>
    %8 = arith.addf %0, %7 : vector<64x8xf32>
    %c0_8 = arith.constant 0 : index
    %c0_9 = arith.constant 0 : index
    %c0_10 = arith.constant 0 : index
    %c1 = arith.constant 1 : index
    %c0_11 = arith.constant 0 : index
    %9 = vector.load %arg2[%c0_8, %c0_9, %c0_10, %c1, %c0_11] : memref<1x1x10x10x4xf32, #tpu.memory_space<vmem>>, vector<1x1x8x8x4xf32>
    %10 = vector.shape_cast %9 : vector<1x1x8x8x4xf32> to vector<8x8x4xf32>
    %11 = vector.shape_cast %10 : vector<8x8x4xf32> to vector<64x4xf32>
    %12 = arith.truncf %11 : vector<64x4xf32> to vector<64x4xbf16>
    %c1_12 = arith.constant 1 : index
    %c0_13 = arith.constant 0 : index
    %c0_14 = arith.constant 0 : index
    %13 = vector.load %arg3[%c1_12, %c0_13, %c0_14] : memref<9x4x8xbf16, #tpu.memory_space<vmem>>, vector<1x4x8xbf16>
    %14 = vector.shape_cast %13 : vector<1x4x8xbf16> to vector<4x8xbf16>
    %cst_15 = arith.constant dense<0.000000e+00> : vector<64x8xf32>
    %15 = tpu.matmul %12, %14, %cst_15 {dimension_numbers = #tpu.dot_dimension_numbers<[1], [0], [0], [1], [0, 0, 1, 1], [], []>} : vector<64x4xbf16>, vector<4x8xbf16>, vector<64x8xf32> -> vector<64x8xf32>
    %16 = arith.addf %8, %15 : vector<64x8xf32>
    %c0_16 = arith.constant 0 : index
    %c0_17 = arith.constant 0 : index
    %c0_18 = arith.constant 0 : index
    %c2 = arith.constant 2 : index
    %c0_19 = arith.constant 0 : index
    %17 = vector.load %arg2[%c0_16, %c0_17, %c0_18, %c2, %c0_19] : memref<1x1x10x10x4xf32, #tpu.memory_space<vmem>>, vector<1x1x8x8x4xf32>
    %18 = vector.shape_cast %17 : vector<1x1x8x8x4xf32> to vector<8x8x4xf32>
    %19 = vector.shape_cast %18 : vector<8x8x4xf32> to vector<64x4xf32>
    %20 = arith.truncf %19 : vector<64x4xf32> to vector<64x4xbf16>
    %c2_20 = arith.constant 2 : index
    %c0_21 = arith.constant 0 : index
    %c0_22 = arith.constant 0 : index
    %21 = vector.load %arg3[%c2_20, %c0_21, %c0_22] : memref<9x4x8xbf16, #tpu.memory_space<vmem>>, vector<1x4x8xbf16>
    %22 = vector.shape_cast %21 : vector<1x4x8xbf16> to vector<4x8xbf16>
    %cst_23 = arith.constant dense<0.000000e+00> : vector<64x8xf32>
    %23 = tpu.matmul %20, %22, %cst_23 {dimension_numbers = #tpu.dot_dimension_numbers<[1], [0], [0], [1], [0, 0, 1, 1], [], []>} : vector<64x4xbf16>, vector<4x8xbf16>, vector<64x8xf32> -> vector<64x8xf32>
    %24 = arith.addf %16, %23 : vector<64x8xf32>
    %c0_24 = arith.constant 0 : index
    %c0_25 = arith.constant 0 : index
    %c1_26 = arith.constant 1 : index
    %c0_27 = arith.constant 0 : index
    %c0_28 = arith.constant 0 : index
    %25 = vector.load %arg2[%c0_24, %c0_25, %c1_26, %c0_27, %c0_28] : memref<1x1x10x10x4xf32, #tpu.memory_space<vmem>>, vector<1x1x8x8x4xf32>
    %26 = vector.shape_cast %25 : vector<1x1x8x8x4xf32> to vector<8x8x4xf32>
    %27 = vector.shape_cast %26 : vector<8x8x4xf32> to vector<64x4xf32>
    %28 = arith.truncf %27 : vector<64x4xf32> to vector<64x4xbf16>
    %c3 = arith.constant 3 : index
    %c0_29 = arith.constant 0 : index
    %c0_30 = arith.constant 0 : index
    %29 = vector.load %arg3[%c3, %c0_29, %c0_30] : memref<9x4x8xbf16, #tpu.memory_space<vmem>>, vector<1x4x8xbf16>
    %30 = vector.shape_cast %29 : vector<1x4x8xbf16> to vector<4x8xbf16>
    %cst_31 = arith.constant dense<0.000000e+00> : vector<64x8xf32>
    %31 = tpu.matmul %28, %30, %cst_31 {dimension_numbers = #tpu.dot_dimension_numbers<[1], [0], [0], [1], [0, 0, 1, 1], [], []>} : vector<64x4xbf16>, vector<4x8xbf16>, vector<64x8xf32> -> vector<64x8xf32>
    %32 = arith.addf %24, %31 : vector<64x8xf32>
    %c0_32 = arith.constant 0 : index
    %c0_33 = arith.constant 0 : index
    %c1_34 = arith.constant 1 : index
    %c1_35 = arith.constant 1 : index
    %c0_36 = arith.constant 0 : index
    %33 = vector.load %arg2[%c0_32, %c0_33, %c1_34, %c1_35, %c0_36] : memref<1x1x10x10x4xf32, #tpu.memory_space<vmem>>, vector<1x1x8x8x4xf32>
    %34 = vector.shape_cast %33 : vector<1x1x8x8x4xf32> to vector<8x8x4xf32>
    %35 = vector.shape_cast %34 : vector<8x8x4xf32> to vector<64x4xf32>
    %36 = arith.truncf %35 : vector<64x4xf32> to vector<64x4xbf16>
    %c4 = arith.constant 4 : index
    %c0_37 = arith.constant 0 : index
    %c0_38 = arith.constant 0 : index
    %37 = vector.load %arg3[%c4, %c0_37, %c0_38] : memref<9x4x8xbf16, #tpu.memory_space<vmem>>, vector<1x4x8xbf16>
    %38 = vector.shape_cast %37 : vector<1x4x8xbf16> to vector<4x8xbf16>
    %cst_39 = arith.constant dense<0.000000e+00> : vector<64x8xf32>
    %39 = tpu.matmul %36, %38, %cst_39 {dimension_numbers = #tpu.dot_dimension_numbers<[1], [0], [0], [1], [0, 0, 1, 1], [], []>} : vector<64x4xbf16>, vector<4x8xbf16>, vector<64x8xf32> -> vector<64x8xf32>
    %40 = arith.addf %32, %39 : vector<64x8xf32>
    %c0_40 = arith.constant 0 : index
    %c0_41 = arith.constant 0 : index
    %c1_42 = arith.constant 1 : index
    %c2_43 = arith.constant 2 : index
    %c0_44 = arith.constant 0 : index
    %41 = vector.load %arg2[%c0_40, %c0_41, %c1_42, %c2_43, %c0_44] : memref<1x1x10x10x4xf32, #tpu.memory_space<vmem>>, vector<1x1x8x8x4xf32>
    %42 = vector.shape_cast %41 : vector<1x1x8x8x4xf32> to vector<8x8x4xf32>
    %43 = vector.shape_cast %42 : vector<8x8x4xf32> to vector<64x4xf32>
    %44 = arith.truncf %43 : vector<64x4xf32> to vector<64x4xbf16>
    %c5 = arith.constant 5 : index
    %c0_45 = arith.constant 0 : index
    %c0_46 = arith.constant 0 : index
    %45 = vector.load %arg3[%c5, %c0_45, %c0_46] : memref<9x4x8xbf16, #tpu.memory_space<vmem>>, vector<1x4x8xbf16>
    %46 = vector.shape_cast %45 : vector<1x4x8xbf16> to vector<4x8xbf16>
    %cst_47 = arith.constant dense<0.000000e+00> : vector<64x8xf32>
    %47 = tpu.matmul %44, %46, %cst_47 {dimension_numbers = #tpu.dot_dimension_numbers<[1], [0], [0], [1], [0, 0, 1, 1], [], []>} : vector<64x4xbf16>, vector<4x8xbf16>, vector<64x8xf32> -> vector<64x8xf32>
    %48 = arith.addf %40, %47 : vector<64x8xf32>
    %c0_48 = arith.constant 0 : index
    %c0_49 = arith.constant 0 : index
    %c2_50 = arith.constant 2 : index
    %c0_51 = arith.constant 0 : index
    %c0_52 = arith.constant 0 : index
    %49 = vector.load %arg2[%c0_48, %c0_49, %c2_50, %c0_51, %c0_52] : memref<1x1x10x10x4xf32, #tpu.memory_space<vmem>>, vector<1x1x8x8x4xf32>
    %50 = vector.shape_cast %49 : vector<1x1x8x8x4xf32> to vector<8x8x4xf32>
    %51 = vector.shape_cast %50 : vector<8x8x4xf32> to vector<64x4xf32>
    %52 = arith.truncf %51 : vector<64x4xf32> to vector<64x4xbf16>
    %c6 = arith.constant 6 : index
    %c0_53 = arith.constant 0 : index
    %c0_54 = arith.constant 0 : index
    %53 = vector.load %arg3[%c6, %c0_53, %c0_54] : memref<9x4x8xbf16, #tpu.memory_space<vmem>>, vector<1x4x8xbf16>
    %54 = vector.shape_cast %53 : vector<1x4x8xbf16> to vector<4x8xbf16>
    %cst_55 = arith.constant dense<0.000000e+00> : vector<64x8xf32>
    %55 = tpu.matmul %52, %54, %cst_55 {dimension_numbers = #tpu.dot_dimension_numbers<[1], [0], [0], [1], [0, 0, 1, 1], [], []>} : vector<64x4xbf16>, vector<4x8xbf16>, vector<64x8xf32> -> vector<64x8xf32>
    %56 = arith.addf %48, %55 : vector<64x8xf32>
    %c0_56 = arith.constant 0 : index
    %c0_57 = arith.constant 0 : index
    %c2_58 = arith.constant 2 : index
    %c1_59 = arith.constant 1 : index
    %c0_60 = arith.constant 0 : index
    %57 = vector.load %arg2[%c0_56, %c0_57, %c2_58, %c1_59, %c0_60] : memref<1x1x10x10x4xf32, #tpu.memory_space<vmem>>, vector<1x1x8x8x4xf32>
    %58 = vector.shape_cast %57 : vector<1x1x8x8x4xf32> to vector<8x8x4xf32>
    %59 = vector.shape_cast %58 : vector<8x8x4xf32> to vector<64x4xf32>
    %60 = arith.truncf %59 : vector<64x4xf32> to vector<64x4xbf16>
    %c7 = arith.constant 7 : index
    %c0_61 = arith.constant 0 : index
    %c0_62 = arith.constant 0 : index
    %61 = vector.load %arg3[%c7, %c0_61, %c0_62] : memref<9x4x8xbf16, #tpu.memory_space<vmem>>, vector<1x4x8xbf16>
    %62 = vector.shape_cast %61 : vector<1x4x8xbf16> to vector<4x8xbf16>
    %cst_63 = arith.constant dense<0.000000e+00> : vector<64x8xf32>
    %63 = tpu.matmul %60, %62, %cst_63 {dimension_numbers = #tpu.dot_dimension_numbers<[1], [0], [0], [1], [0, 0, 1, 1], [], []>} : vector<64x4xbf16>, vector<4x8xbf16>, vector<64x8xf32> -> vector<64x8xf32>
    %64 = arith.addf %56, %63 : vector<64x8xf32>
    %c0_64 = arith.constant 0 : index
    %c0_65 = arith.constant 0 : index
    %c2_66 = arith.constant 2 : index
    %c2_67 = arith.constant 2 : index
    %c0_68 = arith.constant 0 : index
    %65 = vector.load %arg2[%c0_64, %c0_65, %c2_66, %c2_67, %c0_68] : memref<1x1x10x10x4xf32, #tpu.memory_space<vmem>>, vector<1x1x8x8x4xf32>
    %66 = vector.shape_cast %65 : vector<1x1x8x8x4xf32> to vector<8x8x4xf32>
    %67 = vector.shape_cast %66 : vector<8x8x4xf32> to vector<64x4xf32>
    %68 = arith.truncf %67 : vector<64x4xf32> to vector<64x4xbf16>
    %c8 = arith.constant 8 : index
    %c0_69 = arith.constant 0 : index
    %c0_70 = arith.constant 0 : index
    %69 = vector.load %arg3[%c8, %c0_69, %c0_70] : memref<9x4x8xbf16, #tpu.memory_space<vmem>>, vector<1x4x8xbf16>
    %70 = vector.shape_cast %69 : vector<1x4x8xbf16> to vector<4x8xbf16>
    %cst_71 = arith.constant dense<0.000000e+00> : vector<64x8xf32>
    %71 = tpu.matmul %68, %70, %cst_71 {dimension_numbers = #tpu.dot_dimension_numbers<[1], [0], [0], [1], [0, 0, 1, 1], [], []>} : vector<64x4xbf16>, vector<4x8xbf16>, vector<64x8xf32> -> vector<64x8xf32>
    %72 = arith.addf %64, %71 : vector<64x8xf32>
    %c0_72 = arith.constant 0 : index
    %c0_73 = arith.constant 0 : index
    %73 = vector.load %arg4[%c0_72, %c0_73] : memref<1x8xf32, #tpu.memory_space<vmem>>, vector<1x8xf32>
    %74 = vector.broadcast %73 : vector<1x8xf32> to vector<64x8xf32>
    %75 = arith.addf %72, %74 : vector<64x8xf32>
    %cst_74 = arith.constant 0.000000e+00 : f32
    %76 = vector.broadcast %cst_74 : f32 to vector<64x8xf32>
    %77 = arith.maximumf %75, %76 : vector<64x8xf32>
    %78 = vector.shape_cast %77 : vector<64x8xf32> to vector<1x8x8x8xf32>
    %c0_75 = arith.constant 0 : index
    %c0_76 = arith.constant 0 : index
    %c0_77 = arith.constant 0 : index
    %c0_78 = arith.constant 0 : index
    %79 = vector.load %arg5[%c0_75, %c0_76, %c0_77, %c0_78] : memref<1x8x8x8xf32, #tpu.memory_space<vmem>>, vector<1x8x8x8xf32>
    tpu.vector_store %arg5[%c0_75, %c0_76, %c0_77, %c0_78], %78 {strides = array<i32>} : memref<1x8x8x8xf32, #tpu.memory_space<vmem>>, vector<1x8x8x8xf32>,
    return
  }
  func.func @transform_0(%arg0: i32, %arg1: i32) -> (i32, i32, i32, i32, i32) {
    %c0_i32 = arith.constant 0 : i32
    %c0_i32_0 = arith.constant 0 : i32
    %c0_i32_1 = arith.constant 0 : i32
    %c0_i32_2 = arith.constant 0 : i32
    return %arg0, %arg1, %c0_i32, %c0_i32_0, %c0_i32_1 : i32, i32, i32, i32, i32
  }
  func.func @transform_1(%arg0: i32, %arg1: i32) -> (i32, i32, i32) {
    %c0_i32 = arith.constant 0 : i32
    %c0_i32_0 = arith.constant 0 : i32
    %c0_i32_1 = arith.constant 0 : i32
    %c0_i32_2 = arith.constant 0 : i32
    return %c0_i32, %c0_i32_0, %c0_i32_1 : i32, i32, i32
  }
  func.func @transform_2(%arg0: i32, %arg1: i32) -> (i32, i32) {
    %c0_i32 = arith.constant 0 : i32
    %c0_i32_0 = arith.constant 0 : i32
    %c0_i32_1 = arith.constant 0 : i32
    return %c0_i32, %c0_i32_0 : i32, i32
  }
  func.func @transform_3(%arg0: i32, %arg1: i32) -> (i32, i32, i32, i32) {
    %c0_i32 = arith.constant 0 : i32
    %c0_i32_0 = arith.constant 0 : i32
    %c0_i32_1 = arith.constant 0 : i32
    return %arg0, %arg1, %c0_i32, %c0_i32_0 : i32, i32, i32, i32
  }
}

module attributes {stable_mosaic.version = 11 : i64} {
  func.func @_bn_relu_kernel(%arg0: i32, %arg1: i32, %arg2: memref<1x8x8x8xf32, #tpu.memory_space<vmem>>, %arg3: memref<1x8xf32, #tpu.memory_space<vmem>>, %arg4: memref<1x8xf32, #tpu.memory_space<vmem>>, %arg5: memref<1x8x8x8xf32, #tpu.memory_space<vmem>>) attributes {dimension_semantics = [#tpu.dimension_semantics<parallel>, #tpu.dimension_semantics<parallel>], iteration_bounds = array<i64: 2, 1>, scalar_prefetch = 0 : i64, scratch_operands = 0 : i64, tpu.core_type = #tpu.core_type<tc>, window_params = [{transform_indices = @transform_0, window_bounds = array<i64: 1, 8, 8, 8>}, {pipeline_mode = #tpu.pipeline_mode<synchronous>, transform_indices = @transform_1, window_bounds = array<i64: 1, 8>}, {pipeline_mode = #tpu.pipeline_mode<synchronous>, transform_indices = @transform_2, window_bounds = array<i64: 1, 8>}, {transform_indices = @transform_3, window_bounds = array<i64: 1, 8, 8, 8>}]} {
    %c0 = arith.constant 0 : index
    %c0_0 = arith.constant 0 : index
    %c0_1 = arith.constant 0 : index
    %c0_2 = arith.constant 0 : index
    %0 = vector.load %arg2[%c0, %c0_0, %c0_1, %c0_2] : memref<1x8x8x8xf32, #tpu.memory_space<vmem>>, vector<1x8x8x8xf32>
    %1 = vector.shape_cast %0 : vector<1x8x8x8xf32> to vector<8x8x8xf32>
    %c0_3 = arith.constant 0 : index
    %c0_4 = arith.constant 0 : index
    %2 = vector.load %arg3[%c0_3, %c0_4] : memref<1x8xf32, #tpu.memory_space<vmem>>, vector<1x8xf32>
    %3 = vector.shape_cast %2 : vector<1x8xf32> to vector<1x1x8xf32>
    %4 = vector.broadcast %3 : vector<1x1x8xf32> to vector<8x8x8xf32>
    %5 = arith.mulf %1, %4 : vector<8x8x8xf32>
    %c0_5 = arith.constant 0 : index
    %c0_6 = arith.constant 0 : index
    %6 = vector.load %arg4[%c0_5, %c0_6] : memref<1x8xf32, #tpu.memory_space<vmem>>, vector<1x8xf32>
    %7 = vector.shape_cast %6 : vector<1x8xf32> to vector<1x1x8xf32>
    %8 = vector.broadcast %7 : vector<1x1x8xf32> to vector<8x8x8xf32>
    %9 = arith.addf %5, %8 : vector<8x8x8xf32>
    %cst = arith.constant 0.000000e+00 : f32
    %10 = vector.broadcast %cst : f32 to vector<8x8x8xf32>
    %11 = arith.maximumf %9, %10 : vector<8x8x8xf32>
    %12 = vector.shape_cast %11 : vector<8x8x8xf32> to vector<1x8x8x8xf32>
    %c0_7 = arith.constant 0 : index
    %c0_8 = arith.constant 0 : index
    %c0_9 = arith.constant 0 : index
    %c0_10 = arith.constant 0 : index
    %13 = vector.load %arg5[%c0_7, %c0_8, %c0_9, %c0_10] : memref<1x8x8x8xf32, #tpu.memory_space<vmem>>, vector<1x8x8x8xf32>
    tpu.vector_store %arg5[%c0_7, %c0_8, %c0_9, %c0_10], %12 {strides = array<i32>} : memref<1x8x8x8xf32, #tpu.memory_space<vmem>>, vector<1x8x8x8xf32>,
    return
  }
  func.func @transform_0(%arg0: i32, %arg1: i32) -> (i32, i32, i32, i32) {
    %c0_i32 = arith.constant 0 : i32
    %c0_i32_0 = arith.constant 0 : i32
    %c0_i32_1 = arith.constant 0 : i32
    return %arg0, %arg1, %c0_i32, %c0_i32_0 : i32, i32, i32, i32
  }
  func.func @transform_1(%arg0: i32, %arg1: i32) -> (i32, i32) {
    %c0_i32 = arith.constant 0 : i32
    %c0_i32_0 = arith.constant 0 : i32
    %c0_i32_1 = arith.constant 0 : i32
    return %c0_i32, %c0_i32_0 : i32, i32
  }
  func.func @transform_2(%arg0: i32, %arg1: i32) -> (i32, i32) {
    %c0_i32 = arith.constant 0 : i32
    %c0_i32_0 = arith.constant 0 : i32
    %c0_i32_1 = arith.constant 0 : i32
    return %c0_i32, %c0_i32_0 : i32, i32
  }
  func.func @transform_3(%arg0: i32, %arg1: i32) -> (i32, i32, i32, i32) {
    %c0_i32 = arith.constant 0 : i32
    %c0_i32_0 = arith.constant 0 : i32
    %c0_i32_1 = arith.constant 0 : i32
    return %arg0, %arg1, %c0_i32, %c0_i32_0 : i32, i32, i32, i32
  }
}

module attributes {stable_mosaic.version = 11 : i64} {
  func.func @kernel(%arg0: i32, %arg1: i32, %arg2: memref<1x1x10x10x8xf32, #tpu.memory_space<vmem>>, %arg3: memref<9x8x8xbf16, #tpu.memory_space<vmem>>, %arg4: memref<1x8x8x8xf32, #tpu.memory_space<vmem>>, %arg5: memref<1x8xf32, #tpu.memory_space<vmem>>, %arg6: memref<1x8xf32, #tpu.memory_space<vmem>>) attributes {dimension_semantics = [#tpu.dimension_semantics<arbitrary>, #tpu.dimension_semantics<arbitrary>], iteration_bounds = array<i64: 2, 1>, scalar_prefetch = 0 : i64, scratch_operands = 0 : i64, tpu.core_type = #tpu.core_type<tc>, window_params = [{transform_indices = @transform_0, window_bounds = array<i64: 1, 1, 10, 10, 8>}, {pipeline_mode = #tpu.pipeline_mode<synchronous>, transform_indices = @transform_1, window_bounds = array<i64: 9, 8, 8>}, {transform_indices = @transform_2, window_bounds = array<i64: 1, 8, 8, 8>}, {pipeline_mode = #tpu.pipeline_mode<synchronous>, transform_indices = @transform_3, window_bounds = array<i64: 1, 8>}, {pipeline_mode = #tpu.pipeline_mode<synchronous>, transform_indices = @transform_4, window_bounds = array<i64: 1, 8>}]} {
    %cst = arith.constant 0.000000e+00 : f32
    %0 = vector.broadcast %cst : f32 to vector<64x8xf32>
    %c0 = arith.constant 0 : index
    %c0_0 = arith.constant 0 : index
    %c0_1 = arith.constant 0 : index
    %c0_2 = arith.constant 0 : index
    %c0_3 = arith.constant 0 : index
    %1 = vector.load %arg2[%c0, %c0_0, %c0_1, %c0_2, %c0_3] : memref<1x1x10x10x8xf32, #tpu.memory_space<vmem>>, vector<1x1x8x8x8xf32>
    %2 = vector.shape_cast %1 : vector<1x1x8x8x8xf32> to vector<8x8x8xf32>
    %3 = vector.shape_cast %2 : vector<8x8x8xf32> to vector<64x8xf32>
    %4 = arith.truncf %3 : vector<64x8xf32> to vector<64x8xbf16>
    %c0_4 = arith.constant 0 : index
    %c0_5 = arith.constant 0 : index
    %c0_6 = arith.constant 0 : index
    %5 = vector.load %arg3[%c0_4, %c0_5, %c0_6] : memref<9x8x8xbf16, #tpu.memory_space<vmem>>, vector<1x8x8xbf16>
    %6 = vector.shape_cast %5 : vector<1x8x8xbf16> to vector<8x8xbf16>
    %cst_7 = arith.constant dense<0.000000e+00> : vector<64x8xf32>
    %7 = tpu.matmul %4, %6, %cst_7 {dimension_numbers = #tpu.dot_dimension_numbers<[1], [0], [0], [1], [0, 0, 1, 1], [], []>} : vector<64x8xbf16>, vector<8x8xbf16>, vector<64x8xf32> -> vector<64x8xf32>
    %8 = arith.addf %0, %7 : vector<64x8xf32>
    %c0_8 = arith.constant 0 : index
    %c0_9 = arith.constant 0 : index
    %c0_10 = arith.constant 0 : index
    %c1 = arith.constant 1 : index
    %c0_11 = arith.constant 0 : index
    %9 = vector.load %arg2[%c0_8, %c0_9, %c0_10, %c1, %c0_11] : memref<1x1x10x10x8xf32, #tpu.memory_space<vmem>>, vector<1x1x8x8x8xf32>
    %10 = vector.shape_cast %9 : vector<1x1x8x8x8xf32> to vector<8x8x8xf32>
    %11 = vector.shape_cast %10 : vector<8x8x8xf32> to vector<64x8xf32>
    %12 = arith.truncf %11 : vector<64x8xf32> to vector<64x8xbf16>
    %c1_12 = arith.constant 1 : index
    %c0_13 = arith.constant 0 : index
    %c0_14 = arith.constant 0 : index
    %13 = vector.load %arg3[%c1_12, %c0_13, %c0_14] : memref<9x8x8xbf16, #tpu.memory_space<vmem>>, vector<1x8x8xbf16>
    %14 = vector.shape_cast %13 : vector<1x8x8xbf16> to vector<8x8xbf16>
    %cst_15 = arith.constant dense<0.000000e+00> : vector<64x8xf32>
    %15 = tpu.matmul %12, %14, %cst_15 {dimension_numbers = #tpu.dot_dimension_numbers<[1], [0], [0], [1], [0, 0, 1, 1], [], []>} : vector<64x8xbf16>, vector<8x8xbf16>, vector<64x8xf32> -> vector<64x8xf32>
    %16 = arith.addf %8, %15 : vector<64x8xf32>
    %c0_16 = arith.constant 0 : index
    %c0_17 = arith.constant 0 : index
    %c0_18 = arith.constant 0 : index
    %c2 = arith.constant 2 : index
    %c0_19 = arith.constant 0 : index
    %17 = vector.load %arg2[%c0_16, %c0_17, %c0_18, %c2, %c0_19] : memref<1x1x10x10x8xf32, #tpu.memory_space<vmem>>, vector<1x1x8x8x8xf32>
    %18 = vector.shape_cast %17 : vector<1x1x8x8x8xf32> to vector<8x8x8xf32>
    %19 = vector.shape_cast %18 : vector<8x8x8xf32> to vector<64x8xf32>
    %20 = arith.truncf %19 : vector<64x8xf32> to vector<64x8xbf16>
    %c2_20 = arith.constant 2 : index
    %c0_21 = arith.constant 0 : index
    %c0_22 = arith.constant 0 : index
    %21 = vector.load %arg3[%c2_20, %c0_21, %c0_22] : memref<9x8x8xbf16, #tpu.memory_space<vmem>>, vector<1x8x8xbf16>
    %22 = vector.shape_cast %21 : vector<1x8x8xbf16> to vector<8x8xbf16>
    %cst_23 = arith.constant dense<0.000000e+00> : vector<64x8xf32>
    %23 = tpu.matmul %20, %22, %cst_23 {dimension_numbers = #tpu.dot_dimension_numbers<[1], [0], [0], [1], [0, 0, 1, 1], [], []>} : vector<64x8xbf16>, vector<8x8xbf16>, vector<64x8xf32> -> vector<64x8xf32>
    %24 = arith.addf %16, %23 : vector<64x8xf32>
    %c0_24 = arith.constant 0 : index
    %c0_25 = arith.constant 0 : index
    %c1_26 = arith.constant 1 : index
    %c0_27 = arith.constant 0 : index
    %c0_28 = arith.constant 0 : index
    %25 = vector.load %arg2[%c0_24, %c0_25, %c1_26, %c0_27, %c0_28] : memref<1x1x10x10x8xf32, #tpu.memory_space<vmem>>, vector<1x1x8x8x8xf32>
    %26 = vector.shape_cast %25 : vector<1x1x8x8x8xf32> to vector<8x8x8xf32>
    %27 = vector.shape_cast %26 : vector<8x8x8xf32> to vector<64x8xf32>
    %28 = arith.truncf %27 : vector<64x8xf32> to vector<64x8xbf16>
    %c3 = arith.constant 3 : index
    %c0_29 = arith.constant 0 : index
    %c0_30 = arith.constant 0 : index
    %29 = vector.load %arg3[%c3, %c0_29, %c0_30] : memref<9x8x8xbf16, #tpu.memory_space<vmem>>, vector<1x8x8xbf16>
    %30 = vector.shape_cast %29 : vector<1x8x8xbf16> to vector<8x8xbf16>
    %cst_31 = arith.constant dense<0.000000e+00> : vector<64x8xf32>
    %31 = tpu.matmul %28, %30, %cst_31 {dimension_numbers = #tpu.dot_dimension_numbers<[1], [0], [0], [1], [0, 0, 1, 1], [], []>} : vector<64x8xbf16>, vector<8x8xbf16>, vector<64x8xf32> -> vector<64x8xf32>
    %32 = arith.addf %24, %31 : vector<64x8xf32>
    %c0_32 = arith.constant 0 : index
    %c0_33 = arith.constant 0 : index
    %c1_34 = arith.constant 1 : index
    %c1_35 = arith.constant 1 : index
    %c0_36 = arith.constant 0 : index
    %33 = vector.load %arg2[%c0_32, %c0_33, %c1_34, %c1_35, %c0_36] : memref<1x1x10x10x8xf32, #tpu.memory_space<vmem>>, vector<1x1x8x8x8xf32>
    %34 = vector.shape_cast %33 : vector<1x1x8x8x8xf32> to vector<8x8x8xf32>
    %35 = vector.shape_cast %34 : vector<8x8x8xf32> to vector<64x8xf32>
    %36 = arith.truncf %35 : vector<64x8xf32> to vector<64x8xbf16>
    %c4 = arith.constant 4 : index
    %c0_37 = arith.constant 0 : index
    %c0_38 = arith.constant 0 : index
    %37 = vector.load %arg3[%c4, %c0_37, %c0_38] : memref<9x8x8xbf16, #tpu.memory_space<vmem>>, vector<1x8x8xbf16>
    %38 = vector.shape_cast %37 : vector<1x8x8xbf16> to vector<8x8xbf16>
    %cst_39 = arith.constant dense<0.000000e+00> : vector<64x8xf32>
    %39 = tpu.matmul %36, %38, %cst_39 {dimension_numbers = #tpu.dot_dimension_numbers<[1], [0], [0], [1], [0, 0, 1, 1], [], []>} : vector<64x8xbf16>, vector<8x8xbf16>, vector<64x8xf32> -> vector<64x8xf32>
    %40 = arith.addf %32, %39 : vector<64x8xf32>
    %c0_40 = arith.constant 0 : index
    %c0_41 = arith.constant 0 : index
    %c1_42 = arith.constant 1 : index
    %c2_43 = arith.constant 2 : index
    %c0_44 = arith.constant 0 : index
    %41 = vector.load %arg2[%c0_40, %c0_41, %c1_42, %c2_43, %c0_44] : memref<1x1x10x10x8xf32, #tpu.memory_space<vmem>>, vector<1x1x8x8x8xf32>
    %42 = vector.shape_cast %41 : vector<1x1x8x8x8xf32> to vector<8x8x8xf32>
    %43 = vector.shape_cast %42 : vector<8x8x8xf32> to vector<64x8xf32>
    %44 = arith.truncf %43 : vector<64x8xf32> to vector<64x8xbf16>
    %c5 = arith.constant 5 : index
    %c0_45 = arith.constant 0 : index
    %c0_46 = arith.constant 0 : index
    %45 = vector.load %arg3[%c5, %c0_45, %c0_46] : memref<9x8x8xbf16, #tpu.memory_space<vmem>>, vector<1x8x8xbf16>
    %46 = vector.shape_cast %45 : vector<1x8x8xbf16> to vector<8x8xbf16>
    %cst_47 = arith.constant dense<0.000000e+00> : vector<64x8xf32>
    %47 = tpu.matmul %44, %46, %cst_47 {dimension_numbers = #tpu.dot_dimension_numbers<[1], [0], [0], [1], [0, 0, 1, 1], [], []>} : vector<64x8xbf16>, vector<8x8xbf16>, vector<64x8xf32> -> vector<64x8xf32>
    %48 = arith.addf %40, %47 : vector<64x8xf32>
    %c0_48 = arith.constant 0 : index
    %c0_49 = arith.constant 0 : index
    %c2_50 = arith.constant 2 : index
    %c0_51 = arith.constant 0 : index
    %c0_52 = arith.constant 0 : index
    %49 = vector.load %arg2[%c0_48, %c0_49, %c2_50, %c0_51, %c0_52] : memref<1x1x10x10x8xf32, #tpu.memory_space<vmem>>, vector<1x1x8x8x8xf32>
    %50 = vector.shape_cast %49 : vector<1x1x8x8x8xf32> to vector<8x8x8xf32>
    %51 = vector.shape_cast %50 : vector<8x8x8xf32> to vector<64x8xf32>
    %52 = arith.truncf %51 : vector<64x8xf32> to vector<64x8xbf16>
    %c6 = arith.constant 6 : index
    %c0_53 = arith.constant 0 : index
    %c0_54 = arith.constant 0 : index
    %53 = vector.load %arg3[%c6, %c0_53, %c0_54] : memref<9x8x8xbf16, #tpu.memory_space<vmem>>, vector<1x8x8xbf16>
    %54 = vector.shape_cast %53 : vector<1x8x8xbf16> to vector<8x8xbf16>
    %cst_55 = arith.constant dense<0.000000e+00> : vector<64x8xf32>
    %55 = tpu.matmul %52, %54, %cst_55 {dimension_numbers = #tpu.dot_dimension_numbers<[1], [0], [0], [1], [0, 0, 1, 1], [], []>} : vector<64x8xbf16>, vector<8x8xbf16>, vector<64x8xf32> -> vector<64x8xf32>
    %56 = arith.addf %48, %55 : vector<64x8xf32>
    %c0_56 = arith.constant 0 : index
    %c0_57 = arith.constant 0 : index
    %c2_58 = arith.constant 2 : index
    %c1_59 = arith.constant 1 : index
    %c0_60 = arith.constant 0 : index
    %57 = vector.load %arg2[%c0_56, %c0_57, %c2_58, %c1_59, %c0_60] : memref<1x1x10x10x8xf32, #tpu.memory_space<vmem>>, vector<1x1x8x8x8xf32>
    %58 = vector.shape_cast %57 : vector<1x1x8x8x8xf32> to vector<8x8x8xf32>
    %59 = vector.shape_cast %58 : vector<8x8x8xf32> to vector<64x8xf32>
    %60 = arith.truncf %59 : vector<64x8xf32> to vector<64x8xbf16>
    %c7 = arith.constant 7 : index
    %c0_61 = arith.constant 0 : index
    %c0_62 = arith.constant 0 : index
    %61 = vector.load %arg3[%c7, %c0_61, %c0_62] : memref<9x8x8xbf16, #tpu.memory_space<vmem>>, vector<1x8x8xbf16>
    %62 = vector.shape_cast %61 : vector<1x8x8xbf16> to vector<8x8xbf16>
    %cst_63 = arith.constant dense<0.000000e+00> : vector<64x8xf32>
    %63 = tpu.matmul %60, %62, %cst_63 {dimension_numbers = #tpu.dot_dimension_numbers<[1], [0], [0], [1], [0, 0, 1, 1], [], []>} : vector<64x8xbf16>, vector<8x8xbf16>, vector<64x8xf32> -> vector<64x8xf32>
    %64 = arith.addf %56, %63 : vector<64x8xf32>
    %c0_64 = arith.constant 0 : index
    %c0_65 = arith.constant 0 : index
    %c2_66 = arith.constant 2 : index
    %c2_67 = arith.constant 2 : index
    %c0_68 = arith.constant 0 : index
    %65 = vector.load %arg2[%c0_64, %c0_65, %c2_66, %c2_67, %c0_68] : memref<1x1x10x10x8xf32, #tpu.memory_space<vmem>>, vector<1x1x8x8x8xf32>
    %66 = vector.shape_cast %65 : vector<1x1x8x8x8xf32> to vector<8x8x8xf32>
    %67 = vector.shape_cast %66 : vector<8x8x8xf32> to vector<64x8xf32>
    %68 = arith.truncf %67 : vector<64x8xf32> to vector<64x8xbf16>
    %c8 = arith.constant 8 : index
    %c0_69 = arith.constant 0 : index
    %c0_70 = arith.constant 0 : index
    %69 = vector.load %arg3[%c8, %c0_69, %c0_70] : memref<9x8x8xbf16, #tpu.memory_space<vmem>>, vector<1x8x8xbf16>
    %70 = vector.shape_cast %69 : vector<1x8x8xbf16> to vector<8x8xbf16>
    %cst_71 = arith.constant dense<0.000000e+00> : vector<64x8xf32>
    %71 = tpu.matmul %68, %70, %cst_71 {dimension_numbers = #tpu.dot_dimension_numbers<[1], [0], [0], [1], [0, 0, 1, 1], [], []>} : vector<64x8xbf16>, vector<8x8xbf16>, vector<64x8xf32> -> vector<64x8xf32>
    %72 = arith.addf %64, %71 : vector<64x8xf32>
    %73 = vector.shape_cast %72 : vector<64x8xf32> to vector<1x8x8x8xf32>
    %c0_72 = arith.constant 0 : index
    %c0_73 = arith.constant 0 : index
    %c0_74 = arith.constant 0 : index
    %c0_75 = arith.constant 0 : index
    %74 = vector.load %arg4[%c0_72, %c0_73, %c0_74, %c0_75] : memref<1x8x8x8xf32, #tpu.memory_space<vmem>>, vector<1x8x8x8xf32>
    tpu.vector_store %arg4[%c0_72, %c0_73, %c0_74, %c0_75], %73 {strides = array<i32>} : memref<1x8x8x8xf32, #tpu.memory_space<vmem>>, vector<1x8x8x8xf32>,
    %c0_i32 = arith.constant 0 : i32
    %75 = arith.cmpi eq, %arg0, %c0_i32 : i32
    %c0_i32_76 = arith.constant 0 : i32
    %76 = arith.cmpi eq, %arg1, %c0_i32_76 : i32
    %77 = arith.andi %75, %76 : i1
    %78 = arith.extui %77 : i1 to i32
    %c0_i32_77 = arith.constant 0 : i32
    %79 = arith.cmpi ne, %78, %c0_i32_77 : i32
    scf.if %79 {
      %cst_88 = arith.constant 0.000000e+00 : f32
      %91 = vector.broadcast %cst_88 : f32 to vector<1x8xf32>
      %c0_89 = arith.constant 0 : index
      %c0_90 = arith.constant 0 : index
      %92 = vector.load %arg5[%c0_89, %c0_90] : memref<1x8xf32, #tpu.memory_space<vmem>>, vector<1x8xf32>
      tpu.vector_store %arg5[%c0_89, %c0_90], %91 {strides = array<i32>} : memref<1x8xf32, #tpu.memory_space<vmem>>, vector<1x8xf32>,
      %cst_91 = arith.constant 0.000000e+00 : f32
      %93 = vector.broadcast %cst_91 : f32 to vector<1x8xf32>
      %c0_92 = arith.constant 0 : index
      %c0_93 = arith.constant 0 : index
      %94 = vector.load %arg6[%c0_92, %c0_93] : memref<1x8xf32, #tpu.memory_space<vmem>>, vector<1x8xf32>
      tpu.vector_store %arg6[%c0_92, %c0_93], %93 {strides = array<i32>} : memref<1x8xf32, #tpu.memory_space<vmem>>, vector<1x8xf32>,
    } else {
    }
    %c0_78 = arith.constant 0 : index
    %c0_79 = arith.constant 0 : index
    %80 = vector.load %arg5[%c0_78, %c0_79] : memref<1x8xf32, #tpu.memory_space<vmem>>, vector<1x8xf32>
    %cst_80 = arith.constant dense<0.000000e+00> : vector<8xf32>
    %81 = vector.multi_reduction <add>, %72, %cst_80 [0] : vector<64x8xf32> to vector<8xf32>
    %82 = vector.shape_cast %81 : vector<8xf32> to vector<1x8xf32>
    %83 = arith.addf %80, %82 : vector<1x8xf32>
    %c0_81 = arith.constant 0 : index
    %c0_82 = arith.constant 0 : index
    %84 = vector.load %arg5[%c0_81, %c0_82] : memref<1x8xf32, #tpu.memory_space<vmem>>, vector<1x8xf32>
    tpu.vector_store %arg5[%c0_81, %c0_82], %83 {strides = array<i32>} : memref<1x8xf32, #tpu.memory_space<vmem>>, vector<1x8xf32>,
    %c0_83 = arith.constant 0 : index
    %c0_84 = arith.constant 0 : index
    %85 = vector.load %arg6[%c0_83, %c0_84] : memref<1x8xf32, #tpu.memory_space<vmem>>, vector<1x8xf32>
    %86 = arith.mulf %72, %72 : vector<64x8xf32>
    %cst_85 = arith.constant dense<0.000000e+00> : vector<8xf32>
    %87 = vector.multi_reduction <add>, %86, %cst_85 [0] : vector<64x8xf32> to vector<8xf32>
    %88 = vector.shape_cast %87 : vector<8xf32> to vector<1x8xf32>
    %89 = arith.addf %85, %88 : vector<1x8xf32>
    %c0_86 = arith.constant 0 : index
    %c0_87 = arith.constant 0 : index
    %90 = vector.load %arg6[%c0_86, %c0_87] : memref<1x8xf32, #tpu.memory_space<vmem>>, vector<1x8xf32>
    tpu.vector_store %arg6[%c0_86, %c0_87], %89 {strides = array<i32>} : memref<1x8xf32, #tpu.memory_space<vmem>>, vector<1x8xf32>,
    return
  }
  func.func @transform_0(%arg0: i32, %arg1: i32) -> (i32, i32, i32, i32, i32) {
    %c0_i32 = arith.constant 0 : i32
    %c0_i32_0 = arith.constant 0 : i32
    %c0_i32_1 = arith.constant 0 : i32
    %c0_i32_2 = arith.constant 0 : i32
    return %arg0, %arg1, %c0_i32, %c0_i32_0, %c0_i32_1 : i32, i32, i32, i32, i32
  }
  func.func @transform_1(%arg0: i32, %arg1: i32) -> (i32, i32, i32) {
    %c0_i32 = arith.constant 0 : i32
    %c0_i32_0 = arith.constant 0 : i32
    %c0_i32_1 = arith.constant 0 : i32
    %c0_i32_2 = arith.constant 0 : i32
    return %c0_i32, %c0_i32_0, %c0_i32_1 : i32, i32, i32
  }
  func.func @transform_2(%arg0: i32, %arg1: i32) -> (i32, i32, i32, i32) {
    %c0_i32 = arith.constant 0 : i32
    %c0_i32_0 = arith.constant 0 : i32
    %c0_i32_1 = arith.constant 0 : i32
    return %arg0, %arg1, %c0_i32, %c0_i32_0 : i32, i32, i32, i32
  }
  func.func @transform_3(%arg0: i32, %arg1: i32) -> (i32, i32) {
    %c0_i32 = arith.constant 0 : i32
    %c0_i32_0 = arith.constant 0 : i32
    %c0_i32_1 = arith.constant 0 : i32
    return %c0_i32, %c0_i32_0 : i32, i32
  }
  func.func @transform_4(%arg0: i32, %arg1: i32) -> (i32, i32) {
    %c0_i32 = arith.constant 0 : i32
    %c0_i32_0 = arith.constant 0 : i32
    %c0_i32_1 = arith.constant 0 : i32
    return %c0_i32, %c0_i32_0 : i32, i32
  }
}

module attributes {stable_mosaic.version = 11 : i64} {
  func.func @_conv_relu_kernel(%arg0: i32, %arg1: i32, %arg2: memref<1x1x6x10x8xf32, #tpu.memory_space<vmem>>, %arg3: memref<9x8x16xbf16, #tpu.memory_space<vmem>>, %arg4: memref<1x16xf32, #tpu.memory_space<vmem>>, %arg5: memref<1x4x8x16xf32, #tpu.memory_space<vmem>>) attributes {dimension_semantics = [#tpu.dimension_semantics<parallel>, #tpu.dimension_semantics<parallel>], iteration_bounds = array<i64: 2, 1>, scalar_prefetch = 0 : i64, scratch_operands = 0 : i64, tpu.core_type = #tpu.core_type<tc>, window_params = [{transform_indices = @transform_0, window_bounds = array<i64: 1, 1, 6, 10, 8>}, {pipeline_mode = #tpu.pipeline_mode<synchronous>, transform_indices = @transform_1, window_bounds = array<i64: 9, 8, 16>}, {pipeline_mode = #tpu.pipeline_mode<synchronous>, transform_indices = @transform_2, window_bounds = array<i64: 1, 16>}, {transform_indices = @transform_3, window_bounds = array<i64: 1, 4, 8, 16>}]} {
    %cst = arith.constant 0.000000e+00 : f32
    %0 = vector.broadcast %cst : f32 to vector<32x16xf32>
    %c0 = arith.constant 0 : index
    %c0_0 = arith.constant 0 : index
    %c0_1 = arith.constant 0 : index
    %c0_2 = arith.constant 0 : index
    %c0_3 = arith.constant 0 : index
    %1 = vector.load %arg2[%c0, %c0_0, %c0_1, %c0_2, %c0_3] : memref<1x1x6x10x8xf32, #tpu.memory_space<vmem>>, vector<1x1x4x8x8xf32>
    %2 = vector.shape_cast %1 : vector<1x1x4x8x8xf32> to vector<4x8x8xf32>
    %3 = vector.shape_cast %2 : vector<4x8x8xf32> to vector<32x8xf32>
    %4 = arith.truncf %3 : vector<32x8xf32> to vector<32x8xbf16>
    %c0_4 = arith.constant 0 : index
    %c0_5 = arith.constant 0 : index
    %c0_6 = arith.constant 0 : index
    %5 = vector.load %arg3[%c0_4, %c0_5, %c0_6] : memref<9x8x16xbf16, #tpu.memory_space<vmem>>, vector<1x8x16xbf16>
    %6 = vector.shape_cast %5 : vector<1x8x16xbf16> to vector<8x16xbf16>
    %cst_7 = arith.constant dense<0.000000e+00> : vector<32x16xf32>
    %7 = tpu.matmul %4, %6, %cst_7 {dimension_numbers = #tpu.dot_dimension_numbers<[1], [0], [0], [1], [0, 0, 1, 1], [], []>} : vector<32x8xbf16>, vector<8x16xbf16>, vector<32x16xf32> -> vector<32x16xf32>
    %8 = arith.addf %0, %7 : vector<32x16xf32>
    %c0_8 = arith.constant 0 : index
    %c0_9 = arith.constant 0 : index
    %c0_10 = arith.constant 0 : index
    %c1 = arith.constant 1 : index
    %c0_11 = arith.constant 0 : index
    %9 = vector.load %arg2[%c0_8, %c0_9, %c0_10, %c1, %c0_11] : memref<1x1x6x10x8xf32, #tpu.memory_space<vmem>>, vector<1x1x4x8x8xf32>
    %10 = vector.shape_cast %9 : vector<1x1x4x8x8xf32> to vector<4x8x8xf32>
    %11 = vector.shape_cast %10 : vector<4x8x8xf32> to vector<32x8xf32>
    %12 = arith.truncf %11 : vector<32x8xf32> to vector<32x8xbf16>
    %c1_12 = arith.constant 1 : index
    %c0_13 = arith.constant 0 : index
    %c0_14 = arith.constant 0 : index
    %13 = vector.load %arg3[%c1_12, %c0_13, %c0_14] : memref<9x8x16xbf16, #tpu.memory_space<vmem>>, vector<1x8x16xbf16>
    %14 = vector.shape_cast %13 : vector<1x8x16xbf16> to vector<8x16xbf16>
    %cst_15 = arith.constant dense<0.000000e+00> : vector<32x16xf32>
    %15 = tpu.matmul %12, %14, %cst_15 {dimension_numbers = #tpu.dot_dimension_numbers<[1], [0], [0], [1], [0, 0, 1, 1], [], []>} : vector<32x8xbf16>, vector<8x16xbf16>, vector<32x16xf32> -> vector<32x16xf32>
    %16 = arith.addf %8, %15 : vector<32x16xf32>
    %c0_16 = arith.constant 0 : index
    %c0_17 = arith.constant 0 : index
    %c0_18 = arith.constant 0 : index
    %c2 = arith.constant 2 : index
    %c0_19 = arith.constant 0 : index
    %17 = vector.load %arg2[%c0_16, %c0_17, %c0_18, %c2, %c0_19] : memref<1x1x6x10x8xf32, #tpu.memory_space<vmem>>, vector<1x1x4x8x8xf32>
    %18 = vector.shape_cast %17 : vector<1x1x4x8x8xf32> to vector<4x8x8xf32>
    %19 = vector.shape_cast %18 : vector<4x8x8xf32> to vector<32x8xf32>
    %20 = arith.truncf %19 : vector<32x8xf32> to vector<32x8xbf16>
    %c2_20 = arith.constant 2 : index
    %c0_21 = arith.constant 0 : index
    %c0_22 = arith.constant 0 : index
    %21 = vector.load %arg3[%c2_20, %c0_21, %c0_22] : memref<9x8x16xbf16, #tpu.memory_space<vmem>>, vector<1x8x16xbf16>
    %22 = vector.shape_cast %21 : vector<1x8x16xbf16> to vector<8x16xbf16>
    %cst_23 = arith.constant dense<0.000000e+00> : vector<32x16xf32>
    %23 = tpu.matmul %20, %22, %cst_23 {dimension_numbers = #tpu.dot_dimension_numbers<[1], [0], [0], [1], [0, 0, 1, 1], [], []>} : vector<32x8xbf16>, vector<8x16xbf16>, vector<32x16xf32> -> vector<32x16xf32>
    %24 = arith.addf %16, %23 : vector<32x16xf32>
    %c0_24 = arith.constant 0 : index
    %c0_25 = arith.constant 0 : index
    %c1_26 = arith.constant 1 : index
    %c0_27 = arith.constant 0 : index
    %c0_28 = arith.constant 0 : index
    %25 = vector.load %arg2[%c0_24, %c0_25, %c1_26, %c0_27, %c0_28] : memref<1x1x6x10x8xf32, #tpu.memory_space<vmem>>, vector<1x1x4x8x8xf32>
    %26 = vector.shape_cast %25 : vector<1x1x4x8x8xf32> to vector<4x8x8xf32>
    %27 = vector.shape_cast %26 : vector<4x8x8xf32> to vector<32x8xf32>
    %28 = arith.truncf %27 : vector<32x8xf32> to vector<32x8xbf16>
    %c3 = arith.constant 3 : index
    %c0_29 = arith.constant 0 : index
    %c0_30 = arith.constant 0 : index
    %29 = vector.load %arg3[%c3, %c0_29, %c0_30] : memref<9x8x16xbf16, #tpu.memory_space<vmem>>, vector<1x8x16xbf16>
    %30 = vector.shape_cast %29 : vector<1x8x16xbf16> to vector<8x16xbf16>
    %cst_31 = arith.constant dense<0.000000e+00> : vector<32x16xf32>
    %31 = tpu.matmul %28, %30, %cst_31 {dimension_numbers = #tpu.dot_dimension_numbers<[1], [0], [0], [1], [0, 0, 1, 1], [], []>} : vector<32x8xbf16>, vector<8x16xbf16>, vector<32x16xf32> -> vector<32x16xf32>
    %32 = arith.addf %24, %31 : vector<32x16xf32>
    %c0_32 = arith.constant 0 : index
    %c0_33 = arith.constant 0 : index
    %c1_34 = arith.constant 1 : index
    %c1_35 = arith.constant 1 : index
    %c0_36 = arith.constant 0 : index
    %33 = vector.load %arg2[%c0_32, %c0_33, %c1_34, %c1_35, %c0_36] : memref<1x1x6x10x8xf32, #tpu.memory_space<vmem>>, vector<1x1x4x8x8xf32>
    %34 = vector.shape_cast %33 : vector<1x1x4x8x8xf32> to vector<4x8x8xf32>
    %35 = vector.shape_cast %34 : vector<4x8x8xf32> to vector<32x8xf32>
    %36 = arith.truncf %35 : vector<32x8xf32> to vector<32x8xbf16>
    %c4 = arith.constant 4 : index
    %c0_37 = arith.constant 0 : index
    %c0_38 = arith.constant 0 : index
    %37 = vector.load %arg3[%c4, %c0_37, %c0_38] : memref<9x8x16xbf16, #tpu.memory_space<vmem>>, vector<1x8x16xbf16>
    %38 = vector.shape_cast %37 : vector<1x8x16xbf16> to vector<8x16xbf16>
    %cst_39 = arith.constant dense<0.000000e+00> : vector<32x16xf32>
    %39 = tpu.matmul %36, %38, %cst_39 {dimension_numbers = #tpu.dot_dimension_numbers<[1], [0], [0], [1], [0, 0, 1, 1], [], []>} : vector<32x8xbf16>, vector<8x16xbf16>, vector<32x16xf32> -> vector<32x16xf32>
    %40 = arith.addf %32, %39 : vector<32x16xf32>
    %c0_40 = arith.constant 0 : index
    %c0_41 = arith.constant 0 : index
    %c1_42 = arith.constant 1 : index
    %c2_43 = arith.constant 2 : index
    %c0_44 = arith.constant 0 : index
    %41 = vector.load %arg2[%c0_40, %c0_41, %c1_42, %c2_43, %c0_44] : memref<1x1x6x10x8xf32, #tpu.memory_space<vmem>>, vector<1x1x4x8x8xf32>
    %42 = vector.shape_cast %41 : vector<1x1x4x8x8xf32> to vector<4x8x8xf32>
    %43 = vector.shape_cast %42 : vector<4x8x8xf32> to vector<32x8xf32>
    %44 = arith.truncf %43 : vector<32x8xf32> to vector<32x8xbf16>
    %c5 = arith.constant 5 : index
    %c0_45 = arith.constant 0 : index
    %c0_46 = arith.constant 0 : index
    %45 = vector.load %arg3[%c5, %c0_45, %c0_46] : memref<9x8x16xbf16, #tpu.memory_space<vmem>>, vector<1x8x16xbf16>
    %46 = vector.shape_cast %45 : vector<1x8x16xbf16> to vector<8x16xbf16>
    %cst_47 = arith.constant dense<0.000000e+00> : vector<32x16xf32>
    %47 = tpu.matmul %44, %46, %cst_47 {dimension_numbers = #tpu.dot_dimension_numbers<[1], [0], [0], [1], [0, 0, 1, 1], [], []>} : vector<32x8xbf16>, vector<8x16xbf16>, vector<32x16xf32> -> vector<32x16xf32>
    %48 = arith.addf %40, %47 : vector<32x16xf32>
    %c0_48 = arith.constant 0 : index
    %c0_49 = arith.constant 0 : index
    %c2_50 = arith.constant 2 : index
    %c0_51 = arith.constant 0 : index
    %c0_52 = arith.constant 0 : index
    %49 = vector.load %arg2[%c0_48, %c0_49, %c2_50, %c0_51, %c0_52] : memref<1x1x6x10x8xf32, #tpu.memory_space<vmem>>, vector<1x1x4x8x8xf32>
    %50 = vector.shape_cast %49 : vector<1x1x4x8x8xf32> to vector<4x8x8xf32>
    %51 = vector.shape_cast %50 : vector<4x8x8xf32> to vector<32x8xf32>
    %52 = arith.truncf %51 : vector<32x8xf32> to vector<32x8xbf16>
    %c6 = arith.constant 6 : index
    %c0_53 = arith.constant 0 : index
    %c0_54 = arith.constant 0 : index
    %53 = vector.load %arg3[%c6, %c0_53, %c0_54] : memref<9x8x16xbf16, #tpu.memory_space<vmem>>, vector<1x8x16xbf16>
    %54 = vector.shape_cast %53 : vector<1x8x16xbf16> to vector<8x16xbf16>
    %cst_55 = arith.constant dense<0.000000e+00> : vector<32x16xf32>
    %55 = tpu.matmul %52, %54, %cst_55 {dimension_numbers = #tpu.dot_dimension_numbers<[1], [0], [0], [1], [0, 0, 1, 1], [], []>} : vector<32x8xbf16>, vector<8x16xbf16>, vector<32x16xf32> -> vector<32x16xf32>
    %56 = arith.addf %48, %55 : vector<32x16xf32>
    %c0_56 = arith.constant 0 : index
    %c0_57 = arith.constant 0 : index
    %c2_58 = arith.constant 2 : index
    %c1_59 = arith.constant 1 : index
    %c0_60 = arith.constant 0 : index
    %57 = vector.load %arg2[%c0_56, %c0_57, %c2_58, %c1_59, %c0_60] : memref<1x1x6x10x8xf32, #tpu.memory_space<vmem>>, vector<1x1x4x8x8xf32>
    %58 = vector.shape_cast %57 : vector<1x1x4x8x8xf32> to vector<4x8x8xf32>
    %59 = vector.shape_cast %58 : vector<4x8x8xf32> to vector<32x8xf32>
    %60 = arith.truncf %59 : vector<32x8xf32> to vector<32x8xbf16>
    %c7 = arith.constant 7 : index
    %c0_61 = arith.constant 0 : index
    %c0_62 = arith.constant 0 : index
    %61 = vector.load %arg3[%c7, %c0_61, %c0_62] : memref<9x8x16xbf16, #tpu.memory_space<vmem>>, vector<1x8x16xbf16>
    %62 = vector.shape_cast %61 : vector<1x8x16xbf16> to vector<8x16xbf16>
    %cst_63 = arith.constant dense<0.000000e+00> : vector<32x16xf32>
    %63 = tpu.matmul %60, %62, %cst_63 {dimension_numbers = #tpu.dot_dimension_numbers<[1], [0], [0], [1], [0, 0, 1, 1], [], []>} : vector<32x8xbf16>, vector<8x16xbf16>, vector<32x16xf32> -> vector<32x16xf32>
    %64 = arith.addf %56, %63 : vector<32x16xf32>
    %c0_64 = arith.constant 0 : index
    %c0_65 = arith.constant 0 : index
    %c2_66 = arith.constant 2 : index
    %c2_67 = arith.constant 2 : index
    %c0_68 = arith.constant 0 : index
    %65 = vector.load %arg2[%c0_64, %c0_65, %c2_66, %c2_67, %c0_68] : memref<1x1x6x10x8xf32, #tpu.memory_space<vmem>>, vector<1x1x4x8x8xf32>
    %66 = vector.shape_cast %65 : vector<1x1x4x8x8xf32> to vector<4x8x8xf32>
    %67 = vector.shape_cast %66 : vector<4x8x8xf32> to vector<32x8xf32>
    %68 = arith.truncf %67 : vector<32x8xf32> to vector<32x8xbf16>
    %c8 = arith.constant 8 : index
    %c0_69 = arith.constant 0 : index
    %c0_70 = arith.constant 0 : index
    %69 = vector.load %arg3[%c8, %c0_69, %c0_70] : memref<9x8x16xbf16, #tpu.memory_space<vmem>>, vector<1x8x16xbf16>
    %70 = vector.shape_cast %69 : vector<1x8x16xbf16> to vector<8x16xbf16>
    %cst_71 = arith.constant dense<0.000000e+00> : vector<32x16xf32>
    %71 = tpu.matmul %68, %70, %cst_71 {dimension_numbers = #tpu.dot_dimension_numbers<[1], [0], [0], [1], [0, 0, 1, 1], [], []>} : vector<32x8xbf16>, vector<8x16xbf16>, vector<32x16xf32> -> vector<32x16xf32>
    %72 = arith.addf %64, %71 : vector<32x16xf32>
    %c0_72 = arith.constant 0 : index
    %c0_73 = arith.constant 0 : index
    %73 = vector.load %arg4[%c0_72, %c0_73] : memref<1x16xf32, #tpu.memory_space<vmem>>, vector<1x16xf32>
    %74 = vector.broadcast %73 : vector<1x16xf32> to vector<32x16xf32>
    %75 = arith.addf %72, %74 : vector<32x16xf32>
    %cst_74 = arith.constant 0.000000e+00 : f32
    %76 = vector.broadcast %cst_74 : f32 to vector<32x16xf32>
    %77 = arith.maximumf %75, %76 : vector<32x16xf32>
    %78 = vector.shape_cast %77 : vector<32x16xf32> to vector<1x4x8x16xf32>
    %c0_75 = arith.constant 0 : index
    %c0_76 = arith.constant 0 : index
    %c0_77 = arith.constant 0 : index
    %c0_78 = arith.constant 0 : index
    %79 = vector.load %arg5[%c0_75, %c0_76, %c0_77, %c0_78] : memref<1x4x8x16xf32, #tpu.memory_space<vmem>>, vector<1x4x8x16xf32>
    tpu.vector_store %arg5[%c0_75, %c0_76, %c0_77, %c0_78], %78 {strides = array<i32>} : memref<1x4x8x16xf32, #tpu.memory_space<vmem>>, vector<1x4x8x16xf32>,
    return
  }
  func.func @transform_0(%arg0: i32, %arg1: i32) -> (i32, i32, i32, i32, i32) {
    %c0_i32 = arith.constant 0 : i32
    %c0_i32_0 = arith.constant 0 : i32
    %c0_i32_1 = arith.constant 0 : i32
    %c0_i32_2 = arith.constant 0 : i32
    return %arg0, %arg1, %c0_i32, %c0_i32_0, %c0_i32_1 : i32, i32, i32, i32, i32
  }
  func.func @transform_1(%arg0: i32, %arg1: i32) -> (i32, i32, i32) {
    %c0_i32 = arith.constant 0 : i32
    %c0_i32_0 = arith.constant 0 : i32
    %c0_i32_1 = arith.constant 0 : i32
    %c0_i32_2 = arith.constant 0 : i32
    return %c0_i32, %c0_i32_0, %c0_i32_1 : i32, i32, i32
  }
  func.func @transform_2(%arg0: i32, %arg1: i32) -> (i32, i32) {
    %c0_i32 = arith.constant 0 : i32
    %c0_i32_0 = arith.constant 0 : i32
    %c0_i32_1 = arith.constant 0 : i32
    return %c0_i32, %c0_i32_0 : i32, i32
  }
  func.func @transform_3(%arg0: i32, %arg1: i32) -> (i32, i32, i32, i32) {
    %c0_i32 = arith.constant 0 : i32
    %c0_i32_0 = arith.constant 0 : i32
    %c0_i32_1 = arith.constant 0 : i32
    return %arg0, %arg1, %c0_i32, %c0_i32_0 : i32, i32, i32, i32
  }
}

module attributes {stable_mosaic.version = 11 : i64} {
  func.func @_conv_relu_kernel(%arg0: i32, %arg1: i32, %arg2: memref<1x1x6x10x16xf32, #tpu.memory_space<vmem>>, %arg3: memref<9x16x16xbf16, #tpu.memory_space<vmem>>, %arg4: memref<1x16xf32, #tpu.memory_space<vmem>>, %arg5: memref<1x4x8x16xf32, #tpu.memory_space<vmem>>) attributes {dimension_semantics = [#tpu.dimension_semantics<parallel>, #tpu.dimension_semantics<parallel>], iteration_bounds = array<i64: 2, 1>, scalar_prefetch = 0 : i64, scratch_operands = 0 : i64, tpu.core_type = #tpu.core_type<tc>, window_params = [{transform_indices = @transform_0, window_bounds = array<i64: 1, 1, 6, 10, 16>}, {pipeline_mode = #tpu.pipeline_mode<synchronous>, transform_indices = @transform_1, window_bounds = array<i64: 9, 16, 16>}, {pipeline_mode = #tpu.pipeline_mode<synchronous>, transform_indices = @transform_2, window_bounds = array<i64: 1, 16>}, {transform_indices = @transform_3, window_bounds = array<i64: 1, 4, 8, 16>}]} {
    %cst = arith.constant 0.000000e+00 : f32
    %0 = vector.broadcast %cst : f32 to vector<32x16xf32>
    %c0 = arith.constant 0 : index
    %c0_0 = arith.constant 0 : index
    %c0_1 = arith.constant 0 : index
    %c0_2 = arith.constant 0 : index
    %c0_3 = arith.constant 0 : index
    %1 = vector.load %arg2[%c0, %c0_0, %c0_1, %c0_2, %c0_3] : memref<1x1x6x10x16xf32, #tpu.memory_space<vmem>>, vector<1x1x4x8x16xf32>
    %2 = vector.shape_cast %1 : vector<1x1x4x8x16xf32> to vector<4x8x16xf32>
    %3 = vector.shape_cast %2 : vector<4x8x16xf32> to vector<32x16xf32>
    %4 = arith.truncf %3 : vector<32x16xf32> to vector<32x16xbf16>
    %c0_4 = arith.constant 0 : index
    %c0_5 = arith.constant 0 : index
    %c0_6 = arith.constant 0 : index
    %5 = vector.load %arg3[%c0_4, %c0_5, %c0_6] : memref<9x16x16xbf16, #tpu.memory_space<vmem>>, vector<1x16x16xbf16>
    %6 = vector.shape_cast %5 : vector<1x16x16xbf16> to vector<16x16xbf16>
    %cst_7 = arith.constant dense<0.000000e+00> : vector<32x16xf32>
    %7 = tpu.matmul %4, %6, %cst_7 {dimension_numbers = #tpu.dot_dimension_numbers<[1], [0], [0], [1], [0, 0, 1, 1], [], []>} : vector<32x16xbf16>, vector<16x16xbf16>, vector<32x16xf32> -> vector<32x16xf32>
    %8 = arith.addf %0, %7 : vector<32x16xf32>
    %c0_8 = arith.constant 0 : index
    %c0_9 = arith.constant 0 : index
    %c0_10 = arith.constant 0 : index
    %c1 = arith.constant 1 : index
    %c0_11 = arith.constant 0 : index
    %9 = vector.load %arg2[%c0_8, %c0_9, %c0_10, %c1, %c0_11] : memref<1x1x6x10x16xf32, #tpu.memory_space<vmem>>, vector<1x1x4x8x16xf32>
    %10 = vector.shape_cast %9 : vector<1x1x4x8x16xf32> to vector<4x8x16xf32>
    %11 = vector.shape_cast %10 : vector<4x8x16xf32> to vector<32x16xf32>
    %12 = arith.truncf %11 : vector<32x16xf32> to vector<32x16xbf16>
    %c1_12 = arith.constant 1 : index
    %c0_13 = arith.constant 0 : index
    %c0_14 = arith.constant 0 : index
    %13 = vector.load %arg3[%c1_12, %c0_13, %c0_14] : memref<9x16x16xbf16, #tpu.memory_space<vmem>>, vector<1x16x16xbf16>
    %14 = vector.shape_cast %13 : vector<1x16x16xbf16> to vector<16x16xbf16>
    %cst_15 = arith.constant dense<0.000000e+00> : vector<32x16xf32>
    %15 = tpu.matmul %12, %14, %cst_15 {dimension_numbers = #tpu.dot_dimension_numbers<[1], [0], [0], [1], [0, 0, 1, 1], [], []>} : vector<32x16xbf16>, vector<16x16xbf16>, vector<32x16xf32> -> vector<32x16xf32>
    %16 = arith.addf %8, %15 : vector<32x16xf32>
    %c0_16 = arith.constant 0 : index
    %c0_17 = arith.constant 0 : index
    %c0_18 = arith.constant 0 : index
    %c2 = arith.constant 2 : index
    %c0_19 = arith.constant 0 : index
    %17 = vector.load %arg2[%c0_16, %c0_17, %c0_18, %c2, %c0_19] : memref<1x1x6x10x16xf32, #tpu.memory_space<vmem>>, vector<1x1x4x8x16xf32>
    %18 = vector.shape_cast %17 : vector<1x1x4x8x16xf32> to vector<4x8x16xf32>
    %19 = vector.shape_cast %18 : vector<4x8x16xf32> to vector<32x16xf32>
    %20 = arith.truncf %19 : vector<32x16xf32> to vector<32x16xbf16>
    %c2_20 = arith.constant 2 : index
    %c0_21 = arith.constant 0 : index
    %c0_22 = arith.constant 0 : index
    %21 = vector.load %arg3[%c2_20, %c0_21, %c0_22] : memref<9x16x16xbf16, #tpu.memory_space<vmem>>, vector<1x16x16xbf16>
    %22 = vector.shape_cast %21 : vector<1x16x16xbf16> to vector<16x16xbf16>
    %cst_23 = arith.constant dense<0.000000e+00> : vector<32x16xf32>
    %23 = tpu.matmul %20, %22, %cst_23 {dimension_numbers = #tpu.dot_dimension_numbers<[1], [0], [0], [1], [0, 0, 1, 1], [], []>} : vector<32x16xbf16>, vector<16x16xbf16>, vector<32x16xf32> -> vector<32x16xf32>
    %24 = arith.addf %16, %23 : vector<32x16xf32>
    %c0_24 = arith.constant 0 : index
    %c0_25 = arith.constant 0 : index
    %c1_26 = arith.constant 1 : index
    %c0_27 = arith.constant 0 : index
    %c0_28 = arith.constant 0 : index
    %25 = vector.load %arg2[%c0_24, %c0_25, %c1_26, %c0_27, %c0_28] : memref<1x1x6x10x16xf32, #tpu.memory_space<vmem>>, vector<1x1x4x8x16xf32>
    %26 = vector.shape_cast %25 : vector<1x1x4x8x16xf32> to vector<4x8x16xf32>
    %27 = vector.shape_cast %26 : vector<4x8x16xf32> to vector<32x16xf32>
    %28 = arith.truncf %27 : vector<32x16xf32> to vector<32x16xbf16>
    %c3 = arith.constant 3 : index
    %c0_29 = arith.constant 0 : index
    %c0_30 = arith.constant 0 : index
    %29 = vector.load %arg3[%c3, %c0_29, %c0_30] : memref<9x16x16xbf16, #tpu.memory_space<vmem>>, vector<1x16x16xbf16>
    %30 = vector.shape_cast %29 : vector<1x16x16xbf16> to vector<16x16xbf16>
    %cst_31 = arith.constant dense<0.000000e+00> : vector<32x16xf32>
    %31 = tpu.matmul %28, %30, %cst_31 {dimension_numbers = #tpu.dot_dimension_numbers<[1], [0], [0], [1], [0, 0, 1, 1], [], []>} : vector<32x16xbf16>, vector<16x16xbf16>, vector<32x16xf32> -> vector<32x16xf32>
    %32 = arith.addf %24, %31 : vector<32x16xf32>
    %c0_32 = arith.constant 0 : index
    %c0_33 = arith.constant 0 : index
    %c1_34 = arith.constant 1 : index
    %c1_35 = arith.constant 1 : index
    %c0_36 = arith.constant 0 : index
    %33 = vector.load %arg2[%c0_32, %c0_33, %c1_34, %c1_35, %c0_36] : memref<1x1x6x10x16xf32, #tpu.memory_space<vmem>>, vector<1x1x4x8x16xf32>
    %34 = vector.shape_cast %33 : vector<1x1x4x8x16xf32> to vector<4x8x16xf32>
    %35 = vector.shape_cast %34 : vector<4x8x16xf32> to vector<32x16xf32>
    %36 = arith.truncf %35 : vector<32x16xf32> to vector<32x16xbf16>
    %c4 = arith.constant 4 : index
    %c0_37 = arith.constant 0 : index
    %c0_38 = arith.constant 0 : index
    %37 = vector.load %arg3[%c4, %c0_37, %c0_38] : memref<9x16x16xbf16, #tpu.memory_space<vmem>>, vector<1x16x16xbf16>
    %38 = vector.shape_cast %37 : vector<1x16x16xbf16> to vector<16x16xbf16>
    %cst_39 = arith.constant dense<0.000000e+00> : vector<32x16xf32>
    %39 = tpu.matmul %36, %38, %cst_39 {dimension_numbers = #tpu.dot_dimension_numbers<[1], [0], [0], [1], [0, 0, 1, 1], [], []>} : vector<32x16xbf16>, vector<16x16xbf16>, vector<32x16xf32> -> vector<32x16xf32>
    %40 = arith.addf %32, %39 : vector<32x16xf32>
    %c0_40 = arith.constant 0 : index
    %c0_41 = arith.constant 0 : index
    %c1_42 = arith.constant 1 : index
    %c2_43 = arith.constant 2 : index
    %c0_44 = arith.constant 0 : index
    %41 = vector.load %arg2[%c0_40, %c0_41, %c1_42, %c2_43, %c0_44] : memref<1x1x6x10x16xf32, #tpu.memory_space<vmem>>, vector<1x1x4x8x16xf32>
    %42 = vector.shape_cast %41 : vector<1x1x4x8x16xf32> to vector<4x8x16xf32>
    %43 = vector.shape_cast %42 : vector<4x8x16xf32> to vector<32x16xf32>
    %44 = arith.truncf %43 : vector<32x16xf32> to vector<32x16xbf16>
    %c5 = arith.constant 5 : index
    %c0_45 = arith.constant 0 : index
    %c0_46 = arith.constant 0 : index
    %45 = vector.load %arg3[%c5, %c0_45, %c0_46] : memref<9x16x16xbf16, #tpu.memory_space<vmem>>, vector<1x16x16xbf16>
    %46 = vector.shape_cast %45 : vector<1x16x16xbf16> to vector<16x16xbf16>
    %cst_47 = arith.constant dense<0.000000e+00> : vector<32x16xf32>
    %47 = tpu.matmul %44, %46, %cst_47 {dimension_numbers = #tpu.dot_dimension_numbers<[1], [0], [0], [1], [0, 0, 1, 1], [], []>} : vector<32x16xbf16>, vector<16x16xbf16>, vector<32x16xf32> -> vector<32x16xf32>
    %48 = arith.addf %40, %47 : vector<32x16xf32>
    %c0_48 = arith.constant 0 : index
    %c0_49 = arith.constant 0 : index
    %c2_50 = arith.constant 2 : index
    %c0_51 = arith.constant 0 : index
    %c0_52 = arith.constant 0 : index
    %49 = vector.load %arg2[%c0_48, %c0_49, %c2_50, %c0_51, %c0_52] : memref<1x1x6x10x16xf32, #tpu.memory_space<vmem>>, vector<1x1x4x8x16xf32>
    %50 = vector.shape_cast %49 : vector<1x1x4x8x16xf32> to vector<4x8x16xf32>
    %51 = vector.shape_cast %50 : vector<4x8x16xf32> to vector<32x16xf32>
    %52 = arith.truncf %51 : vector<32x16xf32> to vector<32x16xbf16>
    %c6 = arith.constant 6 : index
    %c0_53 = arith.constant 0 : index
    %c0_54 = arith.constant 0 : index
    %53 = vector.load %arg3[%c6, %c0_53, %c0_54] : memref<9x16x16xbf16, #tpu.memory_space<vmem>>, vector<1x16x16xbf16>
    %54 = vector.shape_cast %53 : vector<1x16x16xbf16> to vector<16x16xbf16>
    %cst_55 = arith.constant dense<0.000000e+00> : vector<32x16xf32>
    %55 = tpu.matmul %52, %54, %cst_55 {dimension_numbers = #tpu.dot_dimension_numbers<[1], [0], [0], [1], [0, 0, 1, 1], [], []>} : vector<32x16xbf16>, vector<16x16xbf16>, vector<32x16xf32> -> vector<32x16xf32>
    %56 = arith.addf %48, %55 : vector<32x16xf32>
    %c0_56 = arith.constant 0 : index
    %c0_57 = arith.constant 0 : index
    %c2_58 = arith.constant 2 : index
    %c1_59 = arith.constant 1 : index
    %c0_60 = arith.constant 0 : index
    %57 = vector.load %arg2[%c0_56, %c0_57, %c2_58, %c1_59, %c0_60] : memref<1x1x6x10x16xf32, #tpu.memory_space<vmem>>, vector<1x1x4x8x16xf32>
    %58 = vector.shape_cast %57 : vector<1x1x4x8x16xf32> to vector<4x8x16xf32>
    %59 = vector.shape_cast %58 : vector<4x8x16xf32> to vector<32x16xf32>
    %60 = arith.truncf %59 : vector<32x16xf32> to vector<32x16xbf16>
    %c7 = arith.constant 7 : index
    %c0_61 = arith.constant 0 : index
    %c0_62 = arith.constant 0 : index
    %61 = vector.load %arg3[%c7, %c0_61, %c0_62] : memref<9x16x16xbf16, #tpu.memory_space<vmem>>, vector<1x16x16xbf16>
    %62 = vector.shape_cast %61 : vector<1x16x16xbf16> to vector<16x16xbf16>
    %cst_63 = arith.constant dense<0.000000e+00> : vector<32x16xf32>
    %63 = tpu.matmul %60, %62, %cst_63 {dimension_numbers = #tpu.dot_dimension_numbers<[1], [0], [0], [1], [0, 0, 1, 1], [], []>} : vector<32x16xbf16>, vector<16x16xbf16>, vector<32x16xf32> -> vector<32x16xf32>
    %64 = arith.addf %56, %63 : vector<32x16xf32>
    %c0_64 = arith.constant 0 : index
    %c0_65 = arith.constant 0 : index
    %c2_66 = arith.constant 2 : index
    %c2_67 = arith.constant 2 : index
    %c0_68 = arith.constant 0 : index
    %65 = vector.load %arg2[%c0_64, %c0_65, %c2_66, %c2_67, %c0_68] : memref<1x1x6x10x16xf32, #tpu.memory_space<vmem>>, vector<1x1x4x8x16xf32>
    %66 = vector.shape_cast %65 : vector<1x1x4x8x16xf32> to vector<4x8x16xf32>
    %67 = vector.shape_cast %66 : vector<4x8x16xf32> to vector<32x16xf32>
    %68 = arith.truncf %67 : vector<32x16xf32> to vector<32x16xbf16>
    %c8 = arith.constant 8 : index
    %c0_69 = arith.constant 0 : index
    %c0_70 = arith.constant 0 : index
    %69 = vector.load %arg3[%c8, %c0_69, %c0_70] : memref<9x16x16xbf16, #tpu.memory_space<vmem>>, vector<1x16x16xbf16>
    %70 = vector.shape_cast %69 : vector<1x16x16xbf16> to vector<16x16xbf16>
    %cst_71 = arith.constant dense<0.000000e+00> : vector<32x16xf32>
    %71 = tpu.matmul %68, %70, %cst_71 {dimension_numbers = #tpu.dot_dimension_numbers<[1], [0], [0], [1], [0, 0, 1, 1], [], []>} : vector<32x16xbf16>, vector<16x16xbf16>, vector<32x16xf32> -> vector<32x16xf32>
    %72 = arith.addf %64, %71 : vector<32x16xf32>
    %c0_72 = arith.constant 0 : index
    %c0_73 = arith.constant 0 : index
    %73 = vector.load %arg4[%c0_72, %c0_73] : memref<1x16xf32, #tpu.memory_space<vmem>>, vector<1x16xf32>
    %74 = vector.broadcast %73 : vector<1x16xf32> to vector<32x16xf32>
    %75 = arith.addf %72, %74 : vector<32x16xf32>
    %cst_74 = arith.constant 0.000000e+00 : f32
    %76 = vector.broadcast %cst_74 : f32 to vector<32x16xf32>
    %77 = arith.maximumf %75, %76 : vector<32x16xf32>
    %78 = vector.shape_cast %77 : vector<32x16xf32> to vector<1x4x8x16xf32>
    %c0_75 = arith.constant 0 : index
    %c0_76 = arith.constant 0 : index
    %c0_77 = arith.constant 0 : index
    %c0_78 = arith.constant 0 : index
    %79 = vector.load %arg5[%c0_75, %c0_76, %c0_77, %c0_78] : memref<1x4x8x16xf32, #tpu.memory_space<vmem>>, vector<1x4x8x16xf32>
    tpu.vector_store %arg5[%c0_75, %c0_76, %c0_77, %c0_78], %78 {strides = array<i32>} : memref<1x4x8x16xf32, #tpu.memory_space<vmem>>, vector<1x4x8x16xf32>,
    return
  }
  func.func @transform_0(%arg0: i32, %arg1: i32) -> (i32, i32, i32, i32, i32) {
    %c0_i32 = arith.constant 0 : i32
    %c0_i32_0 = arith.constant 0 : i32
    %c0_i32_1 = arith.constant 0 : i32
    %c0_i32_2 = arith.constant 0 : i32
    return %arg0, %arg1, %c0_i32, %c0_i32_0, %c0_i32_1 : i32, i32, i32, i32, i32
  }
  func.func @transform_1(%arg0: i32, %arg1: i32) -> (i32, i32, i32) {
    %c0_i32 = arith.constant 0 : i32
    %c0_i32_0 = arith.constant 0 : i32
    %c0_i32_1 = arith.constant 0 : i32
    %c0_i32_2 = arith.constant 0 : i32
    return %c0_i32, %c0_i32_0, %c0_i32_1 : i32, i32, i32
  }
  func.func @transform_2(%arg0: i32, %arg1: i32) -> (i32, i32) {
    %c0_i32 = arith.constant 0 : i32
    %c0_i32_0 = arith.constant 0 : i32
    %c0_i32_1 = arith.constant 0 : i32
    return %c0_i32, %c0_i32_0 : i32, i32
  }
  func.func @transform_3(%arg0: i32, %arg1: i32) -> (i32, i32, i32, i32) {
    %c0_i32 = arith.constant 0 : i32
    %c0_i32_0 = arith.constant 0 : i32
    %c0_i32_1 = arith.constant 0 : i32
    return %arg0, %arg1, %c0_i32, %c0_i32_0 : i32, i32, i32, i32
  }
}

</mosaic_0001>

<bundles_post_ra>
// kernel: _lambda_.10
= control target key start
LH: loop header
LB: loop body
LE: loop exit
PB: predicated region body
PF: predicated region fallthrough
CT: control target
= control target key end

     0   :  { %s569_s12 = smov 0   ;;  %s571_s13 = smov 0   ;;  %s776_s0 = inlined_call_operand.vmem [shape: f32[2,16,16,4], index: 0, kind: input, shape index: {}]   ;;  %s777_s1 = inlined_call_operand.vmem [shape: f32[1,4], index: 1, kind: input, shape index: {}]   ;;  %s778_s2 = inlined_call_operand.vmem [shape: f32[1,4], index: 2, kind: input, shape index: {}]   ;;  %s779_s3 = inlined_call_operand.vmem [shape: f32[2,16,16,4], index: 3, kind: output, shape index: {}]  }
   0x1   :  { %s573_s14 = smov 0  }
   0x2 LB: > { %s25_s15 = sadd.s32 1, %s543_s13  ;;  %p490_p0 = scmp.ge.s32.totalorder %s547_s14, 1  ;;  %s547_s14 = sphi %s573_s14, %s13_s14   ;;  %s543_s13 = sphi %s571_s13, %s781_s13   ;;  %s539_s12 = sphi %s569_s12, %s780_s12  }
   0x3   : > { %p27_p1 = scmp.ge.s32.totalorder %s25_s15, 2  ;;  %p159_p2 = scmp.lt.s32.totalorder %s547_s14, 3 }
   0x5   : > { %s783_s15 = smov (%p27_p1, %s25_s15), 0  ;;  %p160_p3 = pnand %p490_p0, %p159_p2 }
   0x6   : > { %p194_p4 = scmp.lt.s32.totalorder (!%p160_p3), %s539_s12, 1  ;;  %v590_v0 = vld [vmem:[%s777_s1] ss:$0 sm:$0xff] (!%p160_p3)  ;;  %vm357_vm0 = vcmask (!%p160_p3), 31744  }
   0x7   : > { %163 = sbr.rel (%p160_p3) target bundleno = 47 (0x2f), region = 32  ;;  %v600_v1 = vld [vmem:[%s778_s2] ss:$0 sm:$0xff] (!%p160_p3) }
   0xe   : > { %s785_s12 = smov (!%p194_p4, %s539_s12), 1 }
   0xf   : > { %s499_s16 = sshll.u32 %s785_s12, 8 }
  0x10   : > { %s595_s21 = scalar_lea.vmem %s776_s0, %s499_s16  ;;  %s623_s26 = scalar_lea.vmem %s779_s3, %s499_s16 }
  0x11   : > { %v215_v2 = vld [vmem:[%s595_s21] sm:$0xff]  ;;  %v216_v3 = vld [vmem:[%s595_s21 + $0x8] sm:$0xff]  ;;  %v217_v4 = vld [vmem:[%s595_s21 + $0x10] sm:$0xff] }
  0x12   : > { %v254_v5 = vmul.f32 %v590_v0, %v215_v2  ;;  %v255_v6 = vmul.f32 %v590_v0, %v216_v3  ;;  %v256_v7 = vmul.f32 %v590_v0, %v217_v4  ;;  %v218_v8 = vld [vmem:[%s595_s21 + $0x18] sm:$0xff]  ;;  %v219_v9 = vld [vmem:[%s595_s21 + $0x20] sm:$0xff]  ;;  %v220_v10 = vld [vmem:[%s595_s21 + $0x28] sm:$0xff] }
  0x13   : > { %v257_v11 = vmul.f32 %v590_v0, %v218_v8  ;;  %v258_v12 = vmul.f32 %v590_v0, %v219_v9  ;;  %v259_v13 = vmul.f32 %v590_v0, %v220_v10  ;;  %v221_v14 = vld [vmem:[%s595_s21 + $0x30] sm:$0xff]  ;;  %v222_v15 = vld [vmem:[%s595_s21 + $0x38] sm:$0xff]  ;;  %v223_v24 = vld [vmem:[%s595_s21 + $0x40] sm:$0xff] }
  0x14   : > { %v293_v16 = vadd.f32 %v600_v1, %v254_v5  ;;  %v294_v17 = vadd.f32 %v600_v1, %v255_v6  ;;  %v295_v18 = vadd.f32 %v600_v1, %v256_v7  ;;  %v260_v19 = vmul.f32 %v590_v0, %v221_v14  ;;  %v224_v25 = vld [vmem:[%s595_s21 + $0x48] sm:$0xff]  ;;  %v225_v26 = vld [vmem:[%s595_s21 + $0x50] sm:$0xff]  ;;  %v226_v31 = vld [vmem:[%s595_s21 + $0x58] sm:$0xff] }
  0x15   : > { %v296_v20 = vadd.f32 %v600_v1, %v257_v11  ;;  %v297_v21 = vadd.f32 %v600_v1, %v258_v12  ;;  %v298_v22 = vadd.f32 %v600_v1, %v259_v13  ;;  %v261_v23 = vmul.f32 %v590_v0, %v222_v15  ;;  %v227_v32 = vld [vmem:[%s595_s21 + $0x60] sm:$0xff]  ;;  %v228_v33 = vld [vmem:[%s595_s21 + $0x68] sm:$0xff]  ;;  %v229_v38 = vld [vmem:[%s595_s21 + $0x70] sm:$0xff] }
  0x16   : > { %v325_v27 = vmax.f32 %v293_v16, 0.0  ;;  %v326_v28 = vmax.f32 %v294_v17, 0.0  ;;  %v327_v29 = vmax.f32 %v295_v18, 0.0  ;;  %v299_v30 = vadd.f32 %v600_v1, %v260_v19  ;;  %v230_v43 = vld [vmem:[%s595_s21 + $0x78] sm:$0xff]  ;;  %v231_v56 = vld [vmem:[%s595_s21 + $0x80] sm:$0xff]  ;;  %v232_v57 = vld [vmem:[%s595_s21 + $0x88] sm:$0xff] }
  0x17   : > { %v328_v34 = vmax.f32 %v296_v20, 0.0  ;;  %v329_v35 = vmax.f32 %v297_v21, 0.0  ;;  %v330_v36 = vmax.f32 %v298_v22, 0.0  ;;  %v300_v37 = vadd.f32 %v600_v1, %v261_v23  ;;  %v233_v58 = vld [vmem:[%s595_s21 + $0x90] sm:$0xff]  ;;  %v234_v63 = vld [vmem:[%s595_s21 + $0x98] sm:$0xff]  ;;  %v235_v2 = vld [vmem:[%s595_s21 + $0xa0] sm:$0xff] }
  0x18   : > { %358 = vst.msk [vmem:[%s623_s26] sm:$0xff] %vm357_vm0, %v325_v27  ;;  %359 = vst.msk [vmem:[%s623_s26 + $0x8] sm:$0xff] %vm357_vm0, %v326_v28  ;;  %v331_v39 = vmax.f32 %v299_v30, 0.0  ;;  %v262_v40 = vmul.f32 %v590_v0, %v223_v24  ;;  %v263_v41 = vmul.f32 %v590_v0, %v224_v25  ;;  %v264_v42 = vmul.f32 %v590_v0, %v225_v26  ;;  %v236_v3 = vld [vmem:[%s595_s21 + $0xa8] sm:$0xff]  ;;  %v237_v8 = vld [vmem:[%s595_s21 + $0xb0] sm:$0xff] }
  0x19   : > { %360 = vst.msk [vmem:[%s623_s26 + $0x10] sm:$0xff] %vm357_vm0, %v327_v29  ;;  %361 = vst.msk [vmem:[%s623_s26 + $0x18] sm:$0xff] %vm357_vm0, %v328_v34  ;;  %v332_v44 = vmax.f32 %v300_v37, 0.0  ;;  %v265_v45 = vmul.f32 %v590_v0, %v226_v31  ;;  %v266_v46 = vmul.f32 %v590_v0, %v227_v32  ;;  %v267_v47 = vmul.f32 %v590_v0, %v228_v33  ;;  %v238_v13 = vld [vmem:[%s595_s21 + $0xb8] sm:$0xff]  ;;  %v239_v26 = vld [vmem:[%s595_s21 + $0xc0] sm:$0xff] }
  0x1a   : > { %362 = vst.msk [vmem:[%s623_s26 + $0x20] sm:$0xff] %vm357_vm0, %v329_v35  ;;  %363 = vst.msk [vmem:[%s623_s26 + $0x28] sm:$0xff] %vm357_vm0, %v330_v36  ;;  %v301_v48 = vadd.f32 %v600_v1, %v262_v40  ;;  %v302_v49 = vadd.f32 %v600_v1, %v263_v41  ;;  %v303_v50 = vadd.f32 %v600_v1, %v264_v42  ;;  %v240_v27 = vld [vmem:[%s595_s21 + $0xc8] sm:$0xff]  ;;  %v241_v28 = vld [vmem:[%s595_s21 + $0xd0] sm:$0xff] }
  0x1b   : > { %364 = vst.msk [vmem:[%s623_s26 + $0x30] sm:$0xff] %vm357_vm0, %v331_v39  ;;  %v268_v51 = vmul.f32 %v590_v0, %v229_v38  ;;  %365 = vst.msk [vmem:[%s623_s26 + $0x38] sm:$0xff] %vm357_vm0, %v332_v44  ;;  %v304_v52 = vadd.f32 %v600_v1, %v265_v45  ;;  %v305_v53 = vadd.f32 %v600_v1, %v266_v46  ;;  %v242_v33 = vld [vmem:[%s595_s21 + $0xd8] sm:$0xff]  ;;  %v243_v34 = vld [vmem:[%s595_s21 + $0xe0] sm:$0xff] }
  0x1c   : > { %v306_v54 = vadd.f32 %v600_v1, %v267_v47  ;;  %v269_v55 = vmul.f32 %v590_v0, %v230_v43  ;;  %v333_v59 = vmax.f32 %v301_v48, 0.0  ;;  %v334_v60 = vmax.f32 %v302_v49, 0.0  ;;  %v244_v35 = vld [vmem:[%s595_s21 + $0xe8] sm:$0xff]  ;;  %v245_v40 = vld [vmem:[%s595_s21 + $0xf0] sm:$0xff]  ;;  %v246_v45 = vld [vmem:[%s595_s21 + $0xf8] sm:$0xff] }
  0x1d   : > { %v335_v61 = vmax.f32 %v303_v50, 0.0  ;;  %v307_v62 = vadd.f32 %v600_v1, %v268_v51  ;;  %v336_v4 = vmax.f32 %v304_v52, 0.0  ;;  %v337_v5 = vmax.f32 %v305_v53, 0.0 }
  0x1e   : > { %v338_v6 = vmax.f32 %v306_v54, 0.0  ;;  %v308_v7 = vadd.f32 %v600_v1, %v269_v55  ;;  %366 = vst.msk [vmem:[%s623_s26 + $0x40] sm:$0xff] %vm357_vm0, %v333_v59  ;;  %367 = vst.msk [vmem:[%s623_s26 + $0x48] sm:$0xff] %vm357_vm0, %v334_v60  ;;  %v270_v10 = vmul.f32 %v590_v0, %v231_v56  ;;  %v271_v11 = vmul.f32 %v590_v0, %v232_v57 }
  0x1f   : > { %368 = vst.msk [vmem:[%s623_s26 + $0x50] sm:$0xff] %vm357_vm0, %v335_v61  ;;  %v339_v9 = vmax.f32 %v307_v62, 0.0  ;;  %v272_v12 = vmul.f32 %v590_v0, %v233_v58  ;;  %369 = vst.msk [vmem:[%s623_s26 + $0x58] sm:$0xff] %vm357_vm0, %v336_v4  ;;  %v273_v15 = vmul.f32 %v590_v0, %v234_v63  ;;  %v274_v16 = vmul.f32 %v590_v0, %v235_v2 }
  0x20   : > { %370 = vst.msk [vmem:[%s623_s26 + $0x60] sm:$0xff] %vm357_vm0, %v337_v5  ;;  %371 = vst.msk [vmem:[%s623_s26 + $0x68] sm:$0xff] %vm357_vm0, %v338_v6  ;;  %v340_v14 = vmax.f32 %v308_v7, 0.0  ;;  %v275_v17 = vmul.f32 %v590_v0, %v236_v3  ;;  %v309_v18 = vadd.f32 %v600_v1, %v270_v10  ;;  %v310_v19 = vadd.f32 %v600_v1, %v271_v11 }
  0x21   : > { %372 = vst.msk [vmem:[%s623_s26 + $0x70] sm:$0xff] %vm357_vm0, %v339_v9  ;;  %v311_v20 = vadd.f32 %v600_v1, %v272_v12  ;;  %v276_v21 = vmul.f32 %v590_v0, %v237_v8  ;;  %v312_v22 = vadd.f32 %v600_v1, %v273_v15  ;;  %v313_v23 = vadd.f32 %v600_v1, %v274_v16 }
  0x22   : > { %373 = vst.msk [vmem:[%s623_s26 + $0x78] sm:$0xff] %vm357_vm0, %v340_v14  ;;  %v314_v24 = vadd.f32 %v600_v1, %v275_v17  ;;  %v277_v25 = vmul.f32 %v590_v0, %v238_v13  ;;  %v341_v29 = vmax.f32 %v309_v18, 0.0  ;;  %v342_v30 = vmax.f32 %v310_v19, 0.0 }
  0x23   : > { %v343_v31 = vmax.f32 %v311_v20, 0.0  ;;  %v315_v32 = vadd.f32 %v600_v1, %v276_v21  ;;  %v344_v36 = vmax.f32 %v312_v22, 0.0  ;;  %v345_v37 = vmax.f32 %v313_v23, 0.0 }
  0x24   : > { %v346_v38 = vmax.f32 %v314_v24, 0.0  ;;  %v316_v39 = vadd.f32 %v600_v1, %v277_v25  ;;  %374 = vst.msk [vmem:[%s623_s26 + $0x80] sm:$0xff] %vm357_vm0, %v341_v29  ;;  %375 = vst.msk [vmem:[%s623_s26 + $0x88] sm:$0xff] %vm357_vm0, %v342_v30  ;;  %v278_v42 = vmul.f32 %v590_v0, %v239_v26  ;;  %v279_v43 = vmul.f32 %v590_v0, %v240_v27 }
  0x25   : > { %376 = vst.msk [vmem:[%s623_s26 + $0x90] sm:$0xff] %vm357_vm0, %v343_v31  ;;  %v347_v41 = vmax.f32 %v315_v32, 0.0  ;;  %v280_v44 = vmul.f32 %v590_v0, %v241_v28  ;;  %377 = vst.msk [vmem:[%s623_s26 + $0x98] sm:$0xff] %vm357_vm0, %v344_v36  ;;  %v281_v47 = vmul.f32 %v590_v0, %v242_v33  ;;  %v282_v48 = vmul.f32 %v590_v0, %v243_v34 }
  0x26   : > { %378 = vst.msk [vmem:[%s623_s26 + $0xa0] sm:$0xff] %vm357_vm0, %v345_v37  ;;  %379 = vst.msk [vmem:[%s623_s26 + $0xa8] sm:$0xff] %vm357_vm0, %v346_v38  ;;  %v348_v46 = vmax.f32 %v316_v39, 0.0  ;;  %v283_v49 = vmul.f32 %v590_v0, %v244_v35  ;;  %v317_v50 = vadd.f32 %v600_v1, %v278_v42  ;;  %v318_v51 = vadd.f32 %v600_v1, %v279_v43 }
  0x27   : > { %380 = vst.msk [vmem:[%s623_s26 + $0xb0] sm:$0xff] %vm357_vm0, %v347_v41  ;;  %v319_v52 = vadd.f32 %v600_v1, %v280_v44  ;;  %v284_v53 = vmul.f32 %v590_v0, %v245_v40  ;;  %v320_v54 = vadd.f32 %v600_v1, %v281_v47  ;;  %v321_v55 = vadd.f32 %v600_v1, %v282_v48 }
  0x28   : > { %381 = vst.msk [vmem:[%s623_s26 + $0xb8] sm:$0xff] %vm357_vm0, %v348_v46  ;;  %v322_v56 = vadd.f32 %v600_v1, %v283_v49  ;;  %v285_v57 = vmul.f32 %v590_v0, %v246_v45  ;;  %v349_v58 = vmax.f32 %v317_v50, 0.0  ;;  %v350_v59 = vmax.f32 %v318_v51, 0.0 }
  0x29   : > { %v351_v60 = vmax.f32 %v319_v52, 0.0  ;;  %v323_v61 = vadd.f32 %v600_v1, %v284_v53  ;;  %v352_v62 = vmax.f32 %v320_v54, 0.0  ;;  %v353_v63 = vmax.f32 %v321_v55, 0.0 }
  0x2a   : > { %v354_v2 = vmax.f32 %v322_v56, 0.0  ;;  %v324_v3 = vadd.f32 %v600_v1, %v285_v57  ;;  %382 = vst.msk [vmem:[%s623_s26 + $0xc0] sm:$0xff] %vm357_vm0, %v349_v58  ;;  %383 = vst.msk [vmem:[%s623_s26 + $0xc8] sm:$0xff] %vm357_vm0, %v350_v59 }
  0x2b   : > { %384 = vst.msk [vmem:[%s623_s26 + $0xd0] sm:$0xff] %vm357_vm0, %v351_v60  ;;  %v355_v4 = vmax.f32 %v323_v61, 0.0  ;;  %385 = vst.msk [vmem:[%s623_s26 + $0xd8] sm:$0xff] %vm357_vm0, %v352_v62 }
  0x2c   : > { %386 = vst.msk [vmem:[%s623_s26 + $0xe0] sm:$0xff] %vm357_vm0, %v353_v63  ;;  %387 = vst.msk [vmem:[%s623_s26 + $0xe8] sm:$0xff] %vm357_vm0, %v354_v2  ;;  %v356_v0 = vmax.f32 %v324_v3, 0.0 }
  0x2d   : > { %388 = vst.msk [vmem:[%s623_s26 + $0xf0] sm:$0xff] %vm357_vm0, %v355_v4 }
  0x2e   : > { %389 = vst.msk [vmem:[%s623_s26 + $0xf8] sm:$0xff] %vm357_vm0, %v356_v0 }
  0x2f PF: > { %s13_s14 = sadd.s32 1, %s547_s14   ;;  %s780_s12 = smov %s543_s13 }
  0x30   : > { %p10_p5 = scmp.ge.s32.totalorder %s13_s14, 4   ;;  %s781_s13 = smov %s783_s15 }
  0x32   :  { %12 = sbr.rel (!%p10_p5) target bundleno = 2 (0x2), region = 62 }

// kernel: _lambda_.8
= control target key start
LH: loop header
LB: loop body
LE: loop exit
PB: predicated region body
PF: predicated region fallthrough
CT: control target
= control target key end

     0   :  { %s4143_s12 = smov 0   ;;  %s4145_s13 = smov 0   ;;  %s4835_s0 = inlined_call_operand.vmem [shape: f32[2,1,18,18,3], index: 0, kind: input, shape index: {}]   ;;  %s4836_s1 = inlined_call_operand.vmem [shape: bf16[9,3,4], index: 1, kind: input, shape index: {}]   ;;  %s4837_s2 = inlined_call_operand.vmem [shape: f32[1,4], index: 2, kind: input, shape index: {}]   ;;  %s4838_s3 = inlined_call_operand.vmem [shape: f32[2,16,16,4], index: 3, kind: output, shape index: {}]  }
   0x1   :  { %s4147_s14 = smov 0  }
   0x2 LB: > { %s25_s15 = sadd.s32 1, %s4116_s13  ;;  %p3003_p0 = scmp.ge.s32.totalorder %s4120_s14, 1  ;;  %s4120_s14 = sphi %s4147_s14, %s13_s14   ;;  %s4116_s13 = sphi %s4145_s13, %s4840_s13   ;;  %s4112_s12 = sphi %s4143_s12, %s4839_s12  }
   0x3   : > { %p27_p1 = scmp.ge.s32.totalorder %s25_s15, 2  ;;  %p157_p2 = scmp.lt.s32.totalorder %s4120_s14, 3 }
   0x5   : > { %s4842_s15 = smov (%p27_p1, %s25_s15), 0  ;;  %p158_p3 = pnand %p3003_p0, %p157_p2 }
   0x6   : > { %v3007_v0 = vld [vmem:[%s4836_s1 + $0x2] sm:$0x3] (!%p158_p3)  ;;  %vm359_vm0 = vcmask (!%p158_p3), 1040384   ;;  %vm360_vm1 = vcmask (!%p158_p3), 1041408   ;;  %p190_p4 = scmp.lt.s32.totalorder (!%p158_p3), %s4112_s12, 1  ;;  %v4122_v1 = vmov (!%p158_p3), 65535  }
   0x7   : > { %161 = sbr.rel (%p158_p3) target bundleno = 525 (0x20d), region = 32  ;;  %v361_v2 = vsel (!%p158_p3), %vm359_vm0, 4294967295, %v4122_v1  ;;  %v3138_v3 = vld [vmem:[%s4836_s1 + $0x8] sm:$0x3] (!%p158_p3)  ;;  %v259_v4 = vld [vmem:[%s4836_s1] sm:$0x3] (!%p158_p3) }
   0x8   : > { %v4170_v5 = vsel (!%p158_p3), %vm360_vm1, %v361_v2, 0  ;;  %v3187_v6 = vld [vmem:[%s4836_s1 + $0xa] sm:$0x3] (!%p158_p3)  ;;  %v3236_v11 = vld [vmem:[%s4836_s1 + $0xc] sm:$0x3] (!%p158_p3)  ;;  %vm310_vm2 = vcmask (!%p158_p3), 23552  }
   0x9   : > { %v364_v7 = vand.u32 (!%p158_p3), %v3007_v0, %v4170_v5  ;;  %v4179_v8 = vand.u32 (!%p158_p3), %v3138_v3, %v4170_v5  ;;  %v576_v9 = vand.u32 (!%p158_p3), %v4170_v5, %v259_v4  ;;  %v1721_v10 = vand.u32 (!%p158_p3), %v3187_v6, %v4170_v5  ;;  %v3040_v12 = vld [vmem:[%s4836_s1 + $0x4] sm:$0x3] (!%p158_p3)  ;;  %v3285_v54 = vld [vmem:[%s4836_s1 + $0xe] sm:$0x3] (!%p158_p3) }
   0xa   : > { %v2016_v25 = vand.u32 (!%p158_p3), %v3236_v11, %v4170_v5  ;;  %v4214_v26 = vand.u32 (!%p158_p3), %v3040_v12, %v4170_v5  ;;  %v4291_v58 = vand.u32 (!%p158_p3), %v3285_v54, %v4170_v5  ;;  %vm2870_vm3 = vcmask (!%p158_p3), 31744  }
   0xb   : > { %3508 = vmatprep.subr.bf16.mxu1 (!%p158_p3), %v364_v7  ;;  %3644 = vmatprep.subr.bf16.mxu0 (!%p158_p3), %v4179_v8 }
   0xc   : > { %3509 = vmatpush3.bf16.msra.mxu1 (!%p158_p3), %v364_v7  ;;  %3645 = vmatpush3.bf16.msra.mxu0 (!%p158_p3), %v4179_v8 }
   0xd   : > { %3542 = vmatprep.subr.bf16.mxu1 (!%p158_p3), %v576_v9  ;;  %3678 = vmatprep.subr.bf16.mxu0 (!%p158_p3), %v1721_v10 }
   0xe   : > { %s4844_s12 = smov (!%p190_p4, %s4112_s12), 1 }
   0xf   : > { %s4072_s24 = smul.u32 432, %s4844_s12  ;;  %s3354_s17 = sshll.u32 %s4844_s12, 8 }
  0x10   : > { %s4725_s20 = scalar_lea.vmem %s4838_s3, %s3354_s17 }
  0x11   : > { %s4189_s27 = scalar_lea.vmem %s4835_s0, %s4072_s24 }
  0x12   : > { %v260_v13 = vld [vmem:[%s4189_s27 + $0x1] sm:$0xff]  ;;  %v261_v14 = vld [vmem:[%s4189_s27 + $0x9] sm:$0xff]  ;;  %v3106_v15 = vld [vmem:[%s4189_s27 + $0x19] sm:$0xff] }
  0x13   : > { %v292_v16 = vpack.c.bf16 %v261_v14, %v260_v13  ;;  %v3107_v17 = vld [vmem:[%s4189_s27 + $0x21] sm:$0xff]  ;;  %v3108_v18 = vld [vmem:[%s4189_s27 + $0x31] sm:$0xff]  ;;  %v3109_v19 = vld [vmem:[%s4189_s27 + $0x39] sm:$0xff] }
  0x14   : > { %v1360_v20 = vpack.c.bf16 %v3107_v17, %v3106_v15  ;;  %v4203_v21 = vpack.c.bf16 %v3109_v19, %v3108_v18  ;;  %v3110_v22 = vld [vmem:[%s4189_s27 + $0x49] sm:$0xff]  ;;  %v3111_v23 = vld [vmem:[%s4189_s27 + $0x51] sm:$0xff]  ;;  %v3112_v27 = vld [vmem:[%s4189_s27 + $0x61] sm:$0xff] }
  0x15   : > { %3510 = vmatprep.mubr.msk.bf16.mxu1 %vm310_vm2, %v292_v16  ;;  %v4208_v24 = vpack.c.bf16 %v3111_v23, %v3110_v22  ;;  %v3113_v28 = vld [vmem:[%s4189_s27 + $0x69] sm:$0xff]  ;;  %v3114_v29 = vld [vmem:[%s4189_s27 + $0x79] sm:$0xff]  ;;  %v3115_v30 = vld [vmem:[%s4189_s27 + $0x81] sm:$0xff] }
  0x16   : > { %3646 = vmatprep.mubr.msk.bf16.mxu0 %vm310_vm2, %v1360_v20  ;;  %3511 = vmatmul.mubr.msk.bf16.vlgmr.msra.gmra.mrb[0].mxu1 %vm310_vm2, %v1360_v20  ;;  %v4227_v31 = vpack.c.bf16 %v3113_v28, %v3112_v27  ;;  %v4229_v32 = vpack.c.bf16 %v3115_v30, %v3114_v29  ;;  %v3116_v33 = vld [vmem:[%s4189_s27 + $0x91] sm:$0xff]  ;;  %v3117_v34 = vld [vmem:[%s4189_s27 + $0x99] sm:$0xff]  ;;  %v3118_v35 = vld [vmem:[%s4189_s27 + $0xa9] sm:$0xff] }
  0x17   : > { %3543 = vmatpush3.bf16.msra.mxu1 %v576_v9  ;;  %3647 = vmatmul.mubr.msk.bf16.vlgmr.msra.gmra.mrb[0].mxu0 %vm310_vm2, %v4203_v21  ;;  %v3119_v36 = vld [vmem:[%s4189_s27 + $0xb1] sm:$0xff]  ;;  %v4243_v37 = vpack.c.bf16 %v3117_v34, %v3116_v33  ;;  %v3120_v39 = vld [vmem:[%s4189_s27 + $0xc1] sm:$0xff]  ;;  %v3121_v40 = vld [vmem:[%s4189_s27 + $0xc9] sm:$0xff] }
  0x18   : > { %3679 = vmatpush3.bf16.msra.mxu0 %v1721_v10  ;;  %3514 = vmatprep.mubr.msk.bf16.mxu1 %vm310_vm2, %v4203_v21  ;;  %v4245_v38 = vpack.c.bf16 %v3119_v36, %v3118_v35  ;;  %v3155_v41 = vld [vmem:[%s4189_s27 + $0x1a] sm:$0xff]  ;;  %v3156_v42 = vld [vmem:[%s4189_s27 + $0x22] sm:$0xff]  ;;  %v4259_v43 = vpack.c.bf16 %v3121_v40, %v3120_v39  ;;  %v3157_v47 = vld [vmem:[%s4189_s27 + $0x32] sm:$0xff] }
  0x19   : > { %3650 = vmatprep.mubr.msk.bf16.mxu0 %vm310_vm2, %v4208_v24  ;;  %3712 = vmatprep.subr.bf16.mxu0 %v2016_v25  ;;  %v4261_v44 = vpack.c.bf16 %v3156_v42, %v3155_v41  ;;  %v278_v45 = vld [vmem:[%s4189_s27 + $0xd9] sm:$0xff]  ;;  %v279_v46 = vld [vmem:[%s4189_s27 + $0xe1] sm:$0xff]  ;;  %v280_v49 = vld [vmem:[%s4189_s27 + $0xf1] sm:$0xff] }
  0x1a   : > { %3576 = vmatprep.subr.bf16.mxu1 %v4214_v26  ;;  %v3158_v48 = vld [vmem:[%s4189_s27 + $0x3a] sm:$0xff]  ;;  %v3159_v51 = vld [vmem:[%s4189_s27 + $0x4a] sm:$0xff]  ;;  %v3160_v52 = vld [vmem:[%s4189_s27 + $0x52] sm:$0xff]  ;;  %v4279_v53 = vpack.c.bf16 %v279_v46, %v278_v45 }
  0x1b   : > { %v281_v50 = vld [vmem:[%s4189_s27 + $0xf9] sm:$0xff]  ;;  %v4284_v55 = vpack.c.bf16 %v3158_v48, %v3157_v47  ;;  %v4288_v57 = vpack.c.bf16 %v3160_v52, %v3159_v51  ;;  %v282_v59 = vld [vmem:[%s4189_s27 + $0x109] sm:$0xff]  ;;  %v283_v60 = vld [vmem:[%s4189_s27 + $0x111] sm:$0xff] }
  0x1c   : > { %v4286_v56 = vpack.c.bf16 %v281_v50, %v280_v49  ;;  %v3161_v61 = vld [vmem:[%s4189_s27 + $0x62] sm:$0xff]  ;;  %v3162_v62 = vld [vmem:[%s4189_s27 + $0x6a] sm:$0xff]  ;;  %v3163_v1 = vld [vmem:[%s4189_s27 + $0x7a] sm:$0xff]  ;;  %v4310_v3 = vpack.c.bf16 %v283_v60, %v282_v59 }
  0x1d   : > { %v284_v63 = vld [vmem:[%s4189_s27 + $0x121] sm:$0xff]  ;;  %v285_v0 = vld [vmem:[%s4189_s27 + $0x129] sm:$0xff]  ;;  %v4312_v4 = vpack.c.bf16 %v3162_v62, %v3161_v61  ;;  %v286_v9 = vld [vmem:[%s4189_s27 + $0x139] sm:$0xff] }
  0x1e   : > { %3515 = vmatmul.mubr.msk.bf16.gmra.mrb[4].mxu1 %vm310_vm2, %v4208_v24  ;;  %v3164_v2 = vld [vmem:[%s4189_s27 + $0x82] sm:$0xff]  ;;  %v4314_v6 = vpack.c.bf16 %v285_v0, %v284_v63  ;;  %v3165_v11 = vld [vmem:[%s4189_s27 + $0x92] sm:$0xff]  ;;  %v3166_v12 = vld [vmem:[%s4189_s27 + $0x9a] sm:$0xff] }
  0x1f   : > { %3651 = vmatmul.mubr.msk.bf16.gmra.mrb[4].mxu0 %vm310_vm2, %v4227_v31  ;;  %3518 = vmatprep.mubr.msk.bf16.mxu1 %vm310_vm2, %v4227_v31  ;;  %v4316_v7 = vpack.c.bf16 %v3164_v2, %v3163_v1  ;;  %v287_v10 = vld [vmem:[%s4189_s27 + $0x141] sm:$0xff]  ;;  %v288_v13 = vld [vmem:[%s4189_s27 + $0x151] sm:$0xff]  ;;  %v289_v14 = vld [vmem:[%s4189_s27 + $0x159] sm:$0xff]  ;;  %v4336_v18 = vpack.c.bf16 %v3166_v12, %v3165_v11 }
  0x20   : > { %3654 = vmatprep.mubr.msk.bf16.mxu0 %vm310_vm2, %v4229_v32  ;;  %v3167_v15 = vld [vmem:[%s4189_s27 + $0xaa] sm:$0xff]  ;;  %v3168_v16 = vld [vmem:[%s4189_s27 + $0xb2] sm:$0xff]  ;;  %v4334_v17 = vpack.c.bf16 %v287_v10, %v286_v9  ;;  %v4338_v19 = vpack.c.bf16 %v289_v14, %v288_v13  ;;  %v211_v28 = vld [vmem:[%s4189_s27] sm:$0xff] }
  0x21   : > { %v4340_v20 = vpack.c.bf16 %v3168_v16, %v3167_v15  ;;  %v290_v22 = vld [vmem:[%s4189_s27 + $0x169] sm:$0xff]  ;;  %v291_v23 = vld [vmem:[%s4189_s27 + $0x171] sm:$0xff]  ;;  %v3171_v30 = vld [vmem:[%s4189_s27 + $0xda] sm:$0xff] }
  0x22   : > { %v3170_v27 = vld [vmem:[%s4189_s27 + $0xca] sm:$0xff]  ;;  %v3172_v33 = vld [vmem:[%s4189_s27 + $0xe2] sm:$0xff]  ;;  %v4358_v34 = vpack.c.bf16 %v291_v23, %v290_v22  ;;  %v213_v40 = vld [vmem:[%s4189_s27 + $0x18] sm:$0xff] }
  0x23   : > { %v212_v29 = vld [vmem:[%s4189_s27 + $0x8] sm:$0xff]  ;;  %v4362_v39 = vpack.c.bf16 %v3172_v33, %v3171_v30  ;;  %v214_v41 = vld [vmem:[%s4189_s27 + $0x20] sm:$0xff]  ;;  %v3173_v42 = vld [vmem:[%s4189_s27 + $0xf2] sm:$0xff] }
  0x24   : > { %v243_v36 = vpack.c.bf16 %v212_v29, %v211_v28  ;;  %v3174_v45 = vld [vmem:[%s4189_s27 + $0xfa] sm:$0xff]  ;;  %v215_v46 = vld [vmem:[%s4189_s27 + $0x30] sm:$0xff]  ;;  %v4379_v50 = vpack.c.bf16 %v214_v41, %v213_v40  ;;  %v3089_v51 = vld [vmem:[%s4836_s1 + $0x6] sm:$0x3] }
  0x25   : > { %v216_v47 = vld [vmem:[%s4189_s27 + $0x38] sm:$0xff]  ;;  %v3175_v48 = vld [vmem:[%s4189_s27 + $0x10a] sm:$0xff]  ;;  %v4384_v52 = vpack.c.bf16 %v3174_v45, %v3173_v42  ;;  %v4391_v60 = vand.u32 %v3089_v51, %v4170_v5  ;;  %v3177_v63 = vld [vmem:[%s4189_s27 + $0x122] sm:$0xff] }
  0x26   : > { %3519 = vmatmul.mubr.msk.bf16.gmra.mrb[8].mxu1 %vm310_vm2, %v4229_v32  ;;  %v3176_v49 = vld [vmem:[%s4189_s27 + $0x112] sm:$0xff]  ;;  %v4386_v54 = vpack.c.bf16 %v216_v47, %v215_v46  ;;  %v217_v61 = vld [vmem:[%s4189_s27 + $0x48] sm:$0xff]  ;;  %v219_v1 = vld [vmem:[%s4189_s27 + $0x60] sm:$0xff] }
  0x27   : > { %3655 = vmatmul.mubr.msk.bf16.gmra.mrb[8].mxu0 %vm310_vm2, %v4243_v37  ;;  %3522 = vmatprep.mubr.msk.bf16.mxu1 %vm310_vm2, %v4243_v37  ;;  %v4388_v59 = vpack.c.bf16 %v3176_v49, %v3175_v48  ;;  %v218_v62 = vld [vmem:[%s4189_s27 + $0x50] sm:$0xff]  ;;  %v220_v2 = vld [vmem:[%s4189_s27 + $0x68] sm:$0xff]  ;;  %v221_v14 = vld [vmem:[%s4189_s27 + $0x78] sm:$0xff] }
  0x28   : > { %3658 = vmatprep.mubr.msk.bf16.mxu0 %vm310_vm2, %v4245_v38  ;;  %v3178_v0 = vld [vmem:[%s4189_s27 + $0x12a] sm:$0xff]  ;;  %v3180_v9 = vld [vmem:[%s4189_s27 + $0x142] sm:$0xff]  ;;  %v4411_v10 = vpack.c.bf16 %v218_v62, %v217_v61  ;;  %v4415_v12 = vpack.c.bf16 %v220_v2, %v219_v1  ;;  %v3181_v16 = vld [vmem:[%s4189_s27 + $0x152] sm:$0xff] }
  0x29   : > { %v4413_v11 = vpack.c.bf16 %v3178_v0, %v3177_v63  ;;  %v222_v15 = vld [vmem:[%s4189_s27 + $0x80] sm:$0xff]  ;;  %v223_v23 = vld [vmem:[%s4189_s27 + $0x90] sm:$0xff]  ;;  %v225_v40 = vld [vmem:[%s4189_s27 + $0xa8] sm:$0xff] }
  0x2a   : > { %v3182_v22 = vld [vmem:[%s4189_s27 + $0x15a] sm:$0xff]  ;;  %v3184_v28 = vld [vmem:[%s4189_s27 + $0x172] sm:$0xff]  ;;  %v4435_v29 = vpack.c.bf16 %v222_v15, %v221_v14  ;;  %v3185_v42 = vld [vmem:[%s4189_s27 + $0x182] sm:$0xff] }
  0x2b   : > { %v4437_v30 = vpack.c.bf16 %v3182_v22, %v3181_v16  ;;  %v226_v41 = vld [vmem:[%s4189_s27 + $0xb0] sm:$0xff]  ;;  %v227_v46 = vld [vmem:[%s4189_s27 + $0xc0] sm:$0xff]  ;;  %v228_v47 = vld [vmem:[%s4189_s27 + $0xc8] sm:$0xff] }
  0x2c   : > { %v3186_v45 = vld [vmem:[%s4189_s27 + $0x18a] sm:$0xff]  ;;  %v4457_v48 = vpack.c.bf16 %v226_v41, %v225_v40  ;;  %v4461_v51 = vpack.c.bf16 %v228_v47, %v227_v46  ;;  %v229_v61 = vld [vmem:[%s4189_s27 + $0xd8] sm:$0xff]  ;;  %v230_v62 = vld [vmem:[%s4189_s27 + $0xe0] sm:$0xff] }
  0x2d   : > { %v4459_v49 = vpack.c.bf16 %v3186_v45, %v3185_v42  ;;  %v231_v63 = vld [vmem:[%s4189_s27 + $0xf0] sm:$0xff]  ;;  %v232_v0 = vld [vmem:[%s4189_s27 + $0xf8] sm:$0xff]  ;;  %v4475_v1 = vpack.c.bf16 %v230_v62, %v229_v61  ;;  %v233_v14 = vld [vmem:[%s4189_s27 + $0x108] sm:$0xff] }
  0x2e   : > { %3523 = vmatmul.mubr.msk.bf16.gmra.mrb[12].mxu1 %vm310_vm2, %v4245_v38  ;;  %v3334_v2 = vld [vmem:[%s4836_s1 + $0x10] sm:$0x3]  ;;  %v236_v16 = vld [vmem:[%s4189_s27 + $0x128] sm:$0xff] }
  0x2f   : > { %3659 = vmatmul.mubr.msk.bf16.gmra.mrb[12].mxu0 %vm310_vm2, %v4259_v43  ;;  %3526 = vmatprep.mubr.msk.bf16.mxu1 %vm310_vm2, %v4259_v43  ;;  %v234_v15 = vld [vmem:[%s4189_s27 + $0x110] sm:$0xff]  ;;  %v241_v42 = vld [vmem:[%s4189_s27 + $0x168] sm:$0xff] }
  0x30   : > { %3680 = vmatprep.mubr.msk.bf16.mxu0 %vm310_vm2, %v4261_v44  ;;  %v4499_v22 = vpack.c.bf16 %v234_v15, %v233_v14  ;;  %v242_v45 = vld [vmem:[%s4189_s27 + $0x170] sm:$0xff]  ;;  %v739_v46 = vld [vmem:[%s4189_s27 + $0x2] sm:$0xff] }
  0x31   : > { %v740_v47 = vld [vmem:[%s4189_s27 + $0xa] sm:$0xff]  ;;  %v4531_v61 = vpack.c.bf16 %v242_v45, %v241_v42 }
  0x32   : > { %v771_v62 = vpack.c.bf16 %v740_v47, %v739_v46 }
  0x36   : > { %3527 = vmatmul.mubr.msk.bf16.gmra.mrb[16].mxu1 %vm310_vm2, %v4279_v53 }
  0x37   : > { %3681 = vmatmul.mubr.msk.bf16.vlgmr.msra.gmra.mrb[0].mxu0 %vm310_vm2, %v4284_v55  ;;  %3530 = vmatprep.mubr.msk.bf16.mxu1 %vm310_vm2, %v4286_v56 }
  0x38   : > { %3713 = vmatpush3.bf16.msra.mxu0 %v2016_v25  ;;  %3684 = vmatprep.mubr.msk.bf16.mxu0 %vm310_vm2, %v4288_v57  ;;  %v3169_v25 = vld [vmem:[%s4189_s27 + $0xc2] sm:$0xff] }
  0x39   : > { %3746 = vmatprep.subr.bf16.mxu0 %v4291_v58  ;;  %v4360_v35 = vpack.c.bf16 %v3170_v27, %v3169_v25  ;;  %v224_v25 = vld [vmem:[%s4189_s27 + $0x98] sm:$0xff]  ;;  %v3183_v27 = vld [vmem:[%s4189_s27 + $0x16a] sm:$0xff] }
  0x3a   : > { %v4439_v33 = vpack.c.bf16 %v224_v25, %v223_v23  ;;  %v238_v25 = vld [vmem:[%s4189_s27 + $0x140] sm:$0xff] }
  0x3e   : > { %3531 = vmatmul.mubr.msk.bf16.gmra.mrb[20].mxu1 %vm310_vm2, %v4310_v3 }
  0x3f   : > { %3685 = vmatmul.mubr.msk.bf16.gmra.mrb[4].mxu0 %vm310_vm2, %v4312_v4  ;;  %3534 = vmatprep.mubr.msk.bf16.mxu1 %vm310_vm2, %v4314_v6 }
  0x40   : > { %3688 = vmatprep.mubr.msk.bf16.mxu0 %vm310_vm2, %v4316_v7 }
  0x46   : > { %3535 = vmatmul.mubr.msk.bf16.gmra.mrb[24].mxu1 %vm310_vm2, %v4334_v17 }
  0x47   : > { %3689 = vmatmul.mubr.msk.bf16.gmra.mrb[8].mxu0 %vm310_vm2, %v4336_v18  ;;  %3538 = vmatprep.mubr.msk.bf16.mxu1 %vm310_vm2, %v4338_v19 }
  0x48   : > { %3692 = vmatprep.mubr.msk.bf16.mxu0 %vm310_vm2, %v4340_v20 }
  0x4e   : > { %3539 = vmatmul.mubr.msk.bf16.gmra.mrb[28].mxu1 %vm310_vm2, %v4358_v34 }
  0x4f   : > { %3693 = vmatmul.mubr.msk.bf16.gmra.mrb[12].mxu0 %vm310_vm2, %v4360_v35  ;;  %3544 = vmatprep.mubr.msk.bf16.mxu1 %vm310_vm2, %v243_v36  ;;  %v4441_v36 = vpack.c.bf16 %v3184_v28, %v3183_v27  ;;  %v239_v27 = vld [vmem:[%s4189_s27 + $0x150] sm:$0xff]  ;;  %v240_v28 = vld [vmem:[%s4189_s27 + $0x158] sm:$0xff] }
  0x50   : > { %3696 = vmatprep.mubr.msk.bf16.mxu0 %vm310_vm2, %v4362_v39  ;;  %v4517_v41 = vpack.c.bf16 %v240_v28, %v239_v27 }
  0x56   : > { %3545 = vmatmul.mubr.msk.bf16.vlgmr.msra.gmra.mrb[0].mxu1 %vm310_vm2, %v4379_v50 }
  0x57   : > { %3577 = vmatpush3.bf16.msra.mxu1 %v4214_v26  ;;  %3697 = vmatmul.mubr.msk.bf16.gmra.mrb[16].mxu0 %vm310_vm2, %v4384_v52  ;;  %v3179_v26 = vld [vmem:[%s4189_s27 + $0x13a] sm:$0xff] }
  0x58   : > { %3548 = vmatprep.mubr.msk.bf16.mxu1 %vm310_vm2, %v4386_v54  ;;  %3700 = vmatprep.mubr.msk.bf16.mxu0 %vm310_vm2, %v4388_v59  ;;  %v4417_v13 = vpack.c.bf16 %v3180_v9, %v3179_v26  ;;  %v4480_v26 = vpack.c.bf16 %v232_v0, %v231_v63  ;;  %v4483_v9 = vand.u32 %v3334_v2, %v4170_v5  ;;  %v235_v5 = vld [vmem:[%s4189_s27 + $0x120] sm:$0xff]  ;;  %v3234_v0 = vld [vmem:[%s4189_s27 + $0x198] sm:$0xff] }
  0x59   : > { %3610 = vmatprep.subr.bf16.mxu1 %v4391_v60  ;;  %v4501_v23 = vpack.c.bf16 %v236_v16, %v235_v5  ;;  %v3235_v2 = vld [vmem:[%s4189_s27 + $0x1a0] sm:$0xff] }
  0x5a   : > { %v1964_v14 = vpack.c.bf16 %v3235_v2, %v3234_v0 }
  0x5e   : > { %3549 = vmatmul.mubr.msk.bf16.gmra.mrb[4].mxu1 %vm310_vm2, %v4411_v10 }
  0x5f   : > { %3701 = vmatmul.mubr.msk.bf16.gmra.mrb[20].mxu0 %vm310_vm2, %v4413_v11  ;;  %3552 = vmatprep.mubr.msk.bf16.mxu1 %vm310_vm2, %v4415_v12 }
  0x60   : > { %3704 = vmatprep.mubr.msk.bf16.mxu0 %vm310_vm2, %v4417_v13 }
  0x66   : > { %3553 = vmatmul.mubr.msk.bf16.gmra.mrb[8].mxu1 %vm310_vm2, %v4435_v29 }
  0x67   : > { %3705 = vmatmul.mubr.msk.bf16.gmra.mrb[24].mxu0 %vm310_vm2, %v4437_v30  ;;  %3556 = vmatprep.mubr.msk.bf16.mxu1 %vm310_vm2, %v4439_v33 }
  0x68   : > { %3708 = vmatprep.mubr.msk.bf16.mxu0 %vm310_vm2, %v4441_v36 }
  0x6e   : > { %3557 = vmatmul.mubr.msk.bf16.gmra.mrb[12].mxu1 %vm310_vm2, %v4457_v48 }
  0x6f   : > { %3709 = vmatmul.mubr.msk.bf16.gmra.mrb[28].mxu0 %vm310_vm2, %v4459_v49  ;;  %3560 = vmatprep.mubr.msk.bf16.mxu1 %vm310_vm2, %v4461_v51 }
  0x70   : > { %3714 = vmatprep.mubr.msk.bf16.mxu0 %vm310_vm2, %v4386_v54 }
  0x76   : > { %3561 = vmatmul.mubr.msk.bf16.gmra.mrb[16].mxu1 %vm310_vm2, %v4475_v1 }
  0x77   : > { %3715 = vmatmul.mubr.msk.bf16.vlgmr.msra.gmra.mrb[0].mxu0 %vm310_vm2, %v4411_v10  ;;  %3564 = vmatprep.mubr.msk.bf16.mxu1 %vm310_vm2, %v4480_v26 }
  0x78   : > { %3747 = vmatpush3.bf16.msra.mxu0 %v4291_v58  ;;  %3718 = vmatprep.mubr.msk.bf16.mxu0 %vm310_vm2, %v4415_v12  ;;  %v237_v58 = vld [vmem:[%s4189_s27 + $0x138] sm:$0xff] }
  0x79   : > { %3780 = vmatprep.subr.bf16.mxu0 %v4483_v9  ;;  %v4515_v40 = vpack.c.bf16 %v238_v25, %v237_v58 }
  0x7e   : > { %3565 = vmatmul.mubr.msk.bf16.gmra.mrb[20].mxu1 %vm310_vm2, %v4499_v22 }
  0x7f   : > { %3719 = vmatmul.mubr.msk.bf16.gmra.mrb[4].mxu0 %vm310_vm2, %v4435_v29  ;;  %3568 = vmatprep.mubr.msk.bf16.mxu1 %vm310_vm2, %v4501_v23 }
  0x80   : > { %3722 = vmatprep.mubr.msk.bf16.mxu0 %vm310_vm2, %v4439_v33 }
  0x86   : > { %3569 = vmatmul.mubr.msk.bf16.gmra.mrb[24].mxu1 %vm310_vm2, %v4515_v40 }
  0x87   : > { %3723 = vmatmul.mubr.msk.bf16.gmra.mrb[8].mxu0 %vm310_vm2, %v4457_v48  ;;  %3572 = vmatprep.mubr.msk.bf16.mxu1 %vm310_vm2, %v4517_v41 }
  0x88   : > { %3726 = vmatprep.mubr.msk.bf16.mxu0 %vm310_vm2, %v4461_v51 }
  0x8e   : > { %3573 = vmatmul.mubr.msk.bf16.gmra.mrb[28].mxu1 %vm310_vm2, %v4531_v61 }
  0x8f   : > { %3727 = vmatmul.mubr.msk.bf16.gmra.mrb[12].mxu0 %vm310_vm2, %v4475_v1  ;;  %3578 = vmatprep.mubr.msk.bf16.mxu1 %vm310_vm2, %v771_v62 }
  0x90   : > { %3730 = vmatprep.mubr.msk.bf16.mxu0 %vm310_vm2, %v4480_v26 }
  0x96   : > { %3579 = vmatmul.mubr.msk.bf16.vlgmr.msra.gmra.mrb[0].mxu1 %vm310_vm2, %v4261_v44  ;;  %v3232_v44 = vld [vmem:[%s4189_s27 + $0x180] sm:$0xff] }
  0x97   : > { %3611 = vmatpush3.bf16.msra.mxu1 %v4391_v60  ;;  %3731 = vmatmul.mubr.msk.bf16.gmra.mrb[16].mxu0 %vm310_vm2, %v4499_v22  ;;  %v3233_v60 = vld [vmem:[%s4189_s27 + $0x188] sm:$0xff] }
  0x98   : > { %3582 = vmatprep.mubr.msk.bf16.mxu1 %vm310_vm2, %v4284_v55  ;;  %3734 = vmatprep.mubr.msk.bf16.mxu0 %vm310_vm2, %v4501_v23  ;;  %v4560_v63 = vpack.c.bf16 %v3233_v60, %v3232_v44 }
  0x99   : > { %3814 = vmatprep.subr.bf16.mxu1 %v4179_v8 }
  0x9e   : > { %3583 = vmatmul.mubr.msk.bf16.gmra.mrb[4].mxu1 %vm310_vm2, %v4288_v57 }
  0x9f   : > { %3735 = vmatmul.mubr.msk.bf16.gmra.mrb[20].mxu0 %vm310_vm2, %v4515_v40  ;;  %3586 = vmatprep.mubr.msk.bf16.mxu1 %vm310_vm2, %v4312_v4 }
  0xa0   : > { %3738 = vmatprep.mubr.msk.bf16.mxu0 %vm310_vm2, %v4517_v41 }
  0xa6   : > { %3587 = vmatmul.mubr.msk.bf16.gmra.mrb[8].mxu1 %vm310_vm2, %v4316_v7 }
  0xa7   : > { %3739 = vmatmul.mubr.msk.bf16.gmra.mrb[24].mxu0 %vm310_vm2, %v4531_v61  ;;  %3590 = vmatprep.mubr.msk.bf16.mxu1 %vm310_vm2, %v4336_v18 }
  0xa8   : > { %3742 = vmatprep.mubr.msk.bf16.mxu0 %vm310_vm2, %v4560_v63 }
  0xae   : > { %3591 = vmatmul.mubr.msk.bf16.gmra.mrb[12].mxu1 %vm310_vm2, %v4340_v20 }
  0xaf   : > { %3743 = vmatmul.mubr.msk.bf16.gmra.mrb[28].mxu0 %vm310_vm2, %v1964_v14  ;;  %3594 = vmatprep.mubr.msk.bf16.mxu1 %vm310_vm2, %v4360_v35 }
  0xb0   : > { %3748 = vmatprep.mubr.msk.bf16.mxu0 %vm310_vm2, %v4203_v21  ;;  %v3282_v21 = vld [vmem:[%s4189_s27 + $0x189] sm:$0xff] }
  0xb6   : > { %3595 = vmatmul.mubr.msk.bf16.gmra.mrb[16].mxu1 %vm310_vm2, %v4362_v39 }
  0xb7   : > { %3749 = vmatmul.mubr.msk.bf16.vlgmr.msra.gmra.mrb[0].mxu0 %vm310_vm2, %v4208_v24  ;;  %3598 = vmatprep.mubr.msk.bf16.mxu1 %vm310_vm2, %v4384_v52 }
  0xb8   : > { %3781 = vmatpush3.bf16.msra.mxu0 %v4483_v9  ;;  %3752 = vmatprep.mubr.msk.bf16.mxu0 %vm310_vm2, %v4227_v31  ;;  %v3283_v31 = vld [vmem:[%s4189_s27 + $0x199] sm:$0xff] }
  0xbe   : > { %3599 = vmatmul.mubr.msk.bf16.gmra.mrb[20].mxu1 %vm310_vm2, %v4388_v59 }
  0xbf   : > { %3753 = vmatmul.mubr.msk.bf16.gmra.mrb[4].mxu0 %vm310_vm2, %v4229_v32  ;;  %3602 = vmatprep.mubr.msk.bf16.mxu1 %vm310_vm2, %v4413_v11  ;;  %v3284_v32 = vld [vmem:[%s4189_s27 + $0x1a1] sm:$0xff] }
  0xc0   : > { %3756 = vmatprep.mubr.msk.bf16.mxu0 %vm310_vm2, %v4243_v37  ;;  %v2258_v37 = vpack.c.bf16 %v3284_v32, %v3283_v31 }
  0xc6   : > { %3603 = vmatmul.mubr.msk.bf16.gmra.mrb[24].mxu1 %vm310_vm2, %v4417_v13 }
  0xc7   : > { %3757 = vmatmul.mubr.msk.bf16.gmra.mrb[8].mxu0 %vm310_vm2, %v4245_v38  ;;  %3606 = vmatprep.mubr.msk.bf16.mxu1 %vm310_vm2, %v4437_v30  ;;  %v3332_v38 = vld [vmem:[%s4189_s27 + $0x19a] sm:$0xff] }
  0xc8   : > { %3760 = vmatprep.mubr.msk.bf16.mxu0 %vm310_vm2, %v4259_v43  ;;  %v3333_v43 = vld [vmem:[%s4189_s27 + $0x1a2] sm:$0xff] }
  0xce   : > { %3607 = vmatmul.mubr.msk.bf16.gmra.mrb[28].mxu1 %vm310_vm2, %v4441_v36 }
  0xcf   : > { %3761 = vmatmul.mubr.msk.bf16.gmra.mrb[12].mxu0 %vm310_vm2, %v4279_v53  ;;  %3612 = vmatprep.mubr.msk.bf16.mxu1 %vm310_vm2, %v4379_v50 }
  0xd0   : > { %3764 = vmatprep.mubr.msk.bf16.mxu0 %vm310_vm2, %v4286_v56 }
  0xd6   : > { %3613 = vmatmul.mubr.msk.bf16.vlgmr.msra.gmra.mrb[0].mxu1 %vm310_vm2, %v4386_v54 }
  0xd7   : > { %3815 = vmatpush3.bf16.msra.mxu1 %v4179_v8  ;;  %3765 = vmatmul.mubr.msk.bf16.gmra.mrb[16].mxu0 %vm310_vm2, %v4310_v3  ;;  %v3281_v8 = vld [vmem:[%s4189_s27 + $0x181] sm:$0xff] }
  0xd8   : > { %3616 = vmatprep.mubr.msk.bf16.mxu1 %vm310_vm2, %v4411_v10  ;;  %3768 = vmatprep.mubr.msk.bf16.mxu0 %vm310_vm2, %v4314_v6  ;;  %v2257_v24 = vpack.c.bf16 %v3282_v21, %v3281_v8 }
  0xde   : > { %3617 = vmatmul.mubr.msk.bf16.gmra.mrb[4].mxu1 %vm310_vm2, %v4415_v12 }
  0xdf   : > { %3769 = vmatmul.mubr.msk.bf16.gmra.mrb[20].mxu0 %vm310_vm2, %v4334_v17  ;;  %3620 = vmatprep.mubr.msk.bf16.mxu1 %vm310_vm2, %v4435_v29 }
  0xe0   : > { %3772 = vmatprep.mubr.msk.bf16.mxu0 %vm310_vm2, %v4338_v19 }
  0xe6   : > { %3621 = vmatmul.mubr.msk.bf16.gmra.mrb[8].mxu1 %vm310_vm2, %v4439_v33 }
  0xe7   : > { %3773 = vmatmul.mubr.msk.bf16.gmra.mrb[24].mxu0 %vm310_vm2, %v4358_v34  ;;  %3624 = vmatprep.mubr.msk.bf16.mxu1 %vm310_vm2, %v4457_v48 }
  0xe8   : > { %3776 = vmatprep.mubr.msk.bf16.mxu0 %vm310_vm2, %v2257_v24 }
  0xee   : > { %3625 = vmatmul.mubr.msk.bf16.gmra.mrb[12].mxu1 %vm310_vm2, %v4461_v51 }
  0xef   : > { %3777 = vmatmul.mubr.msk.bf16.gmra.mrb[28].mxu0 %vm310_vm2, %v2258_v37  ;;  %3628 = vmatprep.mubr.msk.bf16.mxu1 %vm310_vm2, %v4475_v1 }
  0xf0   : > { %3782 = vmatprep.mubr.msk.bf16.mxu0 %vm310_vm2, %v4284_v55 }
  0xf6   : > { %3629 = vmatmul.mubr.msk.bf16.gmra.mrb[16].mxu1 %vm310_vm2, %v4480_v26 }
  0xf7   : > { %3783 = vmatmul.mubr.msk.bf16.vlgmr.msra.gmra.mrb[0].mxu0 %vm310_vm2, %v4288_v57  ;;  %3632 = vmatprep.mubr.msk.bf16.mxu1 %vm310_vm2, %v4499_v22 }
  0xf8   : > { %3786 = vmatprep.mubr.msk.bf16.mxu0 %vm310_vm2, %v4312_v4 }
  0xfe   : > { %3633 = vmatmul.mubr.msk.bf16.gmra.mrb[20].mxu1 %vm310_vm2, %v4501_v23 }
  0xff   : > { %3787 = vmatmul.mubr.msk.bf16.gmra.mrb[4].mxu0 %vm310_vm2, %v4316_v7  ;;  %3636 = vmatprep.mubr.msk.bf16.mxu1 %vm310_vm2, %v4515_v40 }
 0x100   : > { %3790 = vmatprep.mubr.msk.bf16.mxu0 %vm310_vm2, %v4336_v18 }
 0x106   : > { %3637 = vmatmul.mubr.msk.bf16.gmra.mrb[24].mxu1 %vm310_vm2, %v4517_v41 }
 0x107   : > { %3791 = vmatmul.mubr.msk.bf16.gmra.mrb[8].mxu0 %vm310_vm2, %v4340_v20  ;;  %3640 = vmatprep.mubr.msk.bf16.mxu1 %vm310_vm2, %v4531_v61 }
 0x108   : > { %3794 = vmatprep.mubr.msk.bf16.mxu0 %vm310_vm2, %v4360_v35 }
 0x10e   : > { %3641 = vmatmul.mubr.msk.bf16.gmra.mrb[28].mxu1 %vm310_vm2, %v4560_v63 }
 0x10f   : > { %3795 = vmatmul.mubr.msk.bf16.gmra.mrb[12].mxu0 %vm310_vm2, %v4362_v39  ;;  %3662 = vmatprep.mubr.msk.bf16.mxu1 %vm310_vm2, %v4279_v53  ;;  %v2552_v53 = vpack.c.bf16 %v3333_v43, %v3332_v38 }
 0x110   : > { %3798 = vmatprep.mubr.msk.bf16.mxu0 %vm310_vm2, %v4384_v52 }
 0x116   : > { %3663 = vmatmul.mubr.msk.bf16.vlgmr.msra.gmra.mrb[16].mxu1 %vm310_vm2, %v4286_v56 }
 0x117   : > { %3799 = vmatmul.mubr.msk.bf16.gmra.mrb[16].mxu0 %vm310_vm2, %v4388_v59  ;;  %3666 = vmatprep.mubr.msk.bf16.mxu1 %vm310_vm2, %v4310_v3  ;;  %v4718_v59 = vld [vmem:[%s4837_s2] ss:$0 sm:$0xff] }
 0x118   : > { %3802 = vmatprep.mubr.msk.bf16.mxu0 %vm310_vm2, %v4413_v11 }
 0x11e   : > { %3667 = vmatmul.mubr.msk.bf16.gmra.mrb[20].mxu1 %vm310_vm2, %v4314_v6 }
 0x11f   : > { %3803 = vmatmul.mubr.msk.bf16.gmra.mrb[20].mxu0 %vm310_vm2, %v4417_v13  ;;  %3670 = vmatprep.mubr.msk.bf16.mxu1 %vm310_vm2, %v4334_v17 }
 0x120   : > { %3806 = vmatprep.mubr.msk.bf16.mxu0 %vm310_vm2, %v4437_v30 }
 0x126   : > { %3671 = vmatmul.mubr.msk.bf16.gmra.mrb[24].mxu1 %vm310_vm2, %v4338_v19 }
 0x127   : > { %3807 = vmatmul.mubr.msk.bf16.gmra.mrb[24].mxu0 %vm310_vm2, %v4441_v36  ;;  %3674 = vmatprep.mubr.msk.bf16.mxu1 %vm310_vm2, %v4358_v34 }
 0x128   : > { %3810 = vmatprep.mubr.msk.bf16.mxu0 %vm310_vm2, %v4459_v49 }
 0x12e   : > { %3675 = vmatmul.mubr.msk.bf16.gmra.mrb[28].mxu1 %vm310_vm2, %v2257_v24 }
 0x12f   : > { %3811 = vmatmul.mubr.msk.bf16.gmra.mrb[28].mxu0 %vm310_vm2, %v2552_v53 }
 0x1a9   : > { %v3614_v55 = vpop.f32.mrb[0].mxu1 }
 0x1aa   : > { %v1169_v56 = vpop.f32.mrb[1].mxu1 }
 0x1ab   : > { %v3615_v57 = vpop.f32.mrb[2].mxu1 }
 0x1ac   : > { %v1172_v3 = vpop.f32.mrb[3].mxu1 }
 0x1b1   : > { %v3618_v4 = vpop.f32.mrb[4].mxu1 }
 0x1b2   : > { %v1185_v6 = vpop.f32.mrb[5].mxu1 }
 0x1b3   : > { %v3619_v7 = vpop.f32.mrb[6].mxu1 }
 0x1b4   : > { %v1188_v17 = vpop.f32.mrb[7].mxu1 }
 0x1b9   : > { %v3622_v18 = vpop.f32.mrb[8].mxu1 }
 0x1ba   : > { %v1201_v19 = vpop.f32.mrb[9].mxu1 }
 0x1bb   : > { %v3623_v20 = vpop.f32.mrb[10].mxu1 }
 0x1bc   : > { %v1204_v34 = vpop.f32.mrb[11].mxu1 }
 0x1c1   : > { %v4707_v35 = vpop.f32.mrb[12].mxu1 }
 0x1c2   : > { %v4709_v39 = vpop.f32.mrb[13].mxu1 }
 0x1c3   : > { %v4711_v50 = vpop.f32.mrb[14].mxu1 }
 0x1c4   : > { %v4713_v52 = vpop.f32.mrb[15].mxu1 }
 0x1ca   : > { %v3784_v54 = vpop.f32.mrb[0].mxu0 }
 0x1cb   : > { %v3816_v10 = vadd.f32 %v3784_v54, %v3614_v55  ;;  %v2640_v11 = vpop.f32.mrb[1].mxu0 }
 0x1cc   : > { %v3817_v12 = vadd.f32 %v2640_v11, %v1169_v56  ;;  %v3785_v13 = vpop.f32.mrb[2].mxu0 }
 0x1cd   : > { %v2808_v29 = vadd.f32 %v3816_v10, %v4718_v59  ;;  %v3818_v30 = vadd.f32 %v3785_v13, %v3615_v57  ;;  %v2643_v33 = vpop.f32.mrb[3].mxu0 }
 0x1ce   : > { %v2806_v36 = vadd.f32 %v3817_v12, %v4718_v59  ;;  %v3819_v48 = vadd.f32 %v2643_v33, %v1172_v3 }
 0x1cf   : > { %v2840_v49 = vmax.f32 %v2808_v29, 0.0  ;;  %v2809_v51 = vadd.f32 %v3818_v30, %v4718_v59 }
 0x1d0   : > { %v2838_v1 = vmax.f32 %v2806_v36, 0.0  ;;  %v2807_v26 = vadd.f32 %v3819_v48, %v4718_v59 }
 0x1d1   : > { %2873 = vst.msk [vmem:[%s4725_s20 + $0x10] sm:$0xff] %vm2870_vm3, %v2840_v49  ;;  %v2841_v9 = vmax.f32 %v2809_v51, 0.0 }
 0x1d2   : > { %2871 = vst.msk [vmem:[%s4725_s20] sm:$0xff] %vm2870_vm3, %v2838_v1  ;;  %v2839_v15 = vmax.f32 %v2807_v26, 0.0  ;;  %v3788_v5 = vpop.f32.mrb[4].mxu0 }
 0x1d3   : > { %2874 = vst.msk [vmem:[%s4725_s20 + $0x18] sm:$0xff] %vm2870_vm3, %v2841_v9  ;;  %v3820_v16 = vadd.f32 %v3788_v5, %v3618_v4  ;;  %v2656_v22 = vpop.f32.mrb[5].mxu0 }
 0x1d4   : > { %2872 = vst.msk [vmem:[%s4725_s20 + $0x8] sm:$0xff] %vm2870_vm3, %v2839_v15  ;;  %v3821_v23 = vadd.f32 %v2656_v22, %v1185_v6  ;;  %v3789_v58 = vpop.f32.mrb[6].mxu0 }
 0x1d5   : > { %v2812_v25 = vadd.f32 %v3820_v16, %v4718_v59  ;;  %v3822_v27 = vadd.f32 %v3789_v58, %v3619_v7  ;;  %v2659_v28 = vpop.f32.mrb[7].mxu0 }
 0x1d6   : > { %v2810_v40 = vadd.f32 %v3821_v23, %v4718_v59  ;;  %v3823_v41 = vadd.f32 %v2659_v28, %v1188_v17 }
 0x1d7   : > { %v2844_v42 = vmax.f32 %v2812_v25, 0.0  ;;  %v2813_v45 = vadd.f32 %v3822_v27, %v4718_v59 }
 0x1d8   : > { %v2842_v46 = vmax.f32 %v2810_v40, 0.0  ;;  %v2811_v47 = vadd.f32 %v3823_v41, %v4718_v59 }
 0x1d9   : > { %2877 = vst.msk [vmem:[%s4725_s20 + $0x30] sm:$0xff] %vm2870_vm3, %v2844_v42  ;;  %v2845_v61 = vmax.f32 %v2813_v45, 0.0 }
 0x1da   : > { %2875 = vst.msk [vmem:[%s4725_s20 + $0x20] sm:$0xff] %vm2870_vm3, %v2842_v46  ;;  %v2843_v62 = vmax.f32 %v2811_v47, 0.0  ;;  %v3792_v44 = vpop.f32.mrb[8].mxu0 }
 0x1db   : > { %2878 = vst.msk [vmem:[%s4725_s20 + $0x38] sm:$0xff] %vm2870_vm3, %v2845_v61  ;;  %v3824_v60 = vadd.f32 %v3792_v44, %v3622_v18  ;;  %v2672_v63 = vpop.f32.mrb[9].mxu0 }
 0x1dc   : > { %2876 = vst.msk [vmem:[%s4725_s20 + $0x28] sm:$0xff] %vm2870_vm3, %v2843_v62  ;;  %v3825_v0 = vadd.f32 %v2672_v63, %v1201_v19  ;;  %v3793_v2 = vpop.f32.mrb[10].mxu0 }
 0x1dd   : > { %v2816_v14 = vadd.f32 %v3824_v60, %v4718_v59  ;;  %v3826_v8 = vadd.f32 %v3793_v2, %v3623_v20  ;;  %v2675_v21 = vpop.f32.mrb[11].mxu0 }
 0x1de   : > { %v2814_v24 = vadd.f32 %v3825_v0, %v4718_v59  ;;  %v3827_v31 = vadd.f32 %v2675_v21, %v1204_v34 }
 0x1df   : > { %v2848_v32 = vmax.f32 %v2816_v14, 0.0  ;;  %v2817_v37 = vadd.f32 %v3826_v8, %v4718_v59 }
 0x1e0   : > { %v2846_v38 = vmax.f32 %v2814_v24, 0.0  ;;  %v2815_v43 = vadd.f32 %v3827_v31, %v4718_v59 }
 0x1e1   : > { %2881 = vst.msk [vmem:[%s4725_s20 + $0x50] sm:$0xff] %vm2870_vm3, %v2848_v32  ;;  %v2849_v53 = vmax.f32 %v2817_v37, 0.0 }
 0x1e2   : > { %2879 = vst.msk [vmem:[%s4725_s20 + $0x40] sm:$0xff] %vm2870_vm3, %v2846_v38  ;;  %v2847_v55 = vmax.f32 %v2815_v43, 0.0  ;;  %v3796_v56 = vpop.f32.mrb[12].mxu0 }
 0x1e3   : > { %2882 = vst.msk [vmem:[%s4725_s20 + $0x58] sm:$0xff] %vm2870_vm3, %v2849_v53  ;;  %v3828_v57 = vadd.f32 %v3796_v56, %v4707_v35  ;;  %v2688_v3 = vpop.f32.mrb[13].mxu0 }
 0x1e4   : > { %2880 = vst.msk [vmem:[%s4725_s20 + $0x48] sm:$0xff] %vm2870_vm3, %v2847_v55  ;;  %v3829_v4 = vadd.f32 %v2688_v3, %v4709_v39  ;;  %v3797_v6 = vpop.f32.mrb[14].mxu0 }
 0x1e5   : > { %v2820_v7 = vadd.f32 %v3828_v57, %v4718_v59  ;;  %v3830_v17 = vadd.f32 %v3797_v6, %v4711_v50  ;;  %v2691_v18 = vpop.f32.mrb[15].mxu0 }
 0x1e6   : > { %v2818_v19 = vadd.f32 %v3829_v4, %v4718_v59  ;;  %v3831_v20 = vadd.f32 %v2691_v18, %v4713_v52 }
 0x1e7   : > { %v2852_v34 = vmax.f32 %v2820_v7, 0.0  ;;  %v2821_v35 = vadd.f32 %v3830_v17, %v4718_v59 }
 0x1e8   : > { %v2850_v54 = vmax.f32 %v2818_v19, 0.0  ;;  %v2819_v10 = vadd.f32 %v3831_v20, %v4718_v59 }
 0x1e9   : > { %2885 = vst.msk [vmem:[%s4725_s20 + $0x70] sm:$0xff] %vm2870_vm3, %v2852_v34  ;;  %v2853_v39 = vmax.f32 %v2821_v35, 0.0  ;;  %v3664_v11 = vpop.f32.mrb[16].mxu1 }
 0x1ea   : > { %2883 = vst.msk [vmem:[%s4725_s20 + $0x60] sm:$0xff] %vm2870_vm3, %v2850_v54  ;;  %v2851_v12 = vmax.f32 %v2819_v10, 0.0  ;;  %v3800_v50 = vpop.f32.mrb[16].mxu0  ;;  %v1527_v13 = vpop.f32.mrb[17].mxu1 }
 0x1eb   : > { %2886 = vst.msk [vmem:[%s4725_s20 + $0x78] sm:$0xff] %vm2870_vm3, %v2853_v39  ;;  %v3832_v29 = vadd.f32 %v3800_v50, %v3664_v11  ;;  %v2704_v52 = vpop.f32.mrb[17].mxu0  ;;  %v3665_v30 = vpop.f32.mrb[18].mxu1 }
 0x1ec   : > { %2884 = vst.msk [vmem:[%s4725_s20 + $0x68] sm:$0xff] %vm2870_vm3, %v2851_v12  ;;  %v3833_v33 = vadd.f32 %v2704_v52, %v1527_v13  ;;  %v3801_v36 = vpop.f32.mrb[18].mxu0  ;;  %v1530_v48 = vpop.f32.mrb[19].mxu1 }
 0x1ed   : > { %v2824_v49 = vadd.f32 %v3832_v29, %v4718_v59  ;;  %v3834_v51 = vadd.f32 %v3801_v36, %v3665_v30  ;;  %v2707_v1 = vpop.f32.mrb[19].mxu0 }
 0x1ee   : > { %v2822_v26 = vadd.f32 %v3833_v33, %v4718_v59  ;;  %v3835_v9 = vadd.f32 %v2707_v1, %v1530_v48 }
 0x1ef   : > { %v2856_v15 = vmax.f32 %v2824_v49, 0.0  ;;  %v2825_v5 = vadd.f32 %v3834_v51, %v4718_v59 }
 0x1f0   : > { %v2854_v16 = vmax.f32 %v2822_v26, 0.0  ;;  %v2823_v22 = vadd.f32 %v3835_v9, %v4718_v59 }
 0x1f1   : > { %2889 = vst.msk [vmem:[%s4725_s20 + $0x90] sm:$0xff] %vm2870_vm3, %v2856_v15  ;;  %v2857_v23 = vmax.f32 %v2825_v5, 0.0  ;;  %v3668_v58 = vpop.f32.mrb[20].mxu1 }
 0x1f2   : > { %2887 = vst.msk [vmem:[%s4725_s20 + $0x80] sm:$0xff] %vm2870_vm3, %v2854_v16  ;;  %v2855_v25 = vmax.f32 %v2823_v22, 0.0  ;;  %v3804_v27 = vpop.f32.mrb[20].mxu0  ;;  %v1543_v28 = vpop.f32.mrb[21].mxu1 }
 0x1f3   : > { %2890 = vst.msk [vmem:[%s4725_s20 + $0x98] sm:$0xff] %vm2870_vm3, %v2857_v23  ;;  %v3836_v40 = vadd.f32 %v3804_v27, %v3668_v58  ;;  %v2720_v41 = vpop.f32.mrb[21].mxu0  ;;  %v3669_v42 = vpop.f32.mrb[22].mxu1 }
 0x1f4   : > { %2888 = vst.msk [vmem:[%s4725_s20 + $0x88] sm:$0xff] %vm2870_vm3, %v2855_v25  ;;  %v3837_v45 = vadd.f32 %v2720_v41, %v1543_v28  ;;  %v3805_v46 = vpop.f32.mrb[22].mxu0  ;;  %v1546_v47 = vpop.f32.mrb[23].mxu1 }
 0x1f5   : > { %v2828_v61 = vadd.f32 %v3836_v40, %v4718_v59  ;;  %v3838_v62 = vadd.f32 %v3805_v46, %v3669_v42  ;;  %v2723_v44 = vpop.f32.mrb[23].mxu0 }
 0x1f6   : > { %v2826_v60 = vadd.f32 %v3837_v45, %v4718_v59  ;;  %v3839_v63 = vadd.f32 %v2723_v44, %v1546_v47 }
 0x1f7   : > { %v2860_v0 = vmax.f32 %v2828_v61, 0.0  ;;  %v2829_v2 = vadd.f32 %v3838_v62, %v4718_v59 }
 0x1f8   : > { %v2858_v14 = vmax.f32 %v2826_v60, 0.0  ;;  %v2827_v8 = vadd.f32 %v3839_v63, %v4718_v59 }
 0x1f9   : > { %2893 = vst.msk [vmem:[%s4725_s20 + $0xb0] sm:$0xff] %vm2870_vm3, %v2860_v0  ;;  %v2861_v21 = vmax.f32 %v2829_v2, 0.0  ;;  %v3672_v24 = vpop.f32.mrb[24].mxu1 }
 0x1fa   : > { %2891 = vst.msk [vmem:[%s4725_s20 + $0xa0] sm:$0xff] %vm2870_vm3, %v2858_v14  ;;  %v2859_v31 = vmax.f32 %v2827_v8, 0.0  ;;  %v3808_v32 = vpop.f32.mrb[24].mxu0  ;;  %v1559_v37 = vpop.f32.mrb[25].mxu1 }
 0x1fb   : > { %2894 = vst.msk [vmem:[%s4725_s20 + $0xb8] sm:$0xff] %vm2870_vm3, %v2861_v21  ;;  %v3840_v38 = vadd.f32 %v3808_v32, %v3672_v24  ;;  %v2736_v43 = vpop.f32.mrb[25].mxu0  ;;  %v3673_v53 = vpop.f32.mrb[26].mxu1 }
 0x1fc   : > { %2892 = vst.msk [vmem:[%s4725_s20 + $0xa8] sm:$0xff] %vm2870_vm3, %v2859_v31  ;;  %v3841_v55 = vadd.f32 %v2736_v43, %v1559_v37  ;;  %v3809_v56 = vpop.f32.mrb[26].mxu0  ;;  %v1562_v57 = vpop.f32.mrb[27].mxu1 }
 0x1fd   : > { %v2832_v3 = vadd.f32 %v3840_v38, %v4718_v59  ;;  %v3842_v4 = vadd.f32 %v3809_v56, %v3673_v53  ;;  %v2739_v6 = vpop.f32.mrb[27].mxu0 }
 0x1fe   : > { %v2830_v7 = vadd.f32 %v3841_v55, %v4718_v59  ;;  %v3843_v17 = vadd.f32 %v2739_v6, %v1562_v57 }
 0x1ff   : > { %v2864_v18 = vmax.f32 %v2832_v3, 0.0  ;;  %v2833_v19 = vadd.f32 %v3842_v4, %v4718_v59 }
 0x200   : > { %v2862_v20 = vmax.f32 %v2830_v7, 0.0  ;;  %v2831_v34 = vadd.f32 %v3843_v17, %v4718_v59 }
 0x201   : > { %2897 = vst.msk [vmem:[%s4725_s20 + $0xd0] sm:$0xff] %vm2870_vm3, %v2864_v18  ;;  %v2865_v35 = vmax.f32 %v2833_v19, 0.0  ;;  %v3676_v54 = vpop.f32.mrb[28].mxu1 }
 0x202   : > { %2895 = vst.msk [vmem:[%s4725_s20 + $0xc0] sm:$0xff] %vm2870_vm3, %v2862_v20  ;;  %v2863_v10 = vmax.f32 %v2831_v34, 0.0  ;;  %v3812_v39 = vpop.f32.mrb[28].mxu0  ;;  %v1575_v11 = vpop.f32.mrb[29].mxu1 }
 0x203   : > { %2898 = vst.msk [vmem:[%s4725_s20 + $0xd8] sm:$0xff] %vm2870_vm3, %v2865_v35  ;;  %v3844_v12 = vadd.f32 %v3812_v39, %v3676_v54  ;;  %v2752_v50 = vpop.f32.mrb[29].mxu0  ;;  %v3677_v13 = vpop.f32.mrb[30].mxu1 }
 0x204   : > { %2896 = vst.msk [vmem:[%s4725_s20 + $0xc8] sm:$0xff] %vm2870_vm3, %v2863_v10  ;;  %v3845_v29 = vadd.f32 %v2752_v50, %v1575_v11  ;;  %v3813_v52 = vpop.f32.mrb[30].mxu0  ;;  %v1578_v30 = vpop.f32.mrb[31].mxu1 }
 0x205   : > { %v2836_v33 = vadd.f32 %v3844_v12, %v4718_v59  ;;  %v3846_v36 = vadd.f32 %v3813_v52, %v3677_v13  ;;  %v2755_v48 = vpop.f32.mrb[31].mxu0 }
 0x206   : > { %v2834_v49 = vadd.f32 %v3845_v29, %v4718_v59  ;;  %v3847_v51 = vadd.f32 %v2755_v48, %v1578_v30 }
 0x207   : > { %v2868_v1 = vmax.f32 %v2836_v33, 0.0  ;;  %v2837_v26 = vadd.f32 %v3846_v36, %v4718_v59 }
 0x208   : > { %v2866_v9 = vmax.f32 %v2834_v49, 0.0  ;;  %v2835_v15 = vadd.f32 %v3847_v51, %v4718_v59 }
 0x209   : > { %2901 = vst.msk [vmem:[%s4725_s20 + $0xf0] sm:$0xff] %vm2870_vm3, %v2868_v1  ;;  %v2869_v5 = vmax.f32 %v2837_v26, 0.0 }
 0x20a   : > { %2899 = vst.msk [vmem:[%s4725_s20 + $0xe0] sm:$0xff] %vm2870_vm3, %v2866_v9  ;;  %v2867_v16 = vmax.f32 %v2835_v15, 0.0 }
 0x20b   : > { %2902 = vst.msk [vmem:[%s4725_s20 + $0xf8] sm:$0xff] %vm2870_vm3, %v2869_v5 }
 0x20c   : > { %2900 = vst.msk [vmem:[%s4725_s20 + $0xe8] sm:$0xff] %vm2870_vm3, %v2867_v16 }
 0x20d PF: > { %s13_s14 = sadd.s32 1, %s4120_s14   ;;  %s4839_s12 = smov %s4116_s13 }
 0x20e   : > { %p10_p5 = scmp.ge.s32.totalorder %s13_s14, 4   ;;  %s4840_s13 = smov %s4842_s15 }
 0x210   :  { %12 = sbr.rel (!%p10_p5) target bundleno = 2 (0x2), region = 72 }

// kernel: _lambda_.9
= control target key start
LH: loop header
LB: loop body
LE: loop exit
PB: predicated region body
PF: predicated region fallthrough
CT: control target
= control target key end

     0   :  { %s4304_s15 = smov 0   ;;  %s4306_s16 = smov 0   ;;  %s5237_s0 = inlined_call_operand.vmem [shape: f32[2,1,18,18,4], index: 0, kind: input, shape index: {}]   ;;  %s5238_s1 = inlined_call_operand.vmem [shape: bf16[9,4,4], index: 1, kind: input, shape index: {}]   ;;  %s5239_s2 = inlined_call_operand.vmem [shape: f32[2,16,16,4], index: 2, kind: output, shape index: {0}]   ;;  %s5240_s3 = inlined_call_operand.vmem [shape: f32[1,4], index: 3, kind: output, shape index: {1}]   ;;  %s5241_s4 = inlined_call_operand.vmem [shape: f32[1,4], index: 4, kind: output, shape index: {2}]  }
   0x1   :  { %s4308_s17 = smov 0  }
   0x2 LB: > { %s27_s18 = sadd.s32 1, %s4272_s16  ;;  %p3148_p0 = scmp.ge.s32.totalorder %s4276_s17, 1  ;;  %s4276_s17 = sphi %s4308_s17, %s15_s17   ;;  %s4272_s16 = sphi %s4306_s16, %s5243_s16   ;;  %s4268_s15 = sphi %s4304_s15, %s5242_s15  }
   0x3   : > { %p29_p1 = scmp.ge.s32.totalorder %s27_s18, 2  ;;  %p177_p2 = scmp.lt.s32.totalorder %s4276_s17, 3 }
   0x5   : > { %s5245_s18 = smov (%p29_p1, %s27_s18), 0  ;;  %p178_p3 = pnand %p3148_p0, %p177_p2 }
   0x6   : > { %v3152_v0 = vld [vmem:[%s5238_s1 + $0x2] sm:$0x3] (!%p178_p3)  ;;  %vm381_vm0 = vcmask (!%p178_p3), 1041408   ;;  %v4330_v1 = vld [vmem:[%s5238_s1 + $0x8] sm:$0x3] (!%p178_p3)  ;;  %p212_p4 = scmp.lt.s32.totalorder (!%p178_p3), %s4268_s15, 1 }
   0x7   : > { %181 = sbr.rel (%p178_p3) target bundleno = 605 (0x25d), region = 28  ;;  %4218 = vmatprep.subr.msk.bf16.mxu1 (!%p178_p3), %vm381_vm0, %v3152_v0  ;;  %4222 = vmatprep.subr.msk.bf16.mxu0 (!%p178_p3), %vm381_vm0, %v4330_v1  ;;  %v383_v2 = vsel (!%p178_p3), %vm381_vm0, %v3152_v0, 0  ;;  %v4339_v3 = vsel (!%p178_p3), %vm381_vm0, %v4330_v1, 0  ;;  %v281_v4 = vld [vmem:[%s5238_s1] sm:$0x3] (!%p178_p3)  ;;  %vm332_vm1 = vcmask (!%p178_p3), 31744  }
   0x8   : > { %3655 = vmatpush3.bf16.msra.mxu1 (!%p178_p3), %v383_v2  ;;  %3791 = vmatpush3.bf16.msra.mxu0 (!%p178_p3), %v4339_v3  ;;  %v3332_v5 = vld [vmem:[%s5238_s1 + $0xa] sm:$0x3] (!%p178_p3)  ;;  %v595_v14 = vsel (!%p178_p3), %vm381_vm0, %v281_v4, 0  ;;  %v3381_v20 = vld [vmem:[%s5238_s1 + $0xc] sm:$0x3] (!%p178_p3)  ;;  %p2850_p5 = scmp.eq.s32.totalorder (!%p178_p3), %s4268_s15, 0 }
   0x9   : > { %4219 = vmatprep.subr.msk.bf16.mxu1 (!%p178_p3), %vm381_vm0, %v281_v4  ;;  %4224 = vmatprep.subr.msk.bf16.mxu0 (!%p178_p3), %vm381_vm0, %v3332_v5  ;;  %v1740_v18 = vsel (!%p178_p3), %vm381_vm0, %v3332_v5, 0  ;;  %v4384_v21 = vld [vmem:[%s5238_s1 + $0x4] sm:$0x3] (!%p178_p3)  ;;  %v2035_v52 = vsel (!%p178_p3), %vm381_vm0, %v3381_v20, 0  ;;  %v4463_v53 = vld [vmem:[%s5238_s1 + $0xe] sm:$0x3] (!%p178_p3) }
   0xe   : > { %s4346_s25 = scalar_select %p212_p4, %s4268_s15, 1 }
   0xf   : > { %vm2856_vm2 = vcmask (%p2850_p5), 24576  }
  0x10   : > { %s4228_s28 = smul.u32 432, %s4346_s25  ;;  %s3499_s20 = sshll.u32 %s4346_s25, 8 }
  0x11   : > { %s4884_s23 = scalar_lea.vmem %s5239_s2, %s3499_s20 }
  0x12   : > { %s4357_s5 = scalar_lea.vmem %s5237_s0, %s4228_s28 }
  0x13   : > { %v282_v6 = vld [vmem:[%s4357_s5 + $0x1] sm:$0xff]  ;;  %v283_v7 = vld [vmem:[%s4357_s5 + $0x9] sm:$0xff]  ;;  %v3251_v8 = vld [vmem:[%s4357_s5 + $0x19] sm:$0xff] }
  0x14   : > { %v314_v9 = vpack.c.bf16 %v283_v7, %v282_v6  ;;  %v3252_v10 = vld [vmem:[%s4357_s5 + $0x21] sm:$0xff]  ;;  %v3253_v11 = vld [vmem:[%s4357_s5 + $0x31] sm:$0xff]  ;;  %v3254_v12 = vld [vmem:[%s4357_s5 + $0x39] sm:$0xff] }
  0x15   : > { %v1379_v13 = vpack.c.bf16 %v3252_v10, %v3251_v8  ;;  %v4366_v15 = vpack.c.bf16 %v3254_v12, %v3253_v11  ;;  %v3255_v16 = vld [vmem:[%s4357_s5 + $0x49] sm:$0xff]  ;;  %v3256_v17 = vld [vmem:[%s4357_s5 + $0x51] sm:$0xff]  ;;  %v3257_v22 = vld [vmem:[%s4357_s5 + $0x61] sm:$0xff] }
  0x16   : > { %3656 = vmatprep.mubr.msk.bf16.mxu1 %vm332_vm1, %v314_v9  ;;  %v4372_v19 = vpack.c.bf16 %v3256_v17, %v3255_v16  ;;  %v3258_v23 = vld [vmem:[%s4357_s5 + $0x69] sm:$0xff]  ;;  %v3259_v24 = vld [vmem:[%s4357_s5 + $0x79] sm:$0xff]  ;;  %v3260_v25 = vld [vmem:[%s4357_s5 + $0x81] sm:$0xff] }
  0x17   : > { %3792 = vmatprep.mubr.msk.bf16.mxu0 %vm332_vm1, %v1379_v13  ;;  %3657 = vmatmul.mubr.msk.bf16.vlgmr.msra.gmra.mrb[0].mxu1 %vm332_vm1, %v1379_v13  ;;  %v4397_v26 = vpack.c.bf16 %v3258_v23, %v3257_v22  ;;  %v4399_v27 = vpack.c.bf16 %v3260_v25, %v3259_v24  ;;  %v3261_v28 = vld [vmem:[%s4357_s5 + $0x91] sm:$0xff]  ;;  %v3262_v29 = vld [vmem:[%s4357_s5 + $0x99] sm:$0xff]  ;;  %v3263_v30 = vld [vmem:[%s4357_s5 + $0xa9] sm:$0xff] }
  0x18   : > { %3689 = vmatpush3.bf16.msra.mxu1 %v595_v14  ;;  %3793 = vmatmul.mubr.msk.bf16.vlgmr.msra.gmra.mrb[0].mxu0 %vm332_vm1, %v4366_v15  ;;  %v3264_v31 = vld [vmem:[%s4357_s5 + $0xb1] sm:$0xff]  ;;  %v4413_v32 = vpack.c.bf16 %v3262_v29, %v3261_v28  ;;  %v3265_v34 = vld [vmem:[%s4357_s5 + $0xc1] sm:$0xff]  ;;  %v3266_v35 = vld [vmem:[%s4357_s5 + $0xc9] sm:$0xff] }
  0x19   : > { %3825 = vmatpush3.bf16.msra.mxu0 %v1740_v18  ;;  %3660 = vmatprep.mubr.msk.bf16.mxu1 %vm332_vm1, %v4366_v15  ;;  %v4415_v33 = vpack.c.bf16 %v3264_v31, %v3263_v30  ;;  %v3300_v36 = vld [vmem:[%s4357_s5 + $0x1a] sm:$0xff]  ;;  %v3301_v37 = vld [vmem:[%s4357_s5 + $0x22] sm:$0xff]  ;;  %v4429_v38 = vpack.c.bf16 %v3266_v35, %v3265_v34  ;;  %v3302_v42 = vld [vmem:[%s4357_s5 + $0x32] sm:$0xff] }
  0x1a   : > { %3796 = vmatprep.mubr.msk.bf16.mxu0 %vm332_vm1, %v4372_v19  ;;  %4225 = vmatprep.subr.msk.bf16.mxu0 %vm381_vm0, %v3381_v20  ;;  %v4431_v39 = vpack.c.bf16 %v3301_v37, %v3300_v36  ;;  %v300_v40 = vld [vmem:[%s4357_s5 + $0xd9] sm:$0xff]  ;;  %v301_v41 = vld [vmem:[%s4357_s5 + $0xe1] sm:$0xff]  ;;  %v302_v44 = vld [vmem:[%s4357_s5 + $0xf1] sm:$0xff] }
  0x1b   : > { %4220 = vmatprep.subr.msk.bf16.mxu1 %vm381_vm0, %v4384_v21  ;;  %v3303_v43 = vld [vmem:[%s4357_s5 + $0x3a] sm:$0xff]  ;;  %v3304_v46 = vld [vmem:[%s4357_s5 + $0x4a] sm:$0xff]  ;;  %v3305_v47 = vld [vmem:[%s4357_s5 + $0x52] sm:$0xff]  ;;  %v4449_v48 = vpack.c.bf16 %v301_v41, %v300_v40 }
  0x1c   : > { %v303_v45 = vld [vmem:[%s4357_s5 + $0xf9] sm:$0xff]  ;;  %v4451_v49 = vpack.c.bf16 %v3303_v43, %v3302_v42  ;;  %v4455_v51 = vpack.c.bf16 %v3305_v47, %v3304_v46  ;;  %v304_v54 = vld [vmem:[%s4357_s5 + $0x109] sm:$0xff]  ;;  %v305_v55 = vld [vmem:[%s4357_s5 + $0x111] sm:$0xff]  ;;  %v857_v47 = vsel %vm381_vm0, %v4384_v21, 0 }
  0x1d   : > { %v4453_v50 = vpack.c.bf16 %v303_v45, %v302_v44  ;;  %v3306_v56 = vld [vmem:[%s4357_s5 + $0x62] sm:$0xff]  ;;  %v3307_v57 = vld [vmem:[%s4357_s5 + $0x6a] sm:$0xff]  ;;  %v3308_v60 = vld [vmem:[%s4357_s5 + $0x7a] sm:$0xff]  ;;  %v4481_v62 = vpack.c.bf16 %v305_v55, %v304_v54 }
  0x1e   : > { %v306_v58 = vld [vmem:[%s4357_s5 + $0x121] sm:$0xff]  ;;  %v307_v59 = vld [vmem:[%s4357_s5 + $0x129] sm:$0xff]  ;;  %v4483_v63 = vpack.c.bf16 %v3307_v57, %v3306_v56  ;;  %v308_v4 = vld [vmem:[%s4357_s5 + $0x139] sm:$0xff] }
  0x1f   : > { %3661 = vmatmul.mubr.msk.bf16.gmra.mrb[4].mxu1 %vm332_vm1, %v4372_v19  ;;  %v3309_v61 = vld [vmem:[%s4357_s5 + $0x82] sm:$0xff]  ;;  %v4485_v0 = vpack.c.bf16 %v307_v59, %v306_v58  ;;  %v3310_v6 = vld [vmem:[%s4357_s5 + $0x92] sm:$0xff]  ;;  %v3311_v7 = vld [vmem:[%s4357_s5 + $0x9a] sm:$0xff] }
  0x20   : > { %3797 = vmatmul.mubr.msk.bf16.gmra.mrb[4].mxu0 %vm332_vm1, %v4397_v26  ;;  %3664 = vmatprep.mubr.msk.bf16.mxu1 %vm332_vm1, %v4397_v26  ;;  %v4487_v2 = vpack.c.bf16 %v3309_v61, %v3308_v60  ;;  %v309_v5 = vld [vmem:[%s4357_s5 + $0x141] sm:$0xff]  ;;  %v310_v8 = vld [vmem:[%s4357_s5 + $0x151] sm:$0xff]  ;;  %v311_v9 = vld [vmem:[%s4357_s5 + $0x159] sm:$0xff]  ;;  %v4507_v13 = vpack.c.bf16 %v3311_v7, %v3310_v6 }
  0x21   : > { %3800 = vmatprep.mubr.msk.bf16.mxu0 %vm332_vm1, %v4399_v27  ;;  %v3312_v10 = vld [vmem:[%s4357_s5 + $0xaa] sm:$0xff]  ;;  %v3313_v11 = vld [vmem:[%s4357_s5 + $0xb2] sm:$0xff]  ;;  %v4505_v12 = vpack.c.bf16 %v309_v5, %v308_v4  ;;  %v4509_v14 = vpack.c.bf16 %v311_v9, %v310_v8  ;;  %v3314_v20 = vld [vmem:[%s4357_s5 + $0xc2] sm:$0xff] }
  0x22   : > { %v4511_v16 = vpack.c.bf16 %v3313_v11, %v3312_v10  ;;  %v312_v17 = vld [vmem:[%s4357_s5 + $0x169] sm:$0xff]  ;;  %v313_v18 = vld [vmem:[%s4357_s5 + $0x171] sm:$0xff]  ;;  %v233_v23 = vld [vmem:[%s4357_s5] sm:$0xff] }
  0x23   : > { %v3315_v22 = vld [vmem:[%s4357_s5 + $0xca] sm:$0xff]  ;;  %v3316_v25 = vld [vmem:[%s4357_s5 + $0xda] sm:$0xff]  ;;  %v3317_v28 = vld [vmem:[%s4357_s5 + $0xe2] sm:$0xff]  ;;  %v4529_v29 = vpack.c.bf16 %v313_v18, %v312_v17 }
  0x24   : > { %v234_v24 = vld [vmem:[%s4357_s5 + $0x8] sm:$0xff]  ;;  %v4531_v30 = vpack.c.bf16 %v3315_v22, %v3314_v20  ;;  %v4533_v34 = vpack.c.bf16 %v3317_v28, %v3316_v25  ;;  %v235_v35 = vld [vmem:[%s4357_s5 + $0x18] sm:$0xff]  ;;  %v236_v36 = vld [vmem:[%s4357_s5 + $0x20] sm:$0xff] }
  0x25   : > { %v265_v31 = vpack.c.bf16 %v234_v24, %v233_v23  ;;  %v3318_v37 = vld [vmem:[%s4357_s5 + $0xf2] sm:$0xff]  ;;  %v3319_v40 = vld [vmem:[%s4357_s5 + $0xfa] sm:$0xff]  ;;  %v3320_v43 = vld [vmem:[%s4357_s5 + $0x10a] sm:$0xff]  ;;  %v4550_v45 = vpack.c.bf16 %v236_v36, %v235_v35 }
  0x26   : > { %v237_v41 = vld [vmem:[%s4357_s5 + $0x30] sm:$0xff]  ;;  %v238_v42 = vld [vmem:[%s4357_s5 + $0x38] sm:$0xff]  ;;  %v4552_v46 = vpack.c.bf16 %v3319_v40, %v3318_v37  ;;  %v4565_v55 = vld [vmem:[%s5238_s1 + $0x6] sm:$0x3] }
  0x27   : > { %3665 = vmatmul.mubr.msk.bf16.gmra.mrb[8].mxu1 %vm332_vm1, %v4399_v27  ;;  %v3321_v44 = vld [vmem:[%s4357_s5 + $0x112] sm:$0xff]  ;;  %v239_v56 = vld [vmem:[%s4357_s5 + $0x48] sm:$0xff]  ;;  %v241_v59 = vld [vmem:[%s4357_s5 + $0x60] sm:$0xff] }
  0x28   : > { %3801 = vmatmul.mubr.msk.bf16.gmra.mrb[8].mxu0 %vm332_vm1, %v4413_v32  ;;  %3668 = vmatprep.mubr.msk.bf16.mxu1 %vm332_vm1, %v4413_v32  ;;  %v4558_v54 = vpack.c.bf16 %v3321_v44, %v3320_v43  ;;  %v240_v57 = vld [vmem:[%s4357_s5 + $0x50] sm:$0xff]  ;;  %v3322_v21 = vld [vmem:[%s4357_s5 + $0x122] sm:$0xff]  ;;  %v3324_v61 = vld [vmem:[%s4357_s5 + $0x13a] sm:$0xff] }
  0x29   : > { %3804 = vmatprep.mubr.msk.bf16.mxu0 %vm332_vm1, %v4415_v33  ;;  %v3323_v58 = vld [vmem:[%s4357_s5 + $0x12a] sm:$0xff]  ;;  %v3325_v4 = vld [vmem:[%s4357_s5 + $0x142] sm:$0xff]  ;;  %v4583_v5 = vpack.c.bf16 %v240_v57, %v239_v56  ;;  %v243_v9 = vld [vmem:[%s4357_s5 + $0x78] sm:$0xff] }
  0x2a   : > { %v242_v60 = vld [vmem:[%s4357_s5 + $0x68] sm:$0xff]  ;;  %v4585_v6 = vpack.c.bf16 %v3323_v58, %v3322_v21  ;;  %v4589_v8 = vpack.c.bf16 %v3325_v4, %v3324_v61  ;;  %v244_v10 = vld [vmem:[%s4357_s5 + $0x80] sm:$0xff]  ;;  %v3326_v11 = vld [vmem:[%s4357_s5 + $0x152] sm:$0xff]  ;;  %v2329_v61 = vsel %vm381_vm0, %v4463_v53, 0 }
  0x2b   : > { %v4587_v7 = vpack.c.bf16 %v242_v60, %v241_v59  ;;  %v3327_v17 = vld [vmem:[%s4357_s5 + $0x15a] sm:$0xff]  ;;  %v245_v18 = vld [vmem:[%s4357_s5 + $0x90] sm:$0xff]  ;;  %v4607_v24 = vpack.c.bf16 %v244_v10, %v243_v9  ;;  %v247_v35 = vld [vmem:[%s4357_s5 + $0xa8] sm:$0xff] }
  0x2c   : > { %v246_v20 = vld [vmem:[%s4357_s5 + $0x98] sm:$0xff]  ;;  %v3328_v22 = vld [vmem:[%s4357_s5 + $0x16a] sm:$0xff]  ;;  %v4609_v25 = vpack.c.bf16 %v3327_v17, %v3326_v11  ;;  %v3330_v37 = vld [vmem:[%s4357_s5 + $0x182] sm:$0xff] }
  0x2d   : > { %v3329_v23 = vld [vmem:[%s4357_s5 + $0x172] sm:$0xff]  ;;  %v4611_v28 = vpack.c.bf16 %v246_v20, %v245_v18  ;;  %v3331_v40 = vld [vmem:[%s4357_s5 + $0x18a] sm:$0xff]  ;;  %v252_v57 = vld [vmem:[%s4357_s5 + $0xe0] sm:$0xff] }
  0x2e   : > { %v248_v36 = vld [vmem:[%s4357_s5 + $0xb0] sm:$0xff]  ;;  %v4631_v44 = vpack.c.bf16 %v3331_v40, %v3330_v37  ;;  %v251_v56 = vld [vmem:[%s4357_s5 + $0xd8] sm:$0xff]  ;;  %v255_v9 = vld [vmem:[%s4357_s5 + $0x108] sm:$0xff] }
  0x2f   : > { %3669 = vmatmul.mubr.msk.bf16.gmra.mrb[12].mxu1 %vm332_vm1, %v4415_v33  ;;  %v4629_v43 = vpack.c.bf16 %v248_v36, %v247_v35  ;;  %v253_v21 = vld [vmem:[%s4357_s5 + $0xf0] sm:$0xff]  ;;  %v254_v58 = vld [vmem:[%s4357_s5 + $0xf8] sm:$0xff]  ;;  %v4647_v59 = vpack.c.bf16 %v252_v57, %v251_v56  ;;  %v258_v11 = vld [vmem:[%s4357_s5 + $0x128] sm:$0xff] }
  0x30   : > { %3805 = vmatmul.mubr.msk.bf16.gmra.mrb[12].mxu0 %vm332_vm1, %v4429_v38  ;;  %3672 = vmatprep.mubr.msk.bf16.mxu1 %vm332_vm1, %v4429_v38  ;;  %v4649_v60 = vpack.c.bf16 %v254_v58, %v253_v21  ;;  %v3479_v4 = vld [vmem:[%s5238_s1 + $0x10] sm:$0x3]  ;;  %v259_v20 = vld [vmem:[%s4357_s5 + $0x138] sm:$0xff]  ;;  %v263_v40 = vld [vmem:[%s4357_s5 + $0x168] sm:$0xff]  ;;  %v1152_v58 = vsel %vm381_vm0, %v4565_v55, 0 }
  0x31   : > { %3826 = vmatprep.mubr.msk.bf16.mxu0 %vm332_vm1, %v4431_v39  ;;  %v256_v10 = vld [vmem:[%s4357_s5 + $0x110] sm:$0xff]  ;;  %v262_v35 = vld [vmem:[%s4357_s5 + $0x158] sm:$0xff] }
  0x32   : > { %v4669_v17 = vpack.c.bf16 %v256_v10, %v255_v9  ;;  %v759_v56 = vld [vmem:[%s4357_s5 + $0xa] sm:$0xff]  ;;  %v3380_v9 = vld [vmem:[%s4357_s5 + $0x1a0] sm:$0xff] }
  0x37   : > { %3673 = vmatmul.mubr.msk.bf16.gmra.mrb[16].mxu1 %vm332_vm1, %v4449_v48 }
  0x38   : > { %3827 = vmatmul.mubr.msk.bf16.vlgmr.msra.gmra.mrb[0].mxu0 %vm332_vm1, %v4451_v49  ;;  %3676 = vmatprep.mubr.msk.bf16.mxu1 %vm332_vm1, %v4453_v50 }
  0x39   : > { %3859 = vmatpush3.bf16.msra.mxu0 %v2035_v52  ;;  %3830 = vmatprep.mubr.msk.bf16.mxu0 %vm332_vm1, %v4455_v51  ;;  %v4556_v52 = vpack.c.bf16 %v238_v42, %v237_v41  ;;  %v249_v41 = vld [vmem:[%s4357_s5 + $0xc0] sm:$0xff]  ;;  %v250_v42 = vld [vmem:[%s4357_s5 + $0xc8] sm:$0xff] }
  0x3a   : > { %4226 = vmatprep.subr.msk.bf16.mxu0 %vm381_vm0, %v4463_v53  ;;  %v257_v53 = vld [vmem:[%s4357_s5 + $0x120] sm:$0xff] }
  0x3b   : > { %v4671_v18 = vpack.c.bf16 %v258_v11, %v257_v53  ;;  %v2623_v53 = vsel %vm381_vm0, %v3479_v4, 0 }
  0x3f   : > { %3677 = vmatmul.mubr.msk.bf16.gmra.mrb[20].mxu1 %vm332_vm1, %v4481_v62 }
  0x40   : > { %3831 = vmatmul.mubr.msk.bf16.gmra.mrb[4].mxu0 %vm332_vm1, %v4483_v63  ;;  %3680 = vmatprep.mubr.msk.bf16.mxu1 %vm332_vm1, %v4485_v0 }
  0x41   : > { %3834 = vmatprep.mubr.msk.bf16.mxu0 %vm332_vm1, %v4487_v2 }
  0x47   : > { %3681 = vmatmul.mubr.msk.bf16.gmra.mrb[24].mxu1 %vm332_vm1, %v4505_v12 }
  0x48   : > { %3835 = vmatmul.mubr.msk.bf16.gmra.mrb[8].mxu0 %vm332_vm1, %v4507_v13  ;;  %3684 = vmatprep.mubr.msk.bf16.mxu1 %vm332_vm1, %v4509_v14 }
  0x49   : > { %3838 = vmatprep.mubr.msk.bf16.mxu0 %vm332_vm1, %v4511_v16 }
  0x4f   : > { %3685 = vmatmul.mubr.msk.bf16.gmra.mrb[28].mxu1 %vm332_vm1, %v4529_v29 }
  0x50   : > { %3839 = vmatmul.mubr.msk.bf16.gmra.mrb[12].mxu0 %vm332_vm1, %v4531_v30  ;;  %3690 = vmatprep.mubr.msk.bf16.mxu1 %vm332_vm1, %v265_v31  ;;  %v4613_v31 = vpack.c.bf16 %v3329_v23, %v3328_v22  ;;  %v260_v22 = vld [vmem:[%s4357_s5 + $0x140] sm:$0xff]  ;;  %v261_v23 = vld [vmem:[%s4357_s5 + $0x150] sm:$0xff] }
  0x51   : > { %3842 = vmatprep.mubr.msk.bf16.mxu0 %vm332_vm1, %v4533_v34  ;;  %v4685_v36 = vpack.c.bf16 %v260_v22, %v259_v20  ;;  %v4687_v37 = vpack.c.bf16 %v262_v35, %v261_v23 }
  0x57   : > { %3691 = vmatmul.mubr.msk.bf16.vlgmr.msra.gmra.mrb[0].mxu1 %vm332_vm1, %v4550_v45 }
  0x58   : > { %3723 = vmatpush3.bf16.msra.mxu1 %v857_v47  ;;  %3843 = vmatmul.mubr.msk.bf16.gmra.mrb[16].mxu0 %vm332_vm1, %v4552_v46  ;;  %v4633_v47 = vpack.c.bf16 %v250_v42, %v249_v41  ;;  %v264_v41 = vld [vmem:[%s4357_s5 + $0x170] sm:$0xff]  ;;  %v758_v42 = vld [vmem:[%s4357_s5 + $0x2] sm:$0xff] }
  0x59   : > { %3694 = vmatprep.mubr.msk.bf16.mxu1 %vm332_vm1, %v4556_v52  ;;  %3846 = vmatprep.mubr.msk.bf16.mxu0 %vm332_vm1, %v4558_v54  ;;  %v4701_v57 = vpack.c.bf16 %v264_v41, %v263_v40  ;;  %v790_v21 = vpack.c.bf16 %v759_v56, %v758_v42 }
  0x5a   : > { %4221 = vmatprep.subr.msk.bf16.mxu1 %vm381_vm0, %v4565_v55  ;;  %v3378_v55 = vld [vmem:[%s4357_s5 + $0x188] sm:$0xff] }
  0x5f   : > { %3695 = vmatmul.mubr.msk.bf16.gmra.mrb[4].mxu1 %vm332_vm1, %v4583_v5 }
  0x60   : > { %3847 = vmatmul.mubr.msk.bf16.gmra.mrb[20].mxu0 %vm332_vm1, %v4585_v6  ;;  %3698 = vmatprep.mubr.msk.bf16.mxu1 %vm332_vm1, %v4587_v7 }
  0x61   : > { %3850 = vmatprep.mubr.msk.bf16.mxu0 %vm332_vm1, %v4589_v8 }
  0x67   : > { %3699 = vmatmul.mubr.msk.bf16.gmra.mrb[8].mxu1 %vm332_vm1, %v4607_v24 }
  0x68   : > { %3851 = vmatmul.mubr.msk.bf16.gmra.mrb[24].mxu0 %vm332_vm1, %v4609_v25  ;;  %3702 = vmatprep.mubr.msk.bf16.mxu1 %vm332_vm1, %v4611_v28 }
  0x69   : > { %3854 = vmatprep.mubr.msk.bf16.mxu0 %vm332_vm1, %v4613_v31 }
  0x6f   : > { %3703 = vmatmul.mubr.msk.bf16.gmra.mrb[12].mxu1 %vm332_vm1, %v4629_v43 }
  0x70   : > { %3855 = vmatmul.mubr.msk.bf16.gmra.mrb[28].mxu0 %vm332_vm1, %v4631_v44  ;;  %3706 = vmatprep.mubr.msk.bf16.mxu1 %vm332_vm1, %v4633_v47 }
  0x71   : > { %3860 = vmatprep.mubr.msk.bf16.mxu0 %vm332_vm1, %v4556_v52 }
  0x77   : > { %3707 = vmatmul.mubr.msk.bf16.gmra.mrb[16].mxu1 %vm332_vm1, %v4647_v59 }
  0x78   : > { %3861 = vmatmul.mubr.msk.bf16.vlgmr.msra.gmra.mrb[0].mxu0 %vm332_vm1, %v4583_v5  ;;  %3710 = vmatprep.mubr.msk.bf16.mxu1 %vm332_vm1, %v4649_v60 }
  0x79   : > { %3893 = vmatpush3.bf16.msra.mxu0 %v2329_v61  ;;  %3864 = vmatprep.mubr.msk.bf16.mxu0 %vm332_vm1, %v4587_v7 }
  0x7a   : > { %4227 = vmatprep.subr.msk.bf16.mxu0 %vm381_vm0, %v3479_v4 }
  0x7f   : > { %3711 = vmatmul.mubr.msk.bf16.gmra.mrb[20].mxu1 %vm332_vm1, %v4669_v17 }
  0x80   : > { %3865 = vmatmul.mubr.msk.bf16.gmra.mrb[4].mxu0 %vm332_vm1, %v4607_v24  ;;  %3714 = vmatprep.mubr.msk.bf16.mxu1 %vm332_vm1, %v4671_v18 }
  0x81   : > { %3868 = vmatprep.mubr.msk.bf16.mxu0 %vm332_vm1, %v4611_v28 }
  0x87   : > { %3715 = vmatmul.mubr.msk.bf16.gmra.mrb[24].mxu1 %vm332_vm1, %v4685_v36 }
  0x88   : > { %3869 = vmatmul.mubr.msk.bf16.gmra.mrb[8].mxu0 %vm332_vm1, %v4629_v43  ;;  %3718 = vmatprep.mubr.msk.bf16.mxu1 %vm332_vm1, %v4687_v37 }
  0x89   : > { %3872 = vmatprep.mubr.msk.bf16.mxu0 %vm332_vm1, %v4633_v47 }
  0x8f   : > { %3719 = vmatmul.mubr.msk.bf16.gmra.mrb[28].mxu1 %vm332_vm1, %v4701_v57 }
  0x90   : > { %3873 = vmatmul.mubr.msk.bf16.gmra.mrb[12].mxu0 %vm332_vm1, %v4647_v59  ;;  %3724 = vmatprep.mubr.msk.bf16.mxu1 %vm332_vm1, %v790_v21 }
  0x91   : > { %3876 = vmatprep.mubr.msk.bf16.mxu0 %vm332_vm1, %v4649_v60 }
  0x97   : > { %3725 = vmatmul.mubr.msk.bf16.vlgmr.msra.gmra.mrb[0].mxu1 %vm332_vm1, %v4431_v39  ;;  %v3377_v39 = vld [vmem:[%s4357_s5 + $0x180] sm:$0xff] }
  0x98   : > { %3757 = vmatpush3.bf16.msra.mxu1 %v1152_v58  ;;  %3877 = vmatmul.mubr.msk.bf16.gmra.mrb[16].mxu0 %vm332_vm1, %v4669_v17  ;;  %v4732_v61 = vpack.c.bf16 %v3378_v55, %v3377_v39 }
  0x99   : > { %3728 = vmatprep.mubr.msk.bf16.mxu1 %vm332_vm1, %v4451_v49  ;;  %3880 = vmatprep.mubr.msk.bf16.mxu0 %vm332_vm1, %v4671_v18 }
  0x9a   : > { %4223 = vmatprep.subr.msk.bf16.mxu1 %vm381_vm0, %v4330_v1  ;;  %v3379_v1 = vld [vmem:[%s4357_s5 + $0x198] sm:$0xff] }
  0x9b   : > { %v1983_v10 = vpack.c.bf16 %v3380_v9, %v3379_v1 }
  0x9f   : > { %3729 = vmatmul.mubr.msk.bf16.gmra.mrb[4].mxu1 %vm332_vm1, %v4455_v51 }
  0xa0   : > { %3881 = vmatmul.mubr.msk.bf16.gmra.mrb[20].mxu0 %vm332_vm1, %v4685_v36  ;;  %3732 = vmatprep.mubr.msk.bf16.mxu1 %vm332_vm1, %v4483_v63 }
  0xa1   : > { %3884 = vmatprep.mubr.msk.bf16.mxu0 %vm332_vm1, %v4687_v37 }
  0xa7   : > { %3733 = vmatmul.mubr.msk.bf16.gmra.mrb[8].mxu1 %vm332_vm1, %v4487_v2 }
  0xa8   : > { %3885 = vmatmul.mubr.msk.bf16.gmra.mrb[24].mxu0 %vm332_vm1, %v4701_v57  ;;  %3736 = vmatprep.mubr.msk.bf16.mxu1 %vm332_vm1, %v4507_v13 }
  0xa9   : > { %3888 = vmatprep.mubr.msk.bf16.mxu0 %vm332_vm1, %v4732_v61 }
  0xaf   : > { %3737 = vmatmul.mubr.msk.bf16.gmra.mrb[12].mxu1 %vm332_vm1, %v4511_v16 }
  0xb0   : > { %3889 = vmatmul.mubr.msk.bf16.gmra.mrb[28].mxu0 %vm332_vm1, %v1983_v10  ;;  %3740 = vmatprep.mubr.msk.bf16.mxu1 %vm332_vm1, %v4531_v30 }
  0xb1   : > { %3894 = vmatprep.mubr.msk.bf16.mxu0 %vm332_vm1, %v4366_v15  ;;  %v3427_v15 = vld [vmem:[%s4357_s5 + $0x189] sm:$0xff] }
  0xb7   : > { %3741 = vmatmul.mubr.msk.bf16.gmra.mrb[16].mxu1 %vm332_vm1, %v4533_v34 }
  0xb8   : > { %3895 = vmatmul.mubr.msk.bf16.vlgmr.msra.gmra.mrb[0].mxu0 %vm332_vm1, %v4372_v19  ;;  %3744 = vmatprep.mubr.msk.bf16.mxu1 %vm332_vm1, %v4552_v46 }
  0xb9   : > { %3927 = vmatpush3.bf16.msra.mxu0 %v2623_v53  ;;  %3898 = vmatprep.mubr.msk.bf16.mxu0 %vm332_vm1, %v4397_v26  ;;  %v3428_v26 = vld [vmem:[%s4357_s5 + $0x199] sm:$0xff] }
  0xbf   : > { %3745 = vmatmul.mubr.msk.bf16.gmra.mrb[20].mxu1 %vm332_vm1, %v4558_v54 }
  0xc0   : > { %3899 = vmatmul.mubr.msk.bf16.gmra.mrb[4].mxu0 %vm332_vm1, %v4399_v27  ;;  %3748 = vmatprep.mubr.msk.bf16.mxu1 %vm332_vm1, %v4585_v6  ;;  %v3429_v27 = vld [vmem:[%s4357_s5 + $0x1a1] sm:$0xff] }
  0xc1   : > { %3902 = vmatprep.mubr.msk.bf16.mxu0 %vm332_vm1, %v4413_v32  ;;  %v2277_v32 = vpack.c.bf16 %v3429_v27, %v3428_v26 }
  0xc7   : > { %3749 = vmatmul.mubr.msk.bf16.gmra.mrb[24].mxu1 %vm332_vm1, %v4589_v8 }
  0xc8   : > { %3903 = vmatmul.mubr.msk.bf16.gmra.mrb[8].mxu0 %vm332_vm1, %v4415_v33  ;;  %3752 = vmatprep.mubr.msk.bf16.mxu1 %vm332_vm1, %v4609_v25  ;;  %v3477_v33 = vld [vmem:[%s4357_s5 + $0x19a] sm:$0xff] }
  0xc9   : > { %3906 = vmatprep.mubr.msk.bf16.mxu0 %vm332_vm1, %v4429_v38  ;;  %v3478_v38 = vld [vmem:[%s4357_s5 + $0x1a2] sm:$0xff] }
  0xcf   : > { %3753 = vmatmul.mubr.msk.bf16.gmra.mrb[28].mxu1 %vm332_vm1, %v4613_v31 }
  0xd0   : > { %3907 = vmatmul.mubr.msk.bf16.gmra.mrb[12].mxu0 %vm332_vm1, %v4449_v48  ;;  %3758 = vmatprep.mubr.msk.bf16.mxu1 %vm332_vm1, %v4550_v45 }
  0xd1   : > { %3910 = vmatprep.mubr.msk.bf16.mxu0 %vm332_vm1, %v4453_v50 }
  0xd7   : > { %3759 = vmatmul.mubr.msk.bf16.vlgmr.msra.gmra.mrb[0].mxu1 %vm332_vm1, %v4556_v52 }
  0xd8   : > { %3961 = vmatpush3.bf16.msra.mxu1 %v4339_v3  ;;  %3911 = vmatmul.mubr.msk.bf16.gmra.mrb[16].mxu0 %vm332_vm1, %v4481_v62  ;;  %v3426_v3 = vld [vmem:[%s4357_s5 + $0x181] sm:$0xff] }
  0xd9   : > { %3762 = vmatprep.mubr.msk.bf16.mxu1 %vm332_vm1, %v4583_v5  ;;  %3914 = vmatprep.mubr.msk.bf16.mxu0 %vm332_vm1, %v4485_v0  ;;  %v2276_v19 = vpack.c.bf16 %v3427_v15, %v3426_v3 }
  0xdf   : > { %3763 = vmatmul.mubr.msk.bf16.gmra.mrb[4].mxu1 %vm332_vm1, %v4587_v7 }
  0xe0   : > { %3915 = vmatmul.mubr.msk.bf16.gmra.mrb[20].mxu0 %vm332_vm1, %v4505_v12  ;;  %3766 = vmatprep.mubr.msk.bf16.mxu1 %vm332_vm1, %v4607_v24 }
  0xe1   : > { %3918 = vmatprep.mubr.msk.bf16.mxu0 %vm332_vm1, %v4509_v14 }
  0xe7   : > { %3767 = vmatmul.mubr.msk.bf16.gmra.mrb[8].mxu1 %vm332_vm1, %v4611_v28 }
  0xe8   : > { %3919 = vmatmul.mubr.msk.bf16.gmra.mrb[24].mxu0 %vm332_vm1, %v4529_v29  ;;  %3770 = vmatprep.mubr.msk.bf16.mxu1 %vm332_vm1, %v4629_v43 }
  0xe9   : > { %3922 = vmatprep.mubr.msk.bf16.mxu0 %vm332_vm1, %v2276_v19 }
  0xef   : > { %3771 = vmatmul.mubr.msk.bf16.gmra.mrb[12].mxu1 %vm332_vm1, %v4633_v47 }
  0xf0   : > { %3923 = vmatmul.mubr.msk.bf16.gmra.mrb[28].mxu0 %vm332_vm1, %v2277_v32  ;;  %3774 = vmatprep.mubr.msk.bf16.mxu1 %vm332_vm1, %v4647_v59 }
  0xf1   : > { %3928 = vmatprep.mubr.msk.bf16.mxu0 %vm332_vm1, %v4451_v49 }
  0xf7   : > { %3775 = vmatmul.mubr.msk.bf16.gmra.mrb[16].mxu1 %vm332_vm1, %v4649_v60 }
  0xf8   : > { %3929 = vmatmul.mubr.msk.bf16.vlgmr.msra.gmra.mrb[0].mxu0 %vm332_vm1, %v4455_v51  ;;  %3778 = vmatprep.mubr.msk.bf16.mxu1 %vm332_vm1, %v4669_v17 }
  0xf9   : > { %3932 = vmatprep.mubr.msk.bf16.mxu0 %vm332_vm1, %v4483_v63 }
  0xff   : > { %3779 = vmatmul.mubr.msk.bf16.gmra.mrb[20].mxu1 %vm332_vm1, %v4671_v18 }
 0x100   : > { %3933 = vmatmul.mubr.msk.bf16.gmra.mrb[4].mxu0 %vm332_vm1, %v4487_v2  ;;  %3782 = vmatprep.mubr.msk.bf16.mxu1 %vm332_vm1, %v4685_v36 }
 0x101   : > { %3936 = vmatprep.mubr.msk.bf16.mxu0 %vm332_vm1, %v4507_v13 }
 0x107   : > { %3783 = vmatmul.mubr.msk.bf16.gmra.mrb[24].mxu1 %vm332_vm1, %v4687_v37 }
 0x108   : > { %3937 = vmatmul.mubr.msk.bf16.gmra.mrb[8].mxu0 %vm332_vm1, %v4511_v16  ;;  %3786 = vmatprep.mubr.msk.bf16.mxu1 %vm332_vm1, %v4701_v57 }
 0x109   : > { %3940 = vmatprep.mubr.msk.bf16.mxu0 %vm332_vm1, %v4531_v30 }
 0x10f   : > { %3787 = vmatmul.mubr.msk.bf16.gmra.mrb[28].mxu1 %vm332_vm1, %v4732_v61 }
 0x110   : > { %3941 = vmatmul.mubr.msk.bf16.gmra.mrb[12].mxu0 %vm332_vm1, %v4533_v34  ;;  %3808 = vmatprep.mubr.msk.bf16.mxu1 %vm332_vm1, %v4449_v48  ;;  %v2571_v48 = vpack.c.bf16 %v3478_v38, %v3477_v33 }
 0x111   : > { %3944 = vmatprep.mubr.msk.bf16.mxu0 %vm332_vm1, %v4552_v46 }
 0x117   : > { %3809 = vmatmul.mubr.msk.bf16.vlgmr.msra.gmra.mrb[16].mxu1 %vm332_vm1, %v4453_v50 }
 0x118   : > { %3945 = vmatmul.mubr.msk.bf16.gmra.mrb[16].mxu0 %vm332_vm1, %v4558_v54  ;;  %3812 = vmatprep.mubr.msk.bf16.mxu1 %vm332_vm1, %v4481_v62 }
 0x119   : > { %3948 = vmatprep.mubr.msk.bf16.mxu0 %vm332_vm1, %v4585_v6 }
 0x11f   : > { %3813 = vmatmul.mubr.msk.bf16.gmra.mrb[20].mxu1 %vm332_vm1, %v4485_v0 }
 0x120   : > { %3949 = vmatmul.mubr.msk.bf16.gmra.mrb[20].mxu0 %vm332_vm1, %v4589_v8  ;;  %3816 = vmatprep.mubr.msk.bf16.mxu1 %vm332_vm1, %v4505_v12 }
 0x121   : > { %3952 = vmatprep.mubr.msk.bf16.mxu0 %vm332_vm1, %v4609_v25 }
 0x127   : > { %3817 = vmatmul.mubr.msk.bf16.gmra.mrb[24].mxu1 %vm332_vm1, %v4509_v14 }
 0x128   : > { %3953 = vmatmul.mubr.msk.bf16.gmra.mrb[24].mxu0 %vm332_vm1, %v4613_v31  ;;  %3820 = vmatprep.mubr.msk.bf16.mxu1 %vm332_vm1, %v4529_v29 }
 0x129   : > { %3956 = vmatprep.mubr.msk.bf16.mxu0 %vm332_vm1, %v4631_v44 }
 0x12f   : > { %3821 = vmatmul.mubr.msk.bf16.gmra.mrb[28].mxu1 %vm332_vm1, %v2276_v19 }
 0x130   : > { %3957 = vmatmul.mubr.msk.bf16.gmra.mrb[28].mxu0 %vm332_vm1, %v2571_v48 }
 0x1aa   : > { %v3760_v49 = vpop.f32.mrb[0].mxu1 }
 0x1ab   : > { %v1188_v50 = vpop.f32.mrb[1].mxu1 }
 0x1ac   : > { %v3761_v51 = vpop.f32.mrb[2].mxu1 }
 0x1ad   : > { %v1191_v62 = vpop.f32.mrb[3].mxu1 }
 0x1b2   : > { %v3764_v63 = vpop.f32.mrb[4].mxu1 }
 0x1b3   : > { %v1204_v0 = vpop.f32.mrb[5].mxu1 }
 0x1b4   : > { %v3765_v2 = vpop.f32.mrb[6].mxu1 }
 0x1b5   : > { %v1207_v12 = vpop.f32.mrb[7].mxu1 }
 0x1ba   : > { %v3768_v13 = vpop.f32.mrb[8].mxu1 }
 0x1bb   : > { %v1220_v14 = vpop.f32.mrb[9].mxu1 }
 0x1bc   : > { %v3769_v16 = vpop.f32.mrb[10].mxu1 }
 0x1bd   : > { %v1223_v29 = vpop.f32.mrb[11].mxu1 }
 0x1c2   : > { %v3772_v30 = vpop.f32.mrb[12].mxu1 }
 0x1c3   : > { %v1236_v34 = vpop.f32.mrb[13].mxu1 }
 0x1c4   : > { %v3773_v45 = vpop.f32.mrb[14].mxu1 }
 0x1c5   : > { %v1239_v46 = vpop.f32.mrb[15].mxu1 }
 0x1cb   : > { %v3930_v52 = vpop.f32.mrb[0].mxu0 }
 0x1cc   : > { %v4886_v54 = vadd.f32 %v3930_v52, %v3760_v49  ;;  %v2659_v5 = vpop.f32.mrb[1].mxu0 }
 0x1cd   : > { %v4888_v6 = vadd.f32 %v2659_v5, %v1188_v50  ;;  %v3931_v7 = vpop.f32.mrb[2].mxu0 }
 0x1ce   : > { %2820 = vst.msk [vmem:[%s4884_s23 + $0x10] sm:$0xff] %vm332_vm1, %v4886_v54  ;;  %v4893_v8 = vadd.f32 %v3931_v7, %v3761_v51  ;;  %v2662_v24 = vpop.f32.mrb[3].mxu0 }
 0x1cf   : > { %2818 = vst.msk [vmem:[%s4884_s23] sm:$0xff] %vm332_vm1, %v4888_v6  ;;  %v4898_v25 = vadd.f32 %v2662_v24, %v1191_v62 }
 0x1d0   : > { %2821 = vst.msk [vmem:[%s4884_s23 + $0x18] sm:$0xff] %vm332_vm1, %v4893_v8 }
 0x1d1   : > { %2819 = vst.msk [vmem:[%s4884_s23 + $0x8] sm:$0xff] %vm332_vm1, %v4898_v25 }
 0x1d3   : > { %v3934_v28 = vpop.f32.mrb[4].mxu0 }
 0x1d4   : > { %v4906_v31 = vadd.f32 %v3934_v28, %v3764_v63  ;;  %v2675_v43 = vpop.f32.mrb[5].mxu0 }
 0x1d5   : > { %v4908_v44 = vadd.f32 %v2675_v43, %v1204_v0  ;;  %v3935_v47 = vpop.f32.mrb[6].mxu0 }
 0x1d6   : > { %2824 = vst.msk [vmem:[%s4884_s23 + $0x30] sm:$0xff] %vm332_vm1, %v4906_v31  ;;  %v4913_v59 = vadd.f32 %v3935_v47, %v3765_v2  ;;  %v2678_v60 = vpop.f32.mrb[7].mxu0 }
 0x1d7   : > { %2822 = vst.msk [vmem:[%s4884_s23 + $0x20] sm:$0xff] %vm332_vm1, %v4908_v44  ;;  %v4918_v4 = vadd.f32 %v2678_v60, %v1207_v12 }
 0x1d8   : > { %2825 = vst.msk [vmem:[%s4884_s23 + $0x38] sm:$0xff] %vm332_vm1, %v4913_v59 }
 0x1d9   : > { %2823 = vst.msk [vmem:[%s4884_s23 + $0x28] sm:$0xff] %vm332_vm1, %v4918_v4 }
 0x1db   : > { %v3938_v11 = vpop.f32.mrb[8].mxu0 }
 0x1dc   : > { %v4926_v17 = vadd.f32 %v3938_v11, %v3768_v13  ;;  %v2691_v18 = vpop.f32.mrb[9].mxu0 }
 0x1dd   : > { %v4928_v20 = vadd.f32 %v2691_v18, %v1220_v14  ;;  %v3939_v22 = vpop.f32.mrb[10].mxu0 }
 0x1de   : > { %2828 = vst.msk [vmem:[%s4884_s23 + $0x50] sm:$0xff] %vm332_vm1, %v4926_v17  ;;  %v4933_v23 = vadd.f32 %v3939_v22, %v3769_v16  ;;  %v2694_v35 = vpop.f32.mrb[11].mxu0 }
 0x1df   : > { %2826 = vst.msk [vmem:[%s4884_s23 + $0x40] sm:$0xff] %vm332_vm1, %v4928_v20  ;;  %v4938_v36 = vadd.f32 %v2694_v35, %v1223_v29 }
 0x1e0   : > { %2829 = vst.msk [vmem:[%s4884_s23 + $0x58] sm:$0xff] %vm332_vm1, %v4933_v23 }
 0x1e1   : > { %2827 = vst.msk [vmem:[%s4884_s23 + $0x48] sm:$0xff] %vm332_vm1, %v4938_v36 }
 0x1e3   : > { %v3942_v37 = vpop.f32.mrb[12].mxu0 }
 0x1e4   : > { %v4946_v40 = vadd.f32 %v3942_v37, %v3772_v30  ;;  %v2707_v41 = vpop.f32.mrb[13].mxu0 }
 0x1e5   : > { %v4948_v42 = vadd.f32 %v2707_v41, %v1236_v34  ;;  %v3943_v56 = vpop.f32.mrb[14].mxu0 }
 0x1e6   : > { %2832 = vst.msk [vmem:[%s4884_s23 + $0x70] sm:$0xff] %vm332_vm1, %v4946_v40  ;;  %v4953_v57 = vadd.f32 %v3943_v56, %v3773_v45  ;;  %v2710_v21 = vpop.f32.mrb[15].mxu0 }
 0x1e7   : > { %2830 = vst.msk [vmem:[%s4884_s23 + $0x60] sm:$0xff] %vm332_vm1, %v4948_v42  ;;  %v4958_v58 = vadd.f32 %v2710_v21, %v1239_v46 }
 0x1e8   : > { %2833 = vst.msk [vmem:[%s4884_s23 + $0x78] sm:$0xff] %vm332_vm1, %v4953_v57 }
 0x1e9   : > { %2831 = vst.msk [vmem:[%s4884_s23 + $0x68] sm:$0xff] %vm332_vm1, %v4958_v58 }
 0x1ea   : > { %v3810_v39 = vpop.f32.mrb[16].mxu1 }
 0x1eb   : > { %v3946_v55 = vpop.f32.mrb[16].mxu0  ;;  %v1546_v61 = vpop.f32.mrb[17].mxu1 }
 0x1ec   : > { %v4966_v1 = vadd.f32 %v3946_v55, %v3810_v39  ;;  %v2723_v9 = vpop.f32.mrb[17].mxu0  ;;  %v3811_v10 = vpop.f32.mrb[18].mxu1  ;;  %v4278_v39 = vmov (%p2850_p5), 0.0  }
 0x1ed   : > { %v4968_v53 = vadd.f32 %v2723_v9, %v1546_v61  ;;  %v3947_v3 = vpop.f32.mrb[18].mxu0  ;;  %v1549_v15 = vpop.f32.mrb[19].mxu1  ;;  %2857 = vst.msk [vmem:[%s5240_s3] sm:$0x1] (%p2850_p5), %vm2856_vm2, %v4278_v39  ;;  %2858 = vst.msk [vmem:[%s5241_s4] sm:$0x1] (%p2850_p5), %vm2856_vm2, %v4278_v39 }
 0x1ee   : > { %2836 = vst.msk [vmem:[%s4884_s23 + $0x90] sm:$0xff] %vm332_vm1, %v4966_v1  ;;  %v4973_v19 = vadd.f32 %v3947_v3, %v3811_v10  ;;  %v2726_v26 = vpop.f32.mrb[19].mxu0 }
 0x1ef   : > { %2834 = vst.msk [vmem:[%s4884_s23 + $0x80] sm:$0xff] %vm332_vm1, %v4968_v53  ;;  %v4978_v27 = vadd.f32 %v2726_v26, %v1549_v15 }
 0x1f0   : > { %2837 = vst.msk [vmem:[%s4884_s23 + $0x98] sm:$0xff] %vm332_vm1, %v4973_v19 }
 0x1f1   : > { %2835 = vst.msk [vmem:[%s4884_s23 + $0x88] sm:$0xff] %vm332_vm1, %v4978_v27 }
 0x1f2   : > { %v3814_v32 = vpop.f32.mrb[20].mxu1 }
 0x1f3   : > { %v3950_v33 = vpop.f32.mrb[20].mxu0  ;;  %v1562_v38 = vpop.f32.mrb[21].mxu1 }
 0x1f4   : > { %v4986_v48 = vadd.f32 %v3950_v33, %v3814_v32  ;;  %v2739_v49 = vpop.f32.mrb[21].mxu0  ;;  %v3815_v50 = vpop.f32.mrb[22].mxu1 }
 0x1f5   : > { %v4988_v51 = vadd.f32 %v2739_v49, %v1562_v38  ;;  %v3951_v62 = vpop.f32.mrb[22].mxu0  ;;  %v1565_v63 = vpop.f32.mrb[23].mxu1 }
 0x1f6   : > { %2840 = vst.msk [vmem:[%s4884_s23 + $0xb0] sm:$0xff] %vm332_vm1, %v4986_v48  ;;  %v4993_v0 = vadd.f32 %v3951_v62, %v3815_v50  ;;  %v2742_v2 = vpop.f32.mrb[23].mxu0 }
 0x1f7   : > { %2838 = vst.msk [vmem:[%s4884_s23 + $0xa0] sm:$0xff] %vm332_vm1, %v4988_v51  ;;  %v4998_v12 = vadd.f32 %v2742_v2, %v1565_v63 }
 0x1f8   : > { %2841 = vst.msk [vmem:[%s4884_s23 + $0xb8] sm:$0xff] %vm332_vm1, %v4993_v0 }
 0x1f9   : > { %2839 = vst.msk [vmem:[%s4884_s23 + $0xa8] sm:$0xff] %vm332_vm1, %v4998_v12 }
 0x1fa   : > { %v3818_v13 = vpop.f32.mrb[24].mxu1 }
 0x1fb   : > { %v3954_v14 = vpop.f32.mrb[24].mxu0  ;;  %v1578_v16 = vpop.f32.mrb[25].mxu1 }
 0x1fc   : > { %v5006_v29 = vadd.f32 %v3954_v14, %v3818_v13  ;;  %v2755_v30 = vpop.f32.mrb[25].mxu0  ;;  %v3819_v34 = vpop.f32.mrb[26].mxu1 }
 0x1fd   : > { %v5008_v45 = vadd.f32 %v2755_v30, %v1578_v16  ;;  %v3955_v46 = vpop.f32.mrb[26].mxu0  ;;  %v1581_v52 = vpop.f32.mrb[27].mxu1 }
 0x1fe   : > { %2844 = vst.msk [vmem:[%s4884_s23 + $0xd0] sm:$0xff] %vm332_vm1, %v5006_v29  ;;  %v5013_v5 = vadd.f32 %v3955_v46, %v3819_v34  ;;  %v2758_v7 = vpop.f32.mrb[27].mxu0 }
 0x1ff   : > { %2842 = vst.msk [vmem:[%s4884_s23 + $0xc0] sm:$0xff] %vm332_vm1, %v5008_v45  ;;  %v5018_v24 = vadd.f32 %v2758_v7, %v1581_v52 }
 0x200   : > { %2845 = vst.msk [vmem:[%s4884_s23 + $0xd8] sm:$0xff] %vm332_vm1, %v5013_v5 }
 0x201   : > { %2843 = vst.msk [vmem:[%s4884_s23 + $0xc8] sm:$0xff] %vm332_vm1, %v5018_v24 }
 0x202   : > { %v3822_v28 = vpop.f32.mrb[28].mxu1 }
 0x203   : > { %v3958_v43 = vpop.f32.mrb[28].mxu0  ;;  %v1594_v47 = vpop.f32.mrb[29].mxu1  ;;  %2855 = sbr.rel (!%p2850_p5) target bundleno = 522 (0x20a), region = 32 }
 0x204   : > { %v5026_v60 = vadd.f32 %v3958_v43, %v3822_v28  ;;  %v2771_v11 = vpop.f32.mrb[29].mxu0  ;;  %v3823_v18 = vpop.f32.mrb[30].mxu1 }
 0x205   : > { %v5028_v22 = vadd.f32 %v2771_v11, %v1594_v47  ;;  %v3959_v35 = vpop.f32.mrb[30].mxu0  ;;  %v1597_v37 = vpop.f32.mrb[31].mxu1 }
 0x206   : > { %2848 = vst.msk [vmem:[%s4884_s23 + $0xf0] sm:$0xff] %vm332_vm1, %v5026_v60  ;;  %v5033_v41 = vadd.f32 %v3959_v35, %v3823_v18  ;;  %v2774_v56 = vpop.f32.mrb[31].mxu0 }
 0x207   : > { %2846 = vst.msk [vmem:[%s4884_s23 + $0xe0] sm:$0xff] %vm332_vm1, %v5028_v22  ;;  %v5038_v21 = vadd.f32 %v2774_v56, %v1597_v37 }
 0x208   : > { %2849 = vst.msk [vmem:[%s4884_s23 + $0xf8] sm:$0xff] %vm332_vm1, %v5033_v41 }
 0x209   : > { %2847 = vst.msk [vmem:[%s4884_s23 + $0xe8] sm:$0xff] %vm332_vm1, %v5038_v21 }
 0x20a PF: > { %v2860_v55 = vsel %vm332_vm1, %v4888_v6, 0.0  ;;  %v2861_v61 = vsel %vm332_vm1, %v4898_v25, 0.0  ;;  %v2863_v9 = vsel %vm332_vm1, %v4886_v54, 0.0  ;;  %v2865_v3 = vsel %vm332_vm1, %v4893_v8, 0.0 }
 0x20b   : > { %v2862_v10 = vadd.f32 %v2861_v61, %v2860_v55  ;;  %v2867_v26 = vsel %vm332_vm1, %v4908_v44, 0.0  ;;  %v2869_v33 = vsel %vm332_vm1, %v4918_v4, 0.0  ;;  %v2871_v49 = vsel %vm332_vm1, %v4906_v31, 0.0 }
 0x20c   : > { %v2873_v62 = vsel %vm332_vm1, %v4913_v59, 0.0  ;;  %v2875_v2 = vsel %vm332_vm1, %v4928_v20, 0.0  ;;  %v2877_v14 = vsel %vm332_vm1, %v4938_v36, 0.0  ;;  %v2933_v16 = vmul.f32 %v4888_v6, %v4888_v6 }
 0x20d   : > { %v2864_v15 = vadd.f32 %v2863_v9, %v2862_v10  ;;  %v2934_v30 = vmul.f32 %v4898_v25, %v4898_v25  ;;  %v2935_v46 = vmul.f32 %v4886_v54, %v4886_v54  ;;  %v2879_v52 = vsel %vm332_vm1, %v4926_v17, 0.0 }
 0x20e   : > { %v2936_v7 = vmul.f32 %v4893_v8, %v4893_v8  ;;  %v2881_v43 = vsel %vm332_vm1, %v4933_v23, 0.0  ;;  %v2937_v6 = vmul.f32 %v4908_v44, %v4908_v44  ;;  %v2965_v47 = vsel %vm332_vm1, %v2933_v16, 0.0 }
 0x20f   : > { %v2866_v32 = vadd.f32 %v2865_v3, %v2864_v15  ;;  %v2966_v25 = vsel %vm332_vm1, %v2934_v30, 0.0  ;;  %v2968_v54 = vsel %vm332_vm1, %v2935_v46, 0.0  ;;  %v2883_v35 = vsel %vm332_vm1, %v4948_v42, 0.0 }
 0x210   : > { %v2967_v18 = vadd.f32 %v2966_v25, %v2965_v47  ;;  %v2938_v8 = vmul.f32 %v4918_v4, %v4918_v4  ;;  %v2970_v37 = vsel %vm332_vm1, %v2936_v7, 0.0  ;;  %v2885_v44 = vsel %vm332_vm1, %v4958_v58, 0.0 }
 0x211   : > { %v2868_v38 = vadd.f32 %v2867_v26, %v2866_v32  ;;  %v2939_v55 = vmul.f32 %v4906_v31, %v4906_v31  ;;  %v2972_v61 = vsel %vm332_vm1, %v2937_v6, 0.0  ;;  %v2887_v3 = vsel %vm332_vm1, %v4946_v40, 0.0 }
 0x212   : > { %v2969_v39 = vadd.f32 %v2968_v54, %v2967_v18  ;;  %v2940_v4 = vmul.f32 %v4913_v59, %v4913_v59  ;;  %v2974_v15 = vsel %vm332_vm1, %v2938_v8, 0.0  ;;  %v2941_v31 = vmul.f32 %v4928_v20, %v4928_v20 }
 0x213   : > { %v2870_v50 = vadd.f32 %v2869_v33, %v2868_v38  ;;  %v2889_v33 = vsel %vm332_vm1, %v4953_v57, 0.0  ;;  %v2976_v38 = vsel %vm332_vm1, %v2939_v55, 0.0  ;;  %v2942_v59 = vmul.f32 %v4938_v36, %v4938_v36 }
 0x214   : > { %v2971_v10 = vadd.f32 %v2970_v37, %v2969_v39  ;;  %v2943_v20 = vmul.f32 %v4926_v17, %v4926_v17  ;;  %v2980_v16 = vsel %vm332_vm1, %v2941_v31, 0.0  ;;  %v2895_v46 = vsel %vm332_vm1, %v4966_v1, 0.0 }
 0x215   : > { %v2872_v63 = vadd.f32 %v2871_v49, %v2870_v50  ;;  %v2944_v36 = vmul.f32 %v4933_v23, %v4933_v23  ;;  %v2945_v17 = vmul.f32 %v4948_v42, %v4948_v42  ;;  %v2946_v23 = vmul.f32 %v4958_v58, %v4958_v58 }
 0x216   : > { %v2973_v32 = vadd.f32 %v2972_v61, %v2971_v10  ;;  %v2984_v6 = vsel %vm332_vm1, %v2943_v20, 0.0  ;;  %v2901_v8 = vsel %vm332_vm1, %v4998_v12, 0.0  ;;  %v2947_v42 = vmul.f32 %v4946_v40, %v4946_v40 }
 0x217   : > { %v2874_v13 = vadd.f32 %v2873_v62, %v2872_v63  ;;  %v2891_v62 = vsel %vm332_vm1, %v4968_v53, 0.0  ;;  %v2978_v63 = vsel %vm332_vm1, %v2940_v4, 0.0  ;;  %v2986_v18 = vsel %vm332_vm1, %v2944_v36, 0.0 }
 0x218   : > { %v2975_v50 = vadd.f32 %v2974_v15, %v2973_v32  ;;  %v2988_v37 = vsel %vm332_vm1, %v2945_v17, 0.0  ;;  %v2948_v58 = vmul.f32 %v4953_v57, %v4953_v57  ;;  %v2990_v55 = vsel %vm332_vm1, %v2946_v23, 0.0 }
 0x219   : > { %v2876_v34 = vadd.f32 %v2875_v2, %v2874_v13  ;;  %v2905_v10 = vsel %vm332_vm1, %v4993_v0, 0.0  ;;  %v2949_v40 = vmul.f32 %v4968_v53, %v4968_v53  ;;  %v2950_v57 = vmul.f32 %v4978_v27, %v4978_v27 }
 0x21a   : > { %v2977_v13 = vadd.f32 %v2976_v38, %v2975_v50  ;;  %v2994_v32 = vsel %vm332_vm1, %v2948_v58, 0.0  ;;  %v2909_v38 = vsel %vm332_vm1, %v5018_v24, 0.0  ;;  %v2951_v53 = vmul.f32 %v4966_v1, %v4966_v1 }
 0x21b   : > { %v2878_v28 = vadd.f32 %v2877_v14, %v2876_v34  ;;  %v2893_v14 = vsel %vm332_vm1, %v4978_v27, 0.0  ;;  %v2952_v27 = vmul.f32 %v4973_v19, %v4973_v19  ;;  %v2953_v1 = vmul.f32 %v4988_v51, %v4988_v51 }
 0x21c   : > { %v2979_v34 = vadd.f32 %v2978_v63, %v2977_v13  ;;  %v2998_v63 = vsel %vm332_vm1, %v2950_v57, 0.0  ;;  %v3000_v20 = vsel %vm332_vm1, %v2951_v53, 0.0  ;;  %v2921_v23 = vsel %vm332_vm1, %v5033_v41, 0.0 }
 0x21d   : > { %v2880_v11 = vadd.f32 %v2879_v52, %v2878_v28  ;;  %v2982_v52 = vsel %vm332_vm1, %v2942_v59, 0.0  ;;  %v2911_v59 = vsel %vm332_vm1, %v5006_v29, 0.0  ;;  %vm2930_vm3 = vcmask 24576  }
 0x21e   : > { %v2981_v28 = vadd.f32 %v2980_v16, %v2979_v34  ;;  %v2915_v34 = vsel %vm332_vm1, %v5028_v22, 0.0 }
 0x21f   : > { %v2882_v56 = vadd.f32 %v2881_v43, %v2880_v11  ;;  %v2897_v43 = vsel %vm332_vm1, %v4973_v19, 0.0  ;;  %v2899_v11 = vsel %vm332_vm1, %v4988_v51, 0.0  ;;  %v2954_v19 = vmul.f32 %v4998_v12, %v4998_v12 }
 0x220   : > { %v2983_v25 = vadd.f32 %v2982_v52, %v2981_v28  ;;  %v2955_v51 = vmul.f32 %v4986_v48, %v4986_v48  ;;  %v3004_v28 = vsel %vm332_vm1, %v2953_v1, 0.0  ;;  %v2956_v12 = vmul.f32 %v4993_v0, %v4993_v0  ;;  %v2932_v1 = vld [vmem:[%s5241_s4] sm:$0x1] }
 0x221   : > { %v2884_v9 = vadd.f32 %v2883_v35, %v2882_v56 }
 0x222   : > { %v2985_v35 = vadd.f32 %v2984_v6, %v2983_v25  ;;  %v2919_v6 = vsel %vm332_vm1, %v5026_v60, 0.0 }
 0x223   : > { %v2886_v26 = vadd.f32 %v2885_v44, %v2884_v9  ;;  %v2903_v44 = vsel %vm332_vm1, %v4986_v48, 0.0  ;;  %v2957_v48 = vmul.f32 %v5008_v45, %v5008_v45 }
 0x224   : > { %v2987_v39 = vadd.f32 %v2986_v18, %v2985_v35  ;;  %v3008_v18 = vsel %vm332_vm1, %v2955_v51, 0.0 }
 0x225   : > { %v2888_v49 = vadd.f32 %v2887_v3, %v2886_v26  ;;  %v2992_v3 = vsel %vm332_vm1, %v2947_v42, 0.0  ;;  %v2907_v26 = vsel %vm332_vm1, %v5008_v45, 0.0  ;;  %v3010_v42 = vsel %vm332_vm1, %v2956_v12, 0.0 }
 0x226   : > { %v2989_v9 = vadd.f32 %v2988_v37, %v2987_v39  ;;  %v3012_v39 = vsel %vm332_vm1, %v2957_v48, 0.0  ;;  %v2960_v45 = vmul.f32 %v5013_v5, %v5013_v5 }
 0x227   : > { %v2890_v2 = vadd.f32 %v2889_v33, %v2888_v49  ;;  %v2996_v49 = vsel %vm332_vm1, %v2949_v40, 0.0 }
 0x228   : > { %v2991_v15 = vadd.f32 %v2990_v55, %v2989_v9 }
 0x229   : > { %v2892_v30 = vadd.f32 %v2891_v62, %v2890_v2 }
 0x22a   : > { %v2993_v31 = vadd.f32 %v2992_v3, %v2991_v15 }
 0x22b   : > { %v2894_v7 = vadd.f32 %v2893_v14, %v2892_v30  ;;  %v2913_v14 = vsel %vm332_vm1, %v5013_v5, 0.0  ;;  %v2963_v5 = vmul.f32 %v5026_v60, %v5026_v60 }
 0x22c   : > { %v2995_v62 = vadd.f32 %v2994_v32, %v2993_v31  ;;  %v2964_v31 = vmul.f32 %v5033_v41, %v5033_v41 }
 0x22d   : > { %v2896_v47 = vadd.f32 %v2895_v46, %v2894_v7  ;;  %v3002_v46 = vsel %vm332_vm1, %v2952_v27, 0.0  ;;  %v2917_v7 = vsel %vm332_vm1, %v5038_v21, 0.0 }
 0x22e   : > { %v2997_v13 = vadd.f32 %v2996_v49, %v2995_v62  ;;  %v3024_v49 = vsel %vm332_vm1, %v2963_v5, 0.0  ;;  %v3026_v62 = vsel %vm332_vm1, %v2964_v31, 0.0 }
 0x22f   : > { %v2898_v54 = vadd.f32 %v2897_v43, %v2896_v47  ;;  %v3006_v47 = vsel %vm332_vm1, %v2954_v19, 0.0 }
 0x230   : > { %v2999_v30 = vadd.f32 %v2998_v63, %v2997_v13 }
 0x231   : > { %v2900_v56 = vadd.f32 %v2899_v11, %v2898_v54 }
 0x232   : > { %v3001_v52 = vadd.f32 %v3000_v20, %v2999_v30 }
 0x233   : > { %v2902_v61 = vadd.f32 %v2901_v8, %v2900_v56  ;;  %v2958_v8 = vmul.f32 %v5018_v24, %v5018_v24  ;;  %v2959_v56 = vmul.f32 %v5006_v29, %v5006_v29  ;;  %v2961_v24 = vmul.f32 %v5028_v22, %v5028_v22  ;;  %v2859_v22 = vld [vmem:[%s5240_s3] sm:$0x1] }
 0x234   : > { %v3003_v17 = vadd.f32 %v3002_v46, %v3001_v52  ;;  %v2962_v29 = vmul.f32 %v5038_v21, %v5038_v21 }
 0x235   : > { %v2904_v4 = vadd.f32 %v2903_v44, %v2902_v61  ;;  %v3014_v55 = vsel %vm332_vm1, %v2958_v8, 0.0  ;;  %v3020_v57 = vsel %vm332_vm1, %v2961_v24, 0.0 }
 0x236   : > { %v3005_v11 = vadd.f32 %v3004_v28, %v3003_v17  ;;  %v3022_v21 = vsel %vm332_vm1, %v2962_v29, 0.0 }
 0x237   : > { %v2906_v33 = vadd.f32 %v2905_v10, %v2904_v4  ;;  %v3016_v10 = vsel %vm332_vm1, %v2959_v56, 0.0  ;;  %v3018_v4 = vsel %vm332_vm1, %v2960_v45, 0.0 }
 0x238   : > { %v3007_v35 = vadd.f32 %v3006_v47, %v3005_v11 }
 0x239   : > { %v2908_v50 = vadd.f32 %v2907_v26, %v2906_v33 }
 0x23a   : > { %v3009_v37 = vadd.f32 %v3008_v18, %v3007_v35 }
 0x23b   : > { %v2910_v2 = vadd.f32 %v2909_v38, %v2908_v50 }
 0x23c   : > { %v3011_v58 = vadd.f32 %v3010_v42, %v3009_v37 }
 0x23d   : > { %v2912_v16 = vadd.f32 %v2911_v59, %v2910_v2 }
 0x23e   : > { %v3013_v9 = vadd.f32 %v3012_v39, %v3011_v58 }
 0x23f   : > { %v2914_v36 = vadd.f32 %v2913_v14, %v2912_v16 }
 0x240   : > { %v3015_v3 = vadd.f32 %v3014_v55, %v3013_v9 }
 0x241   : > { %v2916_v43 = vadd.f32 %v2915_v34, %v2914_v36 }
 0x242   : > { %v3017_v26 = vadd.f32 %v3016_v10, %v3015_v3 }
 0x243   : > { %v2918_v25 = vadd.f32 %v2917_v7, %v2916_v43 }
 0x244   : > { %v3019_v33 = vadd.f32 %v3018_v4, %v3017_v26 }
 0x245   : > { %v2920_v54 = vadd.f32 %v2919_v6, %v2918_v25 }
 0x246   : > { %v3021_v53 = vadd.f32 %v3020_v57, %v3019_v33 }
 0x247   : > { %v2922_v0 = vadd.f32 %v2921_v23, %v2920_v54 }
 0x248   : > { %v3023_v60 = vadd.f32 %v3022_v21, %v3021_v53 }
 0x249   : > { %v2923_v44 = vrot.slane %v2922_v0, 4 }
 0x24a   : > { %v3025_v59 = vadd.f32 %v3024_v49, %v3023_v60 }
 0x24b   : > { %v2924_v61 = vadd.f32 %v2923_v44, %v2922_v0 }
 0x24c   : > { %v3027_v27 = vadd.f32 %v3026_v62, %v3025_v59 }
 0x24d   : > { %v2925_v40 = vrot.slane %v2924_v61, 2 }
 0x24e   : > { %v3028_v63 = vrot.slane %v3027_v27, 4 }
 0x24f   : > { %v2926_v15 = vadd.f32 %v2925_v40, %v2924_v61 }
 0x250   : > { %v3029_v41 = vadd.f32 %v3028_v63, %v3027_v27 }
 0x251   : > { %v2927_v32 = vrot.slane %v2926_v15, 1 }
 0x252   : > { %v3030_v2 = vrot.slane %v3029_v41, 2 }
 0x253   : > { %v2928_v38 = vadd.f32 %v2927_v32, %v2926_v15 }
 0x254   : > { %v3031_v13 = vadd.f32 %v3030_v2, %v3029_v41 }
 0x255   : > { %v2929_v50 = vadd.f32 %v2928_v38, %v2859_v22 }
 0x256   : > { %v3032_v14 = vrot.slane %v3031_v13, 1 }
 0x257   : > { %2931 = vst.msk [vmem:[%s5240_s3] sm:$0x1] %vm2930_vm3, %v2929_v50 }
 0x258   : > { %v3033_v20 = vadd.f32 %v3032_v14, %v3031_v13 }
 0x25a   : > { %v3034_v16 = vadd.f32 %v3033_v20, %v2932_v1 }
 0x25c   : > { %3035 = vst.msk [vmem:[%s5241_s4] sm:$0x1] %vm2930_vm3, %v3034_v16 }
 0x25d PF: > { %s15_s17 = sadd.s32 1, %s4276_s17   ;;  %s5242_s15 = smov %s4272_s16 }
 0x25e   : > { %p12_p6 = scmp.ge.s32.totalorder %s15_s17, 4   ;;  %s5243_s16 = smov %s5245_s18 }
 0x260   :  { %14 = sbr.rel (!%p12_p6) target bundleno = 2 (0x2), region = 88 }

// kernel: _lambda_.11
= control target key start
LH: loop header
LB: loop body
LE: loop exit
PB: predicated region body
PF: predicated region fallthrough
CT: control target
= control target key end

     0   :  { %s1620_s12 = smov 0   ;;  %s1622_s13 = smov 0   ;;  %s1833_s0 = inlined_call_operand.vmem [shape: f32[2,1,10,10,4], index: 0, kind: input, shape index: {}]   ;;  %s1834_s1 = inlined_call_operand.vmem [shape: bf16[9,4,8], index: 1, kind: input, shape index: {}]   ;;  %s1835_s2 = inlined_call_operand.vmem [shape: f32[1,8], index: 2, kind: input, shape index: {}]   ;;  %s1836_s3 = inlined_call_operand.vmem [shape: f32[2,8,8,8], index: 3, kind: output, shape index: {}]  }
   0x1   :  { %s1624_s14 = smov 0  }
   0x2 LB: > { %s25_s15 = sadd.s32 1, %s1594_s13  ;;  %p1240_p0 = scmp.ge.s32.totalorder %s1598_s14, 1  ;;  %s1598_s14 = sphi %s1624_s14, %s13_s14   ;;  %s1594_s13 = sphi %s1622_s13, %s1838_s13   ;;  %s1590_s12 = sphi %s1620_s12, %s1837_s12  }
   0x3   : > { %p27_p1 = scmp.ge.s32.totalorder %s25_s15, 2  ;;  %p157_p2 = scmp.lt.s32.totalorder %s1598_s14, 3 }
   0x5   : > { %s1840_s15 = smov (%p27_p1, %s25_s15), 0  ;;  %p158_p3 = pnand %p1240_p0, %p157_p2 }
   0x6   : > { %v1244_v0 = vld [vmem:[%s1834_s1 + $0x2] sm:$0x3] (!%p158_p3)  ;;  %vm249_vm0 = vcmask (!%p158_p3), 1041408   ;;  %v1644_v1 = vld [vmem:[%s1834_s1 + $0x8] sm:$0x3] (!%p158_p3)  ;;  %p189_p4 = scmp.lt.s32.totalorder (!%p158_p3), %s1590_s12, 1 }
   0x7   : > { %161 = sbr.rel (%p158_p3) target bundleno = 313 (0x139), region = 32  ;;  %1541 = vmatprep.subr.msk.bf16.mxu1 (!%p158_p3), %vm249_vm0, %v1244_v0  ;;  %1545 = vmatprep.subr.msk.bf16.mxu0 (!%p158_p3), %vm249_vm0, %v1644_v1  ;;  %v251_v2 = vsel (!%p158_p3), %vm249_vm0, %v1244_v0, 0  ;;  %v1652_v3 = vsel (!%p158_p3), %vm249_vm0, %v1644_v1, 0  ;;  %v221_v4 = vld [vmem:[%s1834_s1] sm:$0x3] (!%p158_p3)  ;;  %vm236_vm1 = vcmask (!%p158_p3), 31744  }
   0x8   : > { %1386 = vmatpush3.bf16.msra.mxu1 (!%p158_p3), %v251_v2  ;;  %1426 = vmatpush3.bf16.msra.mxu0 (!%p158_p3), %v1652_v3  ;;  %v1292_v5 = vld [vmem:[%s1834_s1 + $0xa] sm:$0x3] (!%p158_p3)  ;;  %v331_v12 = vsel (!%p158_p3), %vm249_vm0, %v221_v4, 0  ;;  %v1305_v22 = vld [vmem:[%s1834_s1 + $0xc] sm:$0x3] (!%p158_p3)  ;;  %vm1137_vm2 = vcmask (!%p158_p3), 64512  }
   0x9   : > { %1542 = vmatprep.subr.msk.bf16.mxu1 (!%p158_p3), %vm249_vm0, %v221_v4  ;;  %1547 = vmatprep.subr.msk.bf16.mxu0 (!%p158_p3), %vm249_vm0, %v1292_v5  ;;  %v732_v17 = vsel (!%p158_p3), %vm249_vm0, %v1292_v5, 0  ;;  %v1253_v23 = vld [vmem:[%s1834_s1 + $0x4] sm:$0x3] (!%p158_p3)  ;;  %v835_v38 = vsel (!%p158_p3), %vm249_vm0, %v1305_v22, 0  ;;  %v1318_v41 = vld [vmem:[%s1834_s1 + $0xe] sm:$0x3] (!%p158_p3) }
   0xa   : > { %v425_v46 = vsel (!%p158_p3), %vm249_vm0, %v1253_v23, 0  ;;  %v1266_v47 = vld [vmem:[%s1834_s1 + $0x6] sm:$0x3] (!%p158_p3)  ;;  %v937_v54 = vsel (!%p158_p3), %vm249_vm0, %v1318_v41, 0  ;;  %v1331_v55 = vld [vmem:[%s1834_s1 + $0x10] sm:$0x3] (!%p158_p3) }
   0xb   : > { %v528_v60 = vsel (!%p158_p3), %vm249_vm0, %v1266_v47, 0  ;;  %v1039_v0 = vsel (!%p158_p3), %vm249_vm0, %v1331_v55, 0 }
   0xe   : > { %s1842_s12 = smov (!%p189_p4, %s1590_s12), 1 }
   0xf   : > { %s1551_s24 = smul.u32 160, %s1842_s12  ;;  %s1339_s17 = sshll.u32 %s1842_s12, 6 }
  0x10   : > { %s1806_s20 = scalar_lea.vmem %s1836_s3, %s1339_s17 }
  0x11   : > { %s1669_s27 = scalar_lea.vmem %s1833_s0, %s1551_s24 }
  0x12   : > { %v222_v6 = vld [vmem:[%s1669_s27 + $0x1] sm:$0xff]  ;;  %v223_v7 = vld [vmem:[%s1669_s27 + $0x11] sm:$0xff] }
  0x13   : > { %v1272_v8 = vld [vmem:[%s1669_s27 + $0x21] sm:$0xff]  ;;  %v230_v9 = vpack.c.bf16 %v223_v7, %v222_v6  ;;  %v225_v11 = vld [vmem:[%s1669_s27 + $0x31] sm:$0xff] }
  0x14   : > { %v611_v10 = vpack.c.bf16 %v1272_v8, %v223_v7  ;;  %v1274_v13 = vld [vmem:[%s1669_s27 + $0x41] sm:$0xff]  ;;  %v1678_v14 = vld [vmem:[%s1669_s27 + $0x51] sm:$0xff]  ;;  %v1680_v15 = vpack.c.bf16 %v225_v11, %v1272_v8 }
  0x15   : > { %v612_v16 = vpack.c.bf16 %v1274_v13, %v225_v11  ;;  %v1684_v18 = vpack.c.bf16 %v1678_v14, %v1274_v13  ;;  %v1284_v19 = vld [vmem:[%s1669_s27 + $0x12] sm:$0xff]  ;;  %1387 = vmatprep.mubr.msk.bf16.mxu1 %vm236_vm1, %v230_v9  ;;  %v1285_v20 = vld [vmem:[%s1669_s27 + $0x22] sm:$0xff] }
  0x16   : > { %1427 = vmatprep.mubr.msk.bf16.mxu0 %vm236_vm1, %v611_v10  ;;  %1388 = vmatmul.mubr.msk.bf16.vlgmr.msra.gmra.mrb[0].mxu1 %vm236_vm1, %v1680_v15  ;;  %v713_v21 = vpack.c.bf16 %v1285_v20, %v1284_v19  ;;  %v1700_v24 = vld [vmem:[%s1669_s27 + $0x61] sm:$0xff]  ;;  %v1703_v25 = vld [vmem:[%s1669_s27 + $0x71] sm:$0xff] }
  0x17   : > { %1428 = vmatmul.mubr.msk.bf16.vlgmr.msra.gmra.mrb[0].mxu0 %vm236_vm1, %v612_v16  ;;  %1396 = vmatpush3.bf16.msra.mxu1 %v331_v12  ;;  %v209_v26 = vld [vmem:[%s1669_s27] sm:$0xff]  ;;  %v1710_v27 = vld [vmem:[%s1669_s27 + $0x10] sm:$0xff]  ;;  %v1716_v28 = vpack.c.bf16 %v1703_v25, %v1700_v24  ;;  %v613_v8 = vpack.c.bf16 %v1700_v24, %v1678_v14 }
  0x18   : > { %1436 = vmatpush3.bf16.msra.mxu0 %v732_v17  ;;  %1391 = vmatprep.mubr.msk.bf16.mxu1 %vm236_vm1, %v1684_v18  ;;  %v1286_v29 = vld [vmem:[%s1669_s27 + $0x32] sm:$0xff]  ;;  %v1287_v30 = vld [vmem:[%s1669_s27 + $0x42] sm:$0xff]  ;;  %v217_v31 = vpack.c.bf16 %v1710_v27, %v209_v26  ;;  %v1336_v16 = vld [vmem:[%s1835_s2] ss:$0 sm:$0xff] }
  0x19   : > { %1437 = vmatprep.mubr.msk.bf16.mxu0 %vm236_vm1, %v713_v21  ;;  %1548 = vmatprep.subr.msk.bf16.mxu0 %vm249_vm0, %v1305_v22  ;;  %v1288_v32 = vld [vmem:[%s1669_s27 + $0x52] sm:$0xff]  ;;  %v1289_v33 = vld [vmem:[%s1669_s27 + $0x62] sm:$0xff]  ;;  %v714_v34 = vpack.c.bf16 %v1287_v30, %v1286_v29  ;;  %v407_v56 = vpack.c.bf16 %v1286_v29, %v1285_v20 }
  0x1a   : > { %1543 = vmatprep.subr.msk.bf16.mxu1 %vm249_vm0, %v1253_v23  ;;  %v211_v35 = vld [vmem:[%s1669_s27 + $0x20] sm:$0xff]  ;;  %v212_v36 = vld [vmem:[%s1669_s27 + $0x30] sm:$0xff]  ;;  %v715_v37 = vpack.c.bf16 %v1289_v33, %v1288_v32  ;;  %v408_v59 = vpack.c.bf16 %v1288_v32, %v1287_v30 }
  0x1b   : > { %v213_v39 = vld [vmem:[%s1669_s27 + $0x40] sm:$0xff]  ;;  %v214_v40 = vld [vmem:[%s1669_s27 + $0x50] sm:$0xff]  ;;  %v218_v42 = vpack.c.bf16 %v212_v36, %v211_v35  ;;  %v509_v63 = vpack.c.bf16 %v211_v35, %v1710_v27 }
  0x1c   : > { %v1290_v43 = vld [vmem:[%s1669_s27 + $0x72] sm:$0xff]  ;;  %v1738_v44 = vld [vmem:[%s1669_s27 + $0x82] sm:$0xff]  ;;  %v219_v45 = vpack.c.bf16 %v214_v40, %v213_v39  ;;  %v510_v2 = vpack.c.bf16 %v213_v39, %v212_v36 }
  0x1d   : > { %v716_v48 = vpack.c.bf16 %v1738_v44, %v1290_v43  ;;  %v215_v49 = vld [vmem:[%s1669_s27 + $0x60] sm:$0xff]  ;;  %v216_v50 = vld [vmem:[%s1669_s27 + $0x70] sm:$0xff]  ;;  %v409_v62 = vpack.c.bf16 %v1290_v43, %v1289_v33 }
  0x1e   : > { %1392 = vmatmul.mubr.msk.bf16.gmra.mrb[4].mxu1 %vm236_vm1, %v1716_v28  ;;  %v398_v51 = vld [vmem:[%s1669_s27 + $0x2] sm:$0xff]  ;;  %v220_v52 = vpack.c.bf16 %v216_v50, %v215_v49  ;;  %v1304_v58 = vld [vmem:[%s1669_s27 + $0x90] sm:$0xff]  ;;  %v511_v5 = vpack.c.bf16 %v215_v49, %v214_v40 }
  0x1f   : > { %1397 = vmatprep.mubr.msk.bf16.mxu1 %vm236_vm1, %v217_v31  ;;  %v406_v53 = vpack.c.bf16 %v1284_v19, %v398_v51  ;;  %v1303_v57 = vld [vmem:[%s1669_s27 + $0x80] sm:$0xff]  ;;  %v1317_v4 = vld [vmem:[%s1669_s27 + $0x91] sm:$0xff] }
  0x20   : > { %v819_v61 = vpack.c.bf16 %v1304_v58, %v1303_v57  ;;  %v512_v7 = vpack.c.bf16 %v1303_v57, %v216_v50 }
  0x23   : > { %1438 = vmatmul.mubr.msk.bf16.vlgmr.msra.gmra.mrb[0].mxu0 %vm236_vm1, %v714_v34 }
  0x24   : > { %1446 = vmatpush3.bf16.msra.mxu0 %v835_v38  ;;  %1441 = vmatprep.mubr.msk.bf16.mxu0 %vm236_vm1, %v715_v37 }
  0x25   : > { %1549 = vmatprep.subr.msk.bf16.mxu0 %vm249_vm0, %v1318_v41 }
  0x26   : > { %1398 = vmatmul.mubr.msk.bf16.vlgmr.msra.gmra.mrb[0].mxu1 %vm236_vm1, %v218_v42 }
  0x27   : > { %1406 = vmatpush3.bf16.msra.mxu1 %v425_v46  ;;  %1401 = vmatprep.mubr.msk.bf16.mxu1 %vm236_vm1, %v219_v45 }
  0x28   : > { %1544 = vmatprep.subr.msk.bf16.mxu1 %vm249_vm0, %v1266_v47 }
  0x2b   : > { %1442 = vmatmul.mubr.msk.bf16.gmra.mrb[4].mxu0 %vm236_vm1, %v716_v48 }
  0x2c   : > { %1447 = vmatprep.mubr.msk.bf16.mxu0 %vm236_vm1, %v218_v42 }
  0x2e   : > { %1402 = vmatmul.mubr.msk.bf16.gmra.mrb[4].mxu1 %vm236_vm1, %v220_v52 }
  0x2f   : > { %1407 = vmatprep.mubr.msk.bf16.mxu1 %vm236_vm1, %v406_v53 }
  0x33   : > { %1448 = vmatmul.mubr.msk.bf16.vlgmr.msra.gmra.mrb[0].mxu0 %vm236_vm1, %v219_v45 }
  0x34   : > { %1456 = vmatpush3.bf16.msra.mxu0 %v937_v54  ;;  %1451 = vmatprep.mubr.msk.bf16.mxu0 %vm236_vm1, %v220_v52 }
  0x35   : > { %1550 = vmatprep.subr.msk.bf16.mxu0 %vm249_vm0, %v1331_v55 }
  0x36   : > { %1408 = vmatmul.mubr.msk.bf16.vlgmr.msra.gmra.mrb[0].mxu1 %vm236_vm1, %v407_v56 }
  0x37   : > { %1416 = vmatpush3.bf16.msra.mxu1 %v528_v60  ;;  %1411 = vmatprep.mubr.msk.bf16.mxu1 %vm236_vm1, %v408_v59 }
  0x38   : > { %1546 = vmatprep.subr.msk.bf16.mxu1 %vm249_vm0, %v1644_v1  ;;  %v1316_v1 = vld [vmem:[%s1669_s27 + $0x81] sm:$0xff] }
  0x39   : > { %v921_v6 = vpack.c.bf16 %v1317_v4, %v1316_v1  ;;  %v614_v9 = vpack.c.bf16 %v1316_v1, %v1703_v25 }
  0x3b   : > { %1452 = vmatmul.mubr.msk.bf16.gmra.mrb[4].mxu0 %vm236_vm1, %v819_v61 }
  0x3c   : > { %1457 = vmatprep.mubr.msk.bf16.mxu0 %vm236_vm1, %v1680_v15 }
  0x3e   : > { %1412 = vmatmul.mubr.msk.bf16.gmra.mrb[4].mxu1 %vm236_vm1, %v409_v62 }
  0x3f   : > { %1417 = vmatprep.mubr.msk.bf16.mxu1 %vm236_vm1, %v509_v63 }
  0x43   : > { %1458 = vmatmul.mubr.msk.bf16.vlgmr.msra.gmra.mrb[0].mxu0 %vm236_vm1, %v1684_v18 }
  0x44   : > { %1466 = vmatpush3.bf16.msra.mxu0 %v1039_v0  ;;  %1461 = vmatprep.mubr.msk.bf16.mxu0 %vm236_vm1, %v1716_v28 }
  0x46   : > { %1418 = vmatmul.mubr.msk.bf16.vlgmr.msra.gmra.mrb[0].mxu1 %vm236_vm1, %v510_v2 }
  0x47   : > { %1476 = vmatpush3.bf16.msra.mxu1 %v1652_v3  ;;  %1421 = vmatprep.mubr.msk.bf16.mxu1 %vm236_vm1, %v511_v5  ;;  %v1330_v3 = vld [vmem:[%s1669_s27 + $0x92] sm:$0xff] }
  0x48   : > { %v1023_v10 = vpack.c.bf16 %v1330_v3, %v1738_v44 }
  0x4b   : > { %1462 = vmatmul.mubr.msk.bf16.gmra.mrb[4].mxu0 %vm236_vm1, %v921_v6 }
  0x4c   : > { %1467 = vmatprep.mubr.msk.bf16.mxu0 %vm236_vm1, %v407_v56 }
  0x4e   : > { %1422 = vmatmul.mubr.msk.bf16.gmra.mrb[4].mxu1 %vm236_vm1, %v512_v7 }
  0x4f   : > { %1431 = vmatprep.mubr.msk.bf16.mxu1 %vm236_vm1, %v613_v8 }
  0x53   : > { %1468 = vmatmul.mubr.msk.bf16.vlgmr.msra.gmra.mrb[0].mxu0 %vm236_vm1, %v408_v59 }
  0x54   : > { %1471 = vmatprep.mubr.msk.bf16.mxu0 %vm236_vm1, %v409_v62 }
  0x5a   : > { %1432 = vmatmul.mubr.msk.bf16.vlgmr.msra.gmra.mrb[4].mxu1 %vm236_vm1, %v614_v9 }
  0x5b   : > { %1472 = vmatmul.mubr.msk.bf16.gmra.mrb[4].mxu0 %vm236_vm1, %v1023_v10 }
 0x119   : > { %v1419_v11 = vpop.f32.mrb[0].mxu1 }
 0x11a   : > { %v564_v12 = vpop.f32.mrb[1].mxu1 }
 0x11b   : > { %v1420_v13 = vpop.f32.mrb[2].mxu1 }
 0x11c   : > { %v567_v14 = vpop.f32.mrb[3].mxu1 }
 0x126   : > { %v1469_v15 = vpop.f32.mrb[0].mxu0 }
 0x127   : > { %v1477_v17 = vadd.f32 %v1469_v15, %v1419_v11  ;;  %v1075_v18 = vpop.f32.mrb[1].mxu0 }
 0x128   : > { %v1478_v19 = vadd.f32 %v1075_v18, %v564_v12  ;;  %v1470_v20 = vpop.f32.mrb[2].mxu0 }
 0x129   : > { %v1123_v21 = vadd.f32 %v1477_v17, %v1336_v16  ;;  %v1479_v22 = vadd.f32 %v1470_v20, %v1420_v13  ;;  %v1078_v23 = vpop.f32.mrb[3].mxu0 }
 0x12a   : > { %v1121_v24 = vadd.f32 %v1478_v19, %v1336_v16  ;;  %v1480_v25 = vadd.f32 %v1078_v23, %v567_v14 }
 0x12b   : > { %v1131_v26 = vmax.f32 %v1123_v21, 0.0  ;;  %v1124_v27 = vadd.f32 %v1479_v22, %v1336_v16 }
 0x12c   : > { %v1129_v28 = vmax.f32 %v1121_v24, 0.0  ;;  %v1122_v29 = vadd.f32 %v1480_v25, %v1336_v16 }
 0x12d   : > { %1140 = vst.msk [vmem:[%s1806_s20 + $0x10] sm:$0xff] %vm1137_vm2, %v1131_v26  ;;  %v1132_v30 = vmax.f32 %v1124_v27, 0.0  ;;  %v1433_v32 = vpop.f32.mrb[4].mxu1 }
 0x12e   : > { %1138 = vst.msk [vmem:[%s1806_s20] sm:$0xff] %vm1137_vm2, %v1129_v28  ;;  %v1130_v31 = vmax.f32 %v1122_v29, 0.0  ;;  %v1473_v33 = vpop.f32.mrb[4].mxu0  ;;  %v682_v35 = vpop.f32.mrb[5].mxu1 }
 0x12f   : > { %1141 = vst.msk [vmem:[%s1806_s20 + $0x18] sm:$0xff] %vm1137_vm2, %v1132_v30  ;;  %v1481_v34 = vadd.f32 %v1473_v33, %v1433_v32  ;;  %v1091_v36 = vpop.f32.mrb[5].mxu0  ;;  %v1434_v38 = vpop.f32.mrb[6].mxu1 }
 0x130   : > { %1139 = vst.msk [vmem:[%s1806_s20 + $0x8] sm:$0xff] %vm1137_vm2, %v1130_v31  ;;  %v1482_v37 = vadd.f32 %v1091_v36, %v682_v35  ;;  %v1474_v39 = vpop.f32.mrb[6].mxu0  ;;  %v685_v42 = vpop.f32.mrb[7].mxu1 }
 0x131   : > { %v1127_v40 = vadd.f32 %v1481_v34, %v1336_v16  ;;  %v1483_v41 = vadd.f32 %v1474_v39, %v1434_v38  ;;  %v1094_v43 = vpop.f32.mrb[7].mxu0 }
 0x132   : > { %v1125_v44 = vadd.f32 %v1482_v37, %v1336_v16  ;;  %v1484_v45 = vadd.f32 %v1094_v43, %v685_v42 }
 0x133   : > { %v1135_v46 = vmax.f32 %v1127_v40, 0.0  ;;  %v1128_v47 = vadd.f32 %v1483_v41, %v1336_v16 }
 0x134   : > { %v1133_v48 = vmax.f32 %v1125_v44, 0.0  ;;  %v1126_v49 = vadd.f32 %v1484_v45, %v1336_v16 }
 0x135   : > { %1144 = vst.msk [vmem:[%s1806_s20 + $0x30] sm:$0xff] %vm1137_vm2, %v1135_v46  ;;  %v1136_v50 = vmax.f32 %v1128_v47, 0.0 }
 0x136   : > { %1142 = vst.msk [vmem:[%s1806_s20 + $0x20] sm:$0xff] %vm1137_vm2, %v1133_v48  ;;  %v1134_v51 = vmax.f32 %v1126_v49, 0.0 }
 0x137   : > { %1145 = vst.msk [vmem:[%s1806_s20 + $0x38] sm:$0xff] %vm1137_vm2, %v1136_v50 }
 0x138   : > { %1143 = vst.msk [vmem:[%s1806_s20 + $0x28] sm:$0xff] %vm1137_vm2, %v1134_v51 }
 0x139 PF: > { %s13_s14 = sadd.s32 1, %s1598_s14   ;;  %s1837_s12 = smov %s1594_s13 }
 0x13a   : > { %p10_p5 = scmp.ge.s32.totalorder %s13_s14, 4   ;;  %s1838_s13 = smov %s1840_s15 }
 0x13c   :  { %12 = sbr.rel (!%p10_p5) target bundleno = 2 (0x2), region = 72 }

// kernel: _lambda_.13
= control target key start
LH: loop header
LB: loop body
LE: loop exit
PB: predicated region body
PF: predicated region fallthrough
CT: control target
= control target key end

     0   :  { %s435_s12 = smov 0   ;;  %s437_s13 = smov 0   ;;  %s482_s0 = inlined_call_operand.vmem [shape: f32[2,8,8,8], index: 0, kind: input, shape index: {}]   ;;  %s483_s1 = inlined_call_operand.vmem [shape: f32[1,8], index: 1, kind: input, shape index: {}]   ;;  %s484_s2 = inlined_call_operand.vmem [shape: f32[1,8], index: 2, kind: input, shape index: {}]   ;;  %s485_s3 = inlined_call_operand.vmem [shape: f32[2,8,8,8], index: 3, kind: output, shape index: {}]  }
   0x1   :  { %s439_s14 = smov 0  }
   0x2 LB: > { %s25_s15 = sadd.s32 1, %s409_s13  ;;  %p356_p0 = scmp.ge.s32.totalorder %s413_s14, 1  ;;  %s413_s14 = sphi %s439_s14, %s13_s14   ;;  %s409_s13 = sphi %s437_s13, %s487_s13   ;;  %s405_s12 = sphi %s435_s12, %s486_s12  }
   0x3   : > { %p27_p1 = scmp.ge.s32.totalorder %s25_s15, 2  ;;  %p158_p2 = scmp.lt.s32.totalorder %s413_s14, 3 }
   0x5   : > { %s489_s15 = smov (%p27_p1, %s25_s15), 0  ;;  %p159_p3 = pnand %p356_p0, %p158_p2 }
   0x6   : > { %p191_p4 = scmp.lt.s32.totalorder (!%p159_p3), %s405_s12, 1  ;;  %v361_v0 = vld [vmem:[%s483_s1] ss:$0 sm:$0xff] (!%p159_p3)  ;;  %vm256_vm0 = vcmask (!%p159_p3), 64512  }
   0x7   : > { %162 = sbr.rel (%p159_p3) target bundleno = 28 (0x1c), region = 32  ;;  %v362_v1 = vld [vmem:[%s484_s2] ss:$0 sm:$0xff] (!%p159_p3) }
   0xe   : > { %s491_s12 = smov (!%p191_p4, %s405_s12), 1 }
   0xf   : > { %s365_s16 = sshll.u32 %s491_s12, 6 }
  0x10   : > { %s198_s21 = scalar_lea.vmem %s482_s0, %s365_s16  ;;  %s208_s26 = scalar_lea.vmem %s485_s3, %s365_s16 }
  0x11   : > { %v210_v2 = vld [vmem:[%s198_s21] sm:$0xff]  ;;  %v211_v3 = vld [vmem:[%s198_s21 + $0x8] sm:$0xff]  ;;  %v212_v4 = vld [vmem:[%s198_s21 + $0x10] sm:$0xff] }
  0x12   : > { %v225_v5 = vmul.f32 %v361_v0, %v210_v2  ;;  %v226_v6 = vmul.f32 %v361_v0, %v211_v3  ;;  %v227_v7 = vmul.f32 %v361_v0, %v212_v4  ;;  %v213_v8 = vld [vmem:[%s198_s21 + $0x18] sm:$0xff]  ;;  %v214_v9 = vld [vmem:[%s198_s21 + $0x20] sm:$0xff]  ;;  %v215_v10 = vld [vmem:[%s198_s21 + $0x28] sm:$0xff] }
  0x13   : > { %v228_v11 = vmul.f32 %v361_v0, %v213_v8  ;;  %v229_v12 = vmul.f32 %v361_v0, %v214_v9  ;;  %v230_v13 = vmul.f32 %v361_v0, %v215_v10  ;;  %v216_v14 = vld [vmem:[%s198_s21 + $0x30] sm:$0xff]  ;;  %v217_v15 = vld [vmem:[%s198_s21 + $0x38] sm:$0xff] }
  0x14   : > { %v240_v16 = vadd.f32 %v362_v1, %v225_v5  ;;  %v241_v17 = vadd.f32 %v362_v1, %v226_v6  ;;  %v242_v18 = vadd.f32 %v362_v1, %v227_v7  ;;  %v231_v19 = vmul.f32 %v361_v0, %v216_v14 }
  0x15   : > { %v243_v20 = vadd.f32 %v362_v1, %v228_v11  ;;  %v244_v21 = vadd.f32 %v362_v1, %v229_v12  ;;  %v245_v22 = vadd.f32 %v362_v1, %v230_v13  ;;  %v232_v23 = vmul.f32 %v361_v0, %v217_v15 }
  0x16   : > { %v248_v24 = vmax.f32 %v240_v16, 0.0  ;;  %v249_v25 = vmax.f32 %v241_v17, 0.0  ;;  %v250_v26 = vmax.f32 %v242_v18, 0.0  ;;  %v246_v27 = vadd.f32 %v362_v1, %v231_v19 }
  0x17   : > { %v251_v28 = vmax.f32 %v243_v20, 0.0  ;;  %v252_v29 = vmax.f32 %v244_v21, 0.0  ;;  %v253_v30 = vmax.f32 %v245_v22, 0.0  ;;  %v247_v31 = vadd.f32 %v362_v1, %v232_v23 }
  0x18   : > { %257 = vst.msk [vmem:[%s208_s26] sm:$0xff] %vm256_vm0, %v248_v24  ;;  %258 = vst.msk [vmem:[%s208_s26 + $0x8] sm:$0xff] %vm256_vm0, %v249_v25  ;;  %v254_v32 = vmax.f32 %v246_v27, 0.0 }
  0x19   : > { %259 = vst.msk [vmem:[%s208_s26 + $0x10] sm:$0xff] %vm256_vm0, %v250_v26  ;;  %260 = vst.msk [vmem:[%s208_s26 + $0x18] sm:$0xff] %vm256_vm0, %v251_v28  ;;  %v255_v33 = vmax.f32 %v247_v31, 0.0 }
  0x1a   : > { %261 = vst.msk [vmem:[%s208_s26 + $0x20] sm:$0xff] %vm256_vm0, %v252_v29  ;;  %262 = vst.msk [vmem:[%s208_s26 + $0x28] sm:$0xff] %vm256_vm0, %v253_v30 }
  0x1b   : > { %263 = vst.msk [vmem:[%s208_s26 + $0x30] sm:$0xff] %vm256_vm0, %v254_v32  ;;  %264 = vst.msk [vmem:[%s208_s26 + $0x38] sm:$0xff] %vm256_vm0, %v255_v33 }
  0x1c PF: > { %s13_s14 = sadd.s32 1, %s413_s14   ;;  %s486_s12 = smov %s409_s13 }
  0x1d   : > { %p10_p5 = scmp.ge.s32.totalorder %s13_s14, 4   ;;  %s487_s13 = smov %s489_s15 }
  0x1f   :  { %12 = sbr.rel (!%p10_p5) target bundleno = 2 (0x2), region = 62 }

// kernel: _lambda_.12
= control target key start
LH: loop header
LB: loop body
LE: loop exit
PB: predicated region body
PF: predicated region fallthrough
CT: control target
= control target key end

     0   :  { %s1704_s15 = smov 0   ;;  %s1706_s16 = smov 0   ;;  %s1945_s0 = inlined_call_operand.vmem [shape: f32[2,1,10,10,8], index: 0, kind: input, shape index: {}]   ;;  %s1946_s1 = inlined_call_operand.vmem [shape: bf16[9,8,8], index: 1, kind: input, shape index: {}]   ;;  %s1947_s2 = inlined_call_operand.vmem [shape: f32[2,8,8,8], index: 2, kind: output, shape index: {0}]   ;;  %s1948_s3 = inlined_call_operand.vmem [shape: f32[1,8], index: 3, kind: output, shape index: {1}]   ;;  %s1949_s4 = inlined_call_operand.vmem [shape: f32[1,8], index: 4, kind: output, shape index: {2}]  }
   0x1   :  { %s1708_s17 = smov 0  }
   0x2 LB: > { %s27_s18 = sadd.s32 1, %s1672_s16  ;;  %p1316_p0 = scmp.ge.s32.totalorder %s1676_s17, 1  ;;  %s1676_s17 = sphi %s1708_s17, %s15_s17   ;;  %s1672_s16 = sphi %s1706_s16, %s1951_s16   ;;  %s1668_s15 = sphi %s1704_s15, %s1950_s15  }
   0x3   : > { %p29_p1 = scmp.ge.s32.totalorder %s27_s18, 2  ;;  %p177_p2 = scmp.lt.s32.totalorder %s1676_s17, 3 }
   0x5   : > { %s1953_s18 = smov (%p29_p1, %s27_s18), 0  ;;  %p178_p3 = pnand %p1316_p0, %p177_p2 }
   0x6   : > { %v1320_v0 = vld [vmem:[%s1946_s1 + $0x4] sm:$0xf] (!%p178_p3)  ;;  %vm271_vm0 = vcmask (!%p178_p3), 1043456   ;;  %v1730_v1 = vld [vmem:[%s1946_s1 + $0x10] sm:$0xf] (!%p178_p3)  ;;  %p211_p4 = scmp.lt.s32.totalorder (!%p178_p3), %s1668_s15, 1 }
   0x7   : > { %181 = sbr.rel (%p178_p3) target bundleno = 343 (0x157), region = 28  ;;  %1618 = vmatprep.subr.msk.bf16.mxu1 (!%p178_p3), %vm271_vm0, %v1320_v0  ;;  %1622 = vmatprep.subr.msk.bf16.mxu0 (!%p178_p3), %vm271_vm0, %v1730_v1  ;;  %v273_v2 = vsel (!%p178_p3), %vm271_vm0, %v1320_v0, 0  ;;  %v1739_v3 = vsel (!%p178_p3), %vm271_vm0, %v1730_v1, 0  ;;  %v243_v4 = vld [vmem:[%s1946_s1] sm:$0xf] (!%p178_p3)  ;;  %vm258_vm1 = vcmask (!%p178_p3), 64512  }
   0x8   : > { %1463 = vmatpush3.bf16.msra.mxu1 (!%p178_p3), %v273_v2  ;;  %1503 = vmatpush3.bf16.msra.mxu0 (!%p178_p3), %v1739_v3  ;;  %v1368_v5 = vld [vmem:[%s1946_s1 + $0x14] sm:$0xf] (!%p178_p3)  ;;  %v353_v12 = vsel (!%p178_p3), %vm271_vm0, %v243_v4, 0  ;;  %v1381_v22 = vld [vmem:[%s1946_s1 + $0x18] sm:$0xf] (!%p178_p3)  ;;  %p1144_p5 = scmp.eq.s32.totalorder (!%p178_p3), %s1668_s15, 0 }
   0x9   : > { %1619 = vmatprep.subr.msk.bf16.mxu1 (!%p178_p3), %vm271_vm0, %v243_v4  ;;  %1624 = vmatprep.subr.msk.bf16.mxu0 (!%p178_p3), %vm271_vm0, %v1368_v5  ;;  %v754_v17 = vsel (!%p178_p3), %vm271_vm0, %v1368_v5, 0  ;;  %v1329_v23 = vld [vmem:[%s1946_s1 + $0x8] sm:$0xf] (!%p178_p3)  ;;  %v857_v38 = vsel (!%p178_p3), %vm271_vm0, %v1381_v22, 0  ;;  %v1394_v41 = vld [vmem:[%s1946_s1 + $0x1c] sm:$0xf] (!%p178_p3) }
   0xa   : > { %v447_v46 = vsel (!%p178_p3), %vm271_vm0, %v1329_v23, 0  ;;  %v1342_v47 = vld [vmem:[%s1946_s1 + $0xc] sm:$0xf] (!%p178_p3)  ;;  %v959_v54 = vsel (!%p178_p3), %vm271_vm0, %v1394_v41, 0  ;;  %v1407_v55 = vld [vmem:[%s1946_s1 + $0x20] sm:$0xf] (!%p178_p3) }
   0xb   : > { %v550_v60 = vsel (!%p178_p3), %vm271_vm0, %v1342_v47, 0  ;;  %v1061_v0 = vsel (!%p178_p3), %vm271_vm0, %v1407_v55, 0 }
   0xe   : > { %s1746_s25 = scalar_select %p211_p4, %s1668_s15, 1 }
   0xf   : > { %vm1150_vm2 = vcmask (%p1144_p5), 57344  }
  0x10   : > { %s1628_s28 = smul.u32 160, %s1746_s25  ;;  %s1415_s20 = sshll.u32 %s1746_s25, 6 }
  0x11   : > { %s228_s23 = scalar_lea.vmem %s1947_s2, %s1415_s20 }
  0x12   : > { %s1757_s5 = scalar_lea.vmem %s1945_s0, %s1628_s28 }
  0x13   : > { %v244_v6 = vld [vmem:[%s1757_s5 + $0x1] sm:$0xff]  ;;  %v245_v7 = vld [vmem:[%s1757_s5 + $0x11] sm:$0xff] }
  0x14   : > { %v1348_v8 = vld [vmem:[%s1757_s5 + $0x21] sm:$0xff]  ;;  %v252_v9 = vpack.c.bf16 %v245_v7, %v244_v6  ;;  %v247_v11 = vld [vmem:[%s1757_s5 + $0x31] sm:$0xff] }
  0x15   : > { %v633_v10 = vpack.c.bf16 %v1348_v8, %v245_v7  ;;  %v1350_v13 = vld [vmem:[%s1757_s5 + $0x41] sm:$0xff]  ;;  %v1766_v14 = vld [vmem:[%s1757_s5 + $0x51] sm:$0xff]  ;;  %v1768_v15 = vpack.c.bf16 %v247_v11, %v1348_v8 }
  0x16   : > { %v634_v16 = vpack.c.bf16 %v1350_v13, %v247_v11  ;;  %v1772_v18 = vpack.c.bf16 %v1766_v14, %v1350_v13  ;;  %v1360_v19 = vld [vmem:[%s1757_s5 + $0x12] sm:$0xff]  ;;  %1464 = vmatprep.mubr.msk.bf16.mxu1 %vm258_vm1, %v252_v9  ;;  %v1361_v20 = vld [vmem:[%s1757_s5 + $0x22] sm:$0xff] }
  0x17   : > { %1504 = vmatprep.mubr.msk.bf16.mxu0 %vm258_vm1, %v633_v10  ;;  %1465 = vmatmul.mubr.msk.bf16.vlgmr.msra.gmra.mrb[0].mxu1 %vm258_vm1, %v1768_v15  ;;  %v735_v21 = vpack.c.bf16 %v1361_v20, %v1360_v19  ;;  %v1788_v24 = vld [vmem:[%s1757_s5 + $0x61] sm:$0xff]  ;;  %v1791_v25 = vld [vmem:[%s1757_s5 + $0x71] sm:$0xff] }
  0x18   : > { %1505 = vmatmul.mubr.msk.bf16.vlgmr.msra.gmra.mrb[0].mxu0 %vm258_vm1, %v634_v16  ;;  %1473 = vmatpush3.bf16.msra.mxu1 %v353_v12  ;;  %v231_v26 = vld [vmem:[%s1757_s5] sm:$0xff]  ;;  %v1798_v27 = vld [vmem:[%s1757_s5 + $0x10] sm:$0xff]  ;;  %v1804_v28 = vpack.c.bf16 %v1791_v25, %v1788_v24  ;;  %v635_v8 = vpack.c.bf16 %v1788_v24, %v1766_v14 }
  0x19   : > { %1513 = vmatpush3.bf16.msra.mxu0 %v754_v17  ;;  %1468 = vmatprep.mubr.msk.bf16.mxu1 %vm258_vm1, %v1772_v18  ;;  %v1362_v29 = vld [vmem:[%s1757_s5 + $0x32] sm:$0xff]  ;;  %v1363_v30 = vld [vmem:[%s1757_s5 + $0x42] sm:$0xff]  ;;  %v239_v31 = vpack.c.bf16 %v1798_v27, %v231_v26 }
  0x1a   : > { %1514 = vmatprep.mubr.msk.bf16.mxu0 %vm258_vm1, %v735_v21  ;;  %1625 = vmatprep.subr.msk.bf16.mxu0 %vm271_vm0, %v1381_v22  ;;  %v1364_v32 = vld [vmem:[%s1757_s5 + $0x52] sm:$0xff]  ;;  %v1365_v33 = vld [vmem:[%s1757_s5 + $0x62] sm:$0xff]  ;;  %v736_v34 = vpack.c.bf16 %v1363_v30, %v1362_v29  ;;  %v429_v56 = vpack.c.bf16 %v1362_v29, %v1361_v20 }
  0x1b   : > { %1620 = vmatprep.subr.msk.bf16.mxu1 %vm271_vm0, %v1329_v23  ;;  %v233_v35 = vld [vmem:[%s1757_s5 + $0x20] sm:$0xff]  ;;  %v234_v36 = vld [vmem:[%s1757_s5 + $0x30] sm:$0xff]  ;;  %v737_v37 = vpack.c.bf16 %v1365_v33, %v1364_v32  ;;  %v430_v59 = vpack.c.bf16 %v1364_v32, %v1363_v30 }
  0x1c   : > { %v235_v39 = vld [vmem:[%s1757_s5 + $0x40] sm:$0xff]  ;;  %v236_v40 = vld [vmem:[%s1757_s5 + $0x50] sm:$0xff]  ;;  %v240_v42 = vpack.c.bf16 %v234_v36, %v233_v35  ;;  %v531_v63 = vpack.c.bf16 %v233_v35, %v1798_v27  ;;  %v1678_v35 = vmov (%p1144_p5), 0.0  }
  0x1d   : > { %v1366_v43 = vld [vmem:[%s1757_s5 + $0x72] sm:$0xff]  ;;  %v1826_v44 = vld [vmem:[%s1757_s5 + $0x82] sm:$0xff]  ;;  %v241_v45 = vpack.c.bf16 %v236_v40, %v235_v39  ;;  %v532_v2 = vpack.c.bf16 %v235_v39, %v234_v36  ;;  %1151 = vst.msk [vmem:[%s1948_s3] sm:$0x1] (%p1144_p5), %vm1150_vm2, %v1678_v35  ;;  %1152 = vst.msk [vmem:[%s1949_s4] sm:$0x1] (%p1144_p5), %vm1150_vm2, %v1678_v35 }
  0x1e   : > { %v738_v48 = vpack.c.bf16 %v1826_v44, %v1366_v43  ;;  %v237_v49 = vld [vmem:[%s1757_s5 + $0x60] sm:$0xff]  ;;  %v238_v50 = vld [vmem:[%s1757_s5 + $0x70] sm:$0xff]  ;;  %v431_v62 = vpack.c.bf16 %v1366_v43, %v1365_v33 }
  0x1f   : > { %1469 = vmatmul.mubr.msk.bf16.gmra.mrb[4].mxu1 %vm258_vm1, %v1804_v28  ;;  %v420_v51 = vld [vmem:[%s1757_s5 + $0x2] sm:$0xff]  ;;  %v242_v52 = vpack.c.bf16 %v238_v50, %v237_v49  ;;  %v1380_v58 = vld [vmem:[%s1757_s5 + $0x90] sm:$0xff]  ;;  %v533_v5 = vpack.c.bf16 %v237_v49, %v236_v40 }
  0x20   : > { %1474 = vmatprep.mubr.msk.bf16.mxu1 %vm258_vm1, %v239_v31  ;;  %v428_v53 = vpack.c.bf16 %v1360_v19, %v420_v51  ;;  %v1379_v57 = vld [vmem:[%s1757_s5 + $0x80] sm:$0xff]  ;;  %v1393_v4 = vld [vmem:[%s1757_s5 + $0x91] sm:$0xff] }
  0x21   : > { %v841_v61 = vpack.c.bf16 %v1380_v58, %v1379_v57  ;;  %v534_v7 = vpack.c.bf16 %v1379_v57, %v238_v50 }
  0x24   : > { %1515 = vmatmul.mubr.msk.bf16.vlgmr.msra.gmra.mrb[0].mxu0 %vm258_vm1, %v736_v34 }
  0x25   : > { %1523 = vmatpush3.bf16.msra.mxu0 %v857_v38  ;;  %1518 = vmatprep.mubr.msk.bf16.mxu0 %vm258_vm1, %v737_v37 }
  0x26   : > { %1626 = vmatprep.subr.msk.bf16.mxu0 %vm271_vm0, %v1394_v41 }
  0x27   : > { %1475 = vmatmul.mubr.msk.bf16.vlgmr.msra.gmra.mrb[0].mxu1 %vm258_vm1, %v240_v42 }
  0x28   : > { %1483 = vmatpush3.bf16.msra.mxu1 %v447_v46  ;;  %1478 = vmatprep.mubr.msk.bf16.mxu1 %vm258_vm1, %v241_v45 }
  0x29   : > { %1621 = vmatprep.subr.msk.bf16.mxu1 %vm271_vm0, %v1342_v47 }
  0x2c   : > { %1519 = vmatmul.mubr.msk.bf16.gmra.mrb[4].mxu0 %vm258_vm1, %v738_v48 }
  0x2d   : > { %1524 = vmatprep.mubr.msk.bf16.mxu0 %vm258_vm1, %v240_v42 }
  0x2f   : > { %1479 = vmatmul.mubr.msk.bf16.gmra.mrb[4].mxu1 %vm258_vm1, %v242_v52 }
  0x30   : > { %1484 = vmatprep.mubr.msk.bf16.mxu1 %vm258_vm1, %v428_v53 }
  0x34   : > { %1525 = vmatmul.mubr.msk.bf16.vlgmr.msra.gmra.mrb[0].mxu0 %vm258_vm1, %v241_v45 }
  0x35   : > { %1533 = vmatpush3.bf16.msra.mxu0 %v959_v54  ;;  %1528 = vmatprep.mubr.msk.bf16.mxu0 %vm258_vm1, %v242_v52 }
  0x36   : > { %1627 = vmatprep.subr.msk.bf16.mxu0 %vm271_vm0, %v1407_v55 }
  0x37   : > { %1485 = vmatmul.mubr.msk.bf16.vlgmr.msra.gmra.mrb[0].mxu1 %vm258_vm1, %v429_v56 }
  0x38   : > { %1493 = vmatpush3.bf16.msra.mxu1 %v550_v60  ;;  %1488 = vmatprep.mubr.msk.bf16.mxu1 %vm258_vm1, %v430_v59 }
  0x39   : > { %1623 = vmatprep.subr.msk.bf16.mxu1 %vm271_vm0, %v1730_v1  ;;  %v1392_v1 = vld [vmem:[%s1757_s5 + $0x81] sm:$0xff] }
  0x3a   : > { %v943_v6 = vpack.c.bf16 %v1393_v4, %v1392_v1  ;;  %v636_v9 = vpack.c.bf16 %v1392_v1, %v1791_v25 }
  0x3c   : > { %1529 = vmatmul.mubr.msk.bf16.gmra.mrb[4].mxu0 %vm258_vm1, %v841_v61 }
  0x3d   : > { %1534 = vmatprep.mubr.msk.bf16.mxu0 %vm258_vm1, %v1768_v15 }
  0x3f   : > { %1489 = vmatmul.mubr.msk.bf16.gmra.mrb[4].mxu1 %vm258_vm1, %v431_v62 }
  0x40   : > { %1494 = vmatprep.mubr.msk.bf16.mxu1 %vm258_vm1, %v531_v63 }
  0x44   : > { %1535 = vmatmul.mubr.msk.bf16.vlgmr.msra.gmra.mrb[0].mxu0 %vm258_vm1, %v1772_v18 }
  0x45   : > { %1543 = vmatpush3.bf16.msra.mxu0 %v1061_v0  ;;  %1538 = vmatprep.mubr.msk.bf16.mxu0 %vm258_vm1, %v1804_v28 }
  0x47   : > { %1495 = vmatmul.mubr.msk.bf16.vlgmr.msra.gmra.mrb[0].mxu1 %vm258_vm1, %v532_v2 }
  0x48   : > { %1553 = vmatpush3.bf16.msra.mxu1 %v1739_v3  ;;  %1498 = vmatprep.mubr.msk.bf16.mxu1 %vm258_vm1, %v533_v5  ;;  %v1406_v3 = vld [vmem:[%s1757_s5 + $0x92] sm:$0xff] }
  0x49   : > { %v1045_v10 = vpack.c.bf16 %v1406_v3, %v1826_v44 }
  0x4c   : > { %1539 = vmatmul.mubr.msk.bf16.gmra.mrb[4].mxu0 %vm258_vm1, %v943_v6 }
  0x4d   : > { %1544 = vmatprep.mubr.msk.bf16.mxu0 %vm258_vm1, %v429_v56 }
  0x4f   : > { %1499 = vmatmul.mubr.msk.bf16.gmra.mrb[4].mxu1 %vm258_vm1, %v534_v7 }
  0x50   : > { %1508 = vmatprep.mubr.msk.bf16.mxu1 %vm258_vm1, %v635_v8 }
  0x54   : > { %1545 = vmatmul.mubr.msk.bf16.vlgmr.msra.gmra.mrb[0].mxu0 %vm258_vm1, %v430_v59 }
  0x55   : > { %1548 = vmatprep.mubr.msk.bf16.mxu0 %vm258_vm1, %v431_v62 }
  0x5b   : > { %1509 = vmatmul.mubr.msk.bf16.vlgmr.msra.gmra.mrb[4].mxu1 %vm258_vm1, %v636_v9 }
  0x5c   : > { %1549 = vmatmul.mubr.msk.bf16.gmra.mrb[4].mxu0 %vm258_vm1, %v1045_v10 }
 0x11a   : > { %v1496_v11 = vpop.f32.mrb[0].mxu1 }
 0x11b   : > { %v586_v12 = vpop.f32.mrb[1].mxu1 }
 0x11c   : > { %v1497_v13 = vpop.f32.mrb[2].mxu1 }
 0x11d   : > { %v589_v14 = vpop.f32.mrb[3].mxu1 }
 0x127   : > { %v1546_v15 = vpop.f32.mrb[0].mxu0 }
 0x128   : > { %v1554_v16 = vadd.f32 %v1546_v15, %v1496_v11  ;;  %v1097_v17 = vpop.f32.mrb[1].mxu0 }
 0x129   : > { %v1555_v18 = vadd.f32 %v1097_v17, %v586_v12  ;;  %v1547_v19 = vpop.f32.mrb[2].mxu0 }
 0x12a   : > { %1138 = vst.msk [vmem:[%s228_s23 + $0x10] sm:$0xff] %vm258_vm1, %v1554_v16  ;;  %v1556_v20 = vadd.f32 %v1547_v19, %v1497_v13  ;;  %v1100_v21 = vpop.f32.mrb[3].mxu0 }
 0x12b   : > { %1136 = vst.msk [vmem:[%s228_s23] sm:$0xff] %vm258_vm1, %v1555_v18  ;;  %v1557_v22 = vadd.f32 %v1100_v21, %v589_v14 }
 0x12c   : > { %1139 = vst.msk [vmem:[%s228_s23 + $0x18] sm:$0xff] %vm258_vm1, %v1556_v20 }
 0x12d   : > { %1137 = vst.msk [vmem:[%s228_s23 + $0x8] sm:$0xff] %vm258_vm1, %v1557_v22 }
 0x12e   : > { %v1510_v23 = vpop.f32.mrb[4].mxu1 }
 0x12f   : > { %v1550_v24 = vpop.f32.mrb[4].mxu0  ;;  %v704_v26 = vpop.f32.mrb[5].mxu1  ;;  %1149 = sbr.rel (!%p1144_p5) target bundleno = 310 (0x136), region = 32 }
 0x130   : > { %v1558_v25 = vadd.f32 %v1550_v24, %v1510_v23  ;;  %v1113_v27 = vpop.f32.mrb[5].mxu0  ;;  %v1511_v29 = vpop.f32.mrb[6].mxu1 }
 0x131   : > { %v1559_v28 = vadd.f32 %v1113_v27, %v704_v26  ;;  %v1551_v30 = vpop.f32.mrb[6].mxu0  ;;  %v707_v32 = vpop.f32.mrb[7].mxu1 }
 0x132   : > { %1142 = vst.msk [vmem:[%s228_s23 + $0x30] sm:$0xff] %vm258_vm1, %v1558_v25  ;;  %v1560_v31 = vadd.f32 %v1551_v30, %v1511_v29  ;;  %v1116_v33 = vpop.f32.mrb[7].mxu0 }
 0x133   : > { %1140 = vst.msk [vmem:[%s228_s23 + $0x20] sm:$0xff] %vm258_vm1, %v1559_v28  ;;  %v1561_v34 = vadd.f32 %v1116_v33, %v707_v32 }
 0x134   : > { %1143 = vst.msk [vmem:[%s228_s23 + $0x38] sm:$0xff] %vm258_vm1, %v1560_v31 }
 0x135   : > { %1141 = vst.msk [vmem:[%s228_s23 + $0x28] sm:$0xff] %vm258_vm1, %v1561_v34 }
 0x136 PF: > { %v1154_v36 = vsel %vm258_vm1, %v1555_v18, 0.0  ;;  %v1155_v37 = vsel %vm258_vm1, %v1557_v22, 0.0  ;;  %v1157_v38 = vsel %vm258_vm1, %v1554_v16, 0.0  ;;  %v1159_v40 = vsel %vm258_vm1, %v1556_v20, 0.0  ;;  %v1153_v17 = vld [vmem:[%s1948_s3] sm:$0x1] }
 0x137   : > { %v1156_v39 = vadd.f32 %v1155_v37, %v1154_v36  ;;  %v1179_v41 = vmul.f32 %v1555_v18, %v1555_v18  ;;  %v1180_v42 = vmul.f32 %v1557_v22, %v1557_v22  ;;  %v1181_v44 = vmul.f32 %v1554_v16, %v1554_v16  ;;  %v1178_v23 = vld [vmem:[%s1949_s4] sm:$0x1] }
 0x138   : > { %v1182_v45 = vmul.f32 %v1556_v20, %v1556_v20  ;;  %v1161_v46 = vsel %vm258_vm1, %v1559_v28, 0.0  ;;  %v1183_v49 = vmul.f32 %v1559_v28, %v1559_v28  ;;  %v1163_v52 = vsel %vm258_vm1, %v1561_v34, 0.0 }
 0x139   : > { %v1158_v43 = vadd.f32 %v1157_v38, %v1156_v39  ;;  %v1187_v47 = vsel %vm258_vm1, %v1179_v41, 0.0  ;;  %v1188_v50 = vsel %vm258_vm1, %v1180_v42, 0.0  ;;  %v1190_v51 = vsel %vm258_vm1, %v1181_v44, 0.0 }
 0x13a   : > { %v1189_v53 = vadd.f32 %v1188_v50, %v1187_v47  ;;  %v1184_v55 = vmul.f32 %v1561_v34, %v1561_v34  ;;  %v1192_v56 = vsel %vm258_vm1, %v1182_v45, 0.0  ;;  %v1165_v57 = vsel %vm258_vm1, %v1558_v25, 0.0 }
 0x13b   : > { %v1160_v48 = vadd.f32 %v1159_v40, %v1158_v43  ;;  %v1185_v60 = vmul.f32 %v1558_v25, %v1558_v25  ;;  %v1194_v61 = vsel %vm258_vm1, %v1183_v49, 0.0  ;;  %v1167_v62 = vsel %vm258_vm1, %v1560_v31, 0.0 }
 0x13c   : > { %v1191_v58 = vadd.f32 %v1190_v51, %v1189_v53  ;;  %v1186_v2 = vmul.f32 %v1560_v31, %v1560_v31  ;;  %v1196_v1 = vsel %vm258_vm1, %v1184_v55, 0.0  ;;  %vm1176_vm3 = vcmask 57344  }
 0x13d   : > { %v1162_v54 = vadd.f32 %v1161_v46, %v1160_v48  ;;  %v1198_v6 = vsel %vm258_vm1, %v1185_v60, 0.0 }
 0x13e   : > { %v1193_v63 = vadd.f32 %v1192_v56, %v1191_v58  ;;  %v1200_v3 = vsel %vm258_vm1, %v1186_v2, 0.0 }
 0x13f   : > { %v1164_v59 = vadd.f32 %v1163_v52, %v1162_v54 }
 0x140   : > { %v1195_v4 = vadd.f32 %v1194_v61, %v1193_v63 }
 0x141   : > { %v1166_v0 = vadd.f32 %v1165_v57, %v1164_v59 }
 0x142   : > { %v1197_v7 = vadd.f32 %v1196_v1, %v1195_v4 }
 0x143   : > { %v1168_v5 = vadd.f32 %v1167_v62, %v1166_v0 }
 0x144   : > { %v1199_v9 = vadd.f32 %v1198_v6, %v1197_v7 }
 0x145   : > { %v1169_v8 = vrot.slane %v1168_v5, 4 }
 0x146   : > { %v1201_v11 = vadd.f32 %v1200_v3, %v1199_v9 }
 0x147   : > { %v1170_v10 = vadd.f32 %v1169_v8, %v1168_v5 }
 0x148   : > { %v1202_v13 = vrot.slane %v1201_v11, 4 }
 0x149   : > { %v1171_v12 = vrot.slane %v1170_v10, 2 }
 0x14a   : > { %v1203_v15 = vadd.f32 %v1202_v13, %v1201_v11 }
 0x14b   : > { %v1172_v14 = vadd.f32 %v1171_v12, %v1170_v10 }
 0x14c   : > { %v1204_v18 = vrot.slane %v1203_v15, 2 }
 0x14d   : > { %v1173_v16 = vrot.slane %v1172_v14, 1 }
 0x14e   : > { %v1205_v20 = vadd.f32 %v1204_v18, %v1203_v15 }
 0x14f   : > { %v1174_v19 = vadd.f32 %v1173_v16, %v1172_v14 }
 0x150   : > { %v1206_v22 = vrot.slane %v1205_v20, 1 }
 0x151   : > { %v1175_v21 = vadd.f32 %v1174_v19, %v1153_v17 }
 0x152   : > { %v1207_v24 = vadd.f32 %v1206_v22, %v1205_v20 }
 0x153   : > { %1177 = vst.msk [vmem:[%s1948_s3] sm:$0x1] %vm1176_vm3, %v1175_v21 }
 0x154   : > { %v1208_v25 = vadd.f32 %v1207_v24, %v1178_v23 }
 0x156   : > { %1209 = vst.msk [vmem:[%s1949_s4] sm:$0x1] %vm1176_vm3, %v1208_v25 }
 0x157 PF: > { %s15_s17 = sadd.s32 1, %s1676_s17   ;;  %s1950_s15 = smov %s1672_s16 }
 0x158   : > { %p12_p6 = scmp.ge.s32.totalorder %s15_s17, 4   ;;  %s1951_s16 = smov %s1953_s18 }
 0x15a   :  { %14 = sbr.rel (!%p12_p6) target bundleno = 2 (0x2), region = 88 }

// kernel: _lambda_.14
= control target key start
LH: loop header
LB: loop body
LE: loop exit
PB: predicated region body
PF: predicated region fallthrough
CT: control target
= control target key end

     0   :  { %s1197_s12 = smov 0   ;;  %s1199_s13 = smov 0   ;;  %s1324_s0 = inlined_call_operand.vmem [shape: f32[2,1,6,10,8], index: 0, kind: input, shape index: {}]   ;;  %s1325_s1 = inlined_call_operand.vmem [shape: bf16[9,8,16], index: 1, kind: input, shape index: {}]   ;;  %s1326_s2 = inlined_call_operand.vmem [shape: f32[1,16], index: 2, kind: input, shape index: {}]   ;;  %s1327_s3 = inlined_call_operand.vmem [shape: f32[2,4,8,16], index: 3, kind: output, shape index: {}]  }
   0x1   :  { %s1201_s14 = smov 0  }
   0x2 LB: > { %s25_s15 = sadd.s32 1, %s1171_s13  ;;  %p948_p0 = scmp.ge.s32.totalorder %s1175_s14, 1  ;;  %s1175_s14 = sphi %s1201_s14, %s13_s14   ;;  %s1171_s13 = sphi %s1199_s13, %s1329_s13   ;;  %s1167_s12 = sphi %s1197_s12, %s1328_s12  }
   0x3   : > { %p27_p1 = scmp.ge.s32.totalorder %s25_s15, 2  ;;  %p157_p2 = scmp.lt.s32.totalorder %s1175_s14, 3 }
   0x5   : > { %s1331_s15 = smov (%p27_p1, %s25_s15), 0  ;;  %p158_p3 = pnand %p948_p0, %p157_p2 }
   0x6   : > { %vm231_vm0 = vcmask (!%p158_p3), 1043456   ;;  %v971_v0 = vld [vmem:[%s1325_s1 + $0x10] sm:$0xf] (!%p158_p3)  ;;  %v952_v1 = vld [vmem:[%s1325_s1 + $0x4] sm:$0xf] (!%p158_p3)  ;;  %p189_p4 = scmp.lt.s32.totalorder (!%p158_p3), %s1167_s12, 1 }
   0x7   : > { %161 = sbr.rel (%p158_p3) target bundleno = 293 (0x125), region = 32  ;;  %1123 = vmatprep.subr.msk.bf16.mxu0 (!%p158_p3), %vm231_vm0, %v971_v0  ;;  %1119 = vmatprep.subr.msk.bf16.mxu1 (!%p158_p3), %vm231_vm0, %v952_v1  ;;  %v498_v2 = vsel (!%p158_p3), %vm231_vm0, %v971_v0, 0  ;;  %v233_v3 = vsel (!%p158_p3), %vm231_vm0, %v952_v1, 0  ;;  %v978_v4 = vld [vmem:[%s1325_s1 + $0x14] sm:$0xf] (!%p158_p3)  ;;  %vm224_vm1 = vcmask (!%p158_p3), 64512  }
   0x8   : > { %1058 = vmatpush3.bf16.msra.mxu0 (!%p158_p3), %v498_v2  ;;  %1034 = vmatpush3.bf16.msra.mxu1 (!%p158_p3), %v233_v3  ;;  %v215_v5 = vld [vmem:[%s1325_s1] sm:$0xf] (!%p158_p3)  ;;  %v568_v16 = vsel (!%p158_p3), %vm231_vm0, %v978_v4, 0  ;;  %v985_v23 = vld [vmem:[%s1325_s1 + $0x18] sm:$0xf] (!%p158_p3)  ;;  %vm849_vm2 = vcmask (!%p158_p3), 130048  }
   0x9   : > { %1124 = vmatprep.subr.msk.bf16.mxu0 (!%p158_p3), %vm231_vm0, %v978_v4  ;;  %1120 = vmatprep.subr.msk.bf16.mxu1 (!%p158_p3), %vm231_vm0, %v215_v5  ;;  %v291_v17 = vsel (!%p158_p3), %vm231_vm0, %v215_v5, 0  ;;  %v957_v24 = vld [vmem:[%s1325_s1 + $0x8] sm:$0xf] (!%p158_p3)  ;;  %v639_v32 = vsel (!%p158_p3), %vm231_vm0, %v985_v23, 0  ;;  %v992_v35 = vld [vmem:[%s1325_s1 + $0x1c] sm:$0xf] (!%p158_p3) }
   0xa   : > { %v357_v33 = vsel (!%p158_p3), %vm231_vm0, %v957_v24, 0  ;;  %v964_v36 = vld [vmem:[%s1325_s1 + $0xc] sm:$0xf] (!%p158_p3)  ;;  %v709_v41 = vsel (!%p158_p3), %vm231_vm0, %v992_v35, 0  ;;  %v999_v44 = vld [vmem:[%s1325_s1 + $0x20] sm:$0xf] (!%p158_p3) }
   0xb   : > { %v428_v42 = vsel (!%p158_p3), %vm231_vm0, %v964_v36, 0  ;;  %v779_v48 = vsel (!%p158_p3), %vm231_vm0, %v999_v44, 0  ;;  %v1002_v56 = vld [vmem:[%s1326_s2] ss:$0 sm:$0xff] (!%p158_p3) }
   0xe   : > { %s1333_s12 = smov (!%p189_p4, %s1167_s12), 1 }
   0xf   : > { %s1128_s24 = smul.u32 96, %s1333_s12  ;;  %s1005_s17 = sshll.u32 %s1333_s12, 5 }
  0x10   : > { %s206_s20 = scalar_lea.vmem %s1327_s3, %s1005_s17 }
  0x11   : > { %s1239_s27 = scalar_lea.vmem %s1324_s0, %s1128_s24 }
  0x12   : > { %v216_v6 = vld [vmem:[%s1239_s27 + $0x1] sm:$0xff]  ;;  %v217_v7 = vld [vmem:[%s1239_s27 + $0x11] sm:$0xff] }
  0x13   : > { %v968_v8 = vld [vmem:[%s1239_s27 + $0x21] sm:$0xff]  ;;  %v220_v9 = vpack.c.bf16 %v217_v7, %v216_v6  ;;  %v219_v11 = vld [vmem:[%s1239_s27 + $0x31] sm:$0xff] }
  0x14   : > { %v487_v10 = vpack.c.bf16 %v968_v8, %v217_v7  ;;  %v1246_v12 = vld [vmem:[%s1239_s27 + $0x41] sm:$0xff]  ;;  %v221_v14 = vpack.c.bf16 %v219_v11, %v968_v8  ;;  %v210_v18 = vld [vmem:[%s1239_s27 + $0x10] sm:$0xff] }
  0x15   : > { %v209_v13 = vld [vmem:[%s1239_s27] sm:$0xff]  ;;  %v488_v15 = vpack.c.bf16 %v1246_v12, %v219_v11  ;;  %v974_v19 = vld [vmem:[%s1239_s27 + $0x12] sm:$0xff]  ;;  %1035 = vmatprep.mubr.msk.bf16.mxu1 %vm224_vm1, %v220_v9 }
  0x16   : > { %v975_v20 = vld [vmem:[%s1239_s27 + $0x22] sm:$0xff]  ;;  %1059 = vmatprep.mubr.msk.bf16.mxu0 %vm224_vm1, %v487_v10  ;;  %v213_v21 = vpack.c.bf16 %v210_v18, %v209_v13  ;;  %1036 = vmatmul.mubr.msk.bf16.vlgmr.msra.gmra.mrb[0].mxu1 %vm224_vm1, %v221_v14  ;;  %v212_v26 = vld [vmem:[%s1239_s27 + $0x30] sm:$0xff] }
  0x17   : > { %v557_v22 = vpack.c.bf16 %v975_v20, %v974_v19  ;;  %1060 = vmatmul.mubr.msk.bf16.vlgmr.msra.gmra.mrb[0].mxu0 %vm224_vm1, %v488_v15  ;;  %1040 = vmatpush3.bf16.msra.mxu1 %v291_v17  ;;  %v211_v25 = vld [vmem:[%s1239_s27 + $0x20] sm:$0xff]  ;;  %v976_v27 = vld [vmem:[%s1239_s27 + $0x32] sm:$0xff] }
  0x18   : > { %1064 = vmatpush3.bf16.msra.mxu0 %v568_v16  ;;  %1041 = vmatprep.mubr.msk.bf16.mxu1 %vm224_vm1, %v213_v21  ;;  %v977_v28 = vld [vmem:[%s1239_s27 + $0x42] sm:$0xff]  ;;  %v214_v30 = vpack.c.bf16 %v212_v26, %v211_v25  ;;  %v984_v38 = vld [vmem:[%s1239_s27 + $0x50] sm:$0xff]  ;;  %v347_v39 = vpack.c.bf16 %v976_v27, %v975_v20  ;;  %v417_v43 = vpack.c.bf16 %v211_v25, %v210_v18 }
  0x19   : > { %1065 = vmatprep.mubr.msk.bf16.mxu0 %vm224_vm1, %v557_v22  ;;  %1125 = vmatprep.subr.msk.bf16.mxu0 %vm231_vm0, %v985_v23  ;;  %v342_v29 = vld [vmem:[%s1239_s27 + $0x2] sm:$0xff]  ;;  %v558_v31 = vpack.c.bf16 %v977_v28, %v976_v27  ;;  %v991_v45 = vld [vmem:[%s1239_s27 + $0x51] sm:$0xff] }
  0x1a   : > { %1121 = vmatprep.subr.msk.bf16.mxu1 %vm231_vm0, %v957_v24  ;;  %v346_v34 = vpack.c.bf16 %v974_v19, %v342_v29  ;;  %v983_v37 = vld [vmem:[%s1239_s27 + $0x40] sm:$0xff]  ;;  %v699_v47 = vpack.c.bf16 %v991_v45, %v1246_v12  ;;  %v998_v49 = vld [vmem:[%s1239_s27 + $0x52] sm:$0xff] }
  0x1b   : > { %v629_v40 = vpack.c.bf16 %v984_v38, %v983_v37  ;;  %v418_v46 = vpack.c.bf16 %v983_v37, %v212_v26  ;;  %v769_v50 = vpack.c.bf16 %v998_v49, %v977_v28 }
  0x22   : > { %1042 = vmatmul.mubr.msk.bf16.vlgmr.msra.gmra.mrb[0].mxu1 %vm224_vm1, %v214_v30 }
  0x23   : > { %1066 = vmatmul.mubr.msk.bf16.vlgmr.msra.gmra.mrb[0].mxu0 %vm224_vm1, %v558_v31  ;;  %1046 = vmatpush3.bf16.msra.mxu1 %v357_v33 }
  0x24   : > { %1070 = vmatpush3.bf16.msra.mxu0 %v639_v32  ;;  %1047 = vmatprep.mubr.msk.bf16.mxu1 %vm224_vm1, %v346_v34 }
  0x25   : > { %1071 = vmatprep.mubr.msk.bf16.mxu0 %vm224_vm1, %v214_v30  ;;  %1126 = vmatprep.subr.msk.bf16.mxu0 %vm231_vm0, %v992_v35 }
  0x26   : > { %1122 = vmatprep.subr.msk.bf16.mxu1 %vm231_vm0, %v964_v36 }
  0x2e   : > { %1048 = vmatmul.mubr.msk.bf16.vlgmr.msra.gmra.mrb[0].mxu1 %vm224_vm1, %v347_v39 }
  0x2f   : > { %1072 = vmatmul.mubr.msk.bf16.vlgmr.msra.gmra.mrb[0].mxu0 %vm224_vm1, %v629_v40  ;;  %1052 = vmatpush3.bf16.msra.mxu1 %v428_v42 }
  0x30   : > { %1076 = vmatpush3.bf16.msra.mxu0 %v709_v41  ;;  %1053 = vmatprep.mubr.msk.bf16.mxu1 %vm224_vm1, %v417_v43 }
  0x31   : > { %1077 = vmatprep.mubr.msk.bf16.mxu0 %vm224_vm1, %v221_v14  ;;  %1127 = vmatprep.subr.msk.bf16.mxu0 %vm231_vm0, %v999_v44 }
  0x3a   : > { %1054 = vmatmul.mubr.msk.bf16.vlgmr.msra.gmra.mrb[0].mxu1 %vm224_vm1, %v418_v46 }
  0x3b   : > { %1078 = vmatmul.mubr.msk.bf16.vlgmr.msra.gmra.mrb[0].mxu0 %vm224_vm1, %v699_v47 }
  0x3c   : > { %1082 = vmatpush3.bf16.msra.mxu0 %v779_v48  ;;  %1083 = vmatprep.mubr.msk.bf16.mxu0 %vm224_vm1, %v347_v39 }
  0x47   : > { %1084 = vmatmul.mubr.msk.bf16.vlgmr.msra.gmra.mrb[0].mxu0 %vm224_vm1, %v769_v50 }
 0x10d   : > { %v1055_v51 = vpop.f32.mrb[0].mxu1 }
 0x10e   : > { %v464_v52 = vpop.f32.mrb[1].mxu1 }
 0x10f   : > { %v1056_v53 = vpop.f32.mrb[2].mxu1 }
 0x110   : > { %v467_v54 = vpop.f32.mrb[3].mxu1 }
 0x11a   : > { %v1085_v55 = vpop.f32.mrb[0].mxu0 }
 0x11b   : > { %v1087_v57 = vadd.f32 %v1085_v55, %v1055_v51  ;;  %v815_v58 = vpop.f32.mrb[1].mxu0 }
 0x11c   : > { %v1088_v59 = vadd.f32 %v815_v58, %v464_v52  ;;  %v1086_v60 = vpop.f32.mrb[2].mxu0 }
 0x11d   : > { %v843_v61 = vadd.f32 %v1087_v57, %v1002_v56  ;;  %v1089_v62 = vadd.f32 %v1086_v60, %v1056_v53  ;;  %v818_v63 = vpop.f32.mrb[3].mxu0 }
 0x11e   : > { %v841_v0 = vadd.f32 %v1088_v59, %v1002_v56  ;;  %v1090_v1 = vadd.f32 %v818_v63, %v467_v54 }
 0x11f   : > { %v847_v2 = vmax.f32 %v843_v61, 0.0  ;;  %v844_v3 = vadd.f32 %v1089_v62, %v1002_v56 }
 0x120   : > { %v845_v4 = vmax.f32 %v841_v0, 0.0  ;;  %v842_v5 = vadd.f32 %v1090_v1, %v1002_v56 }
 0x121   : > { %852 = vst.msk [vmem:[%s206_s20 + $0x10] sm:$0xff] %vm849_vm2, %v847_v2  ;;  %v848_v6 = vmax.f32 %v844_v3, 0.0 }
 0x122   : > { %850 = vst.msk [vmem:[%s206_s20] sm:$0xff] %vm849_vm2, %v845_v4  ;;  %v846_v7 = vmax.f32 %v842_v5, 0.0 }
 0x123   : > { %853 = vst.msk [vmem:[%s206_s20 + $0x18] sm:$0xff] %vm849_vm2, %v848_v6 }
 0x124   : > { %851 = vst.msk [vmem:[%s206_s20 + $0x8] sm:$0xff] %vm849_vm2, %v846_v7 }
 0x125 PF: > { %s13_s14 = sadd.s32 1, %s1175_s14   ;;  %s1328_s12 = smov %s1171_s13 }
 0x126   : > { %p10_p5 = scmp.ge.s32.totalorder %s13_s14, 4   ;;  %s1329_s13 = smov %s1331_s15 }
 0x128   :  { %12 = sbr.rel (!%p10_p5) target bundleno = 2 (0x2), region = 72 }

// kernel: _lambda_.15
= control target key start
LH: loop header
LB: loop body
LE: loop exit
PB: predicated region body
PF: predicated region fallthrough
CT: control target
= control target key end

     0   :  { %s1248_s12 = smov 0   ;;  %s1250_s13 = smov 0   ;;  %s1357_s0 = inlined_call_operand.vmem [shape: f32[2,1,6,10,16], index: 0, kind: input, shape index: {}]   ;;  %s1358_s1 = inlined_call_operand.vmem [shape: bf16[9,16,16], index: 1, kind: input, shape index: {}]   ;;  %s1359_s2 = inlined_call_operand.vmem [shape: f32[1,16], index: 2, kind: input, shape index: {}]   ;;  %s1360_s3 = inlined_call_operand.vmem [shape: f32[2,4,8,16], index: 3, kind: output, shape index: {}]  }
   0x1   :  { %s1252_s14 = smov 0  }
   0x2 LB: > { %s25_s15 = sadd.s32 1, %s1222_s13  ;;  %p982_p0 = scmp.ge.s32.totalorder %s1226_s14, 1  ;;  %s1226_s14 = sphi %s1252_s14, %s13_s14   ;;  %s1222_s13 = sphi %s1250_s13, %s1362_s13   ;;  %s1218_s12 = sphi %s1248_s12, %s1361_s12  }
   0x3   : > { %p27_p1 = scmp.ge.s32.totalorder %s25_s15, 2  ;;  %p157_p2 = scmp.lt.s32.totalorder %s1226_s14, 3 }
   0x5   : > { %s1364_s15 = smov (%p27_p1, %s25_s15), 0  ;;  %p158_p3 = pnand %p982_p0, %p157_p2 }
   0x6   : > { %v1195_v0 = vld [vmem:[%s1358_s1 + $0x20] sm:$0xff] (!%p158_p3)   ;;  %p189_p4 = scmp.lt.s32.totalorder (!%p158_p3), %s1218_s12, 1  ;;  %v1196_v1 = vld [vmem:[%s1358_s1 + $0x8] sm:$0xff] (!%p158_p3)   ;;  %vm232_vm0 = vcmask (!%p158_p3), 130048   ;;  %v1199_v19 = vld [vmem:[%s1358_s1 + $0x30] sm:$0xff] (!%p158_p3)  }
   0x7   : > { %161 = sbr.rel (%p158_p3) target bundleno = 293 (0x125), region = 32  ;;  %1108 = vmatprep.subr.bf16.mxu0 (!%p158_p3), %v1195_v0  ;;  %v1197_v2 = vld [vmem:[%s1358_s1 + $0x28] sm:$0xff] (!%p158_p3)   ;;  %1084 = vmatprep.subr.bf16.mxu1 (!%p158_p3), %v1196_v1  ;;  %v1198_v3 = vld [vmem:[%s1358_s1] sm:$0xff] (!%p158_p3)   ;;  %v1200_v20 = vld [vmem:[%s1358_s1 + $0x10] sm:$0xff] (!%p158_p3)  }
   0x8   : > { %1109 = vmatpush3.bf16.msra.mxu0 (!%p158_p3), %v1195_v0  ;;  %1085 = vmatpush3.bf16.msra.mxu1 (!%p158_p3), %v1196_v1  ;;  %v1201_v29 = vld [vmem:[%s1358_s1 + $0x38] sm:$0xff] (!%p158_p3)   ;;  %v1203_v36 = vld [vmem:[%s1358_s1 + $0x40] sm:$0xff] (!%p158_p3)  }
   0x9   : > { %1114 = vmatprep.subr.bf16.mxu0 (!%p158_p3), %v1197_v2  ;;  %1090 = vmatprep.subr.bf16.mxu1 (!%p158_p3), %v1198_v3  ;;  %v1202_v30 = vld [vmem:[%s1358_s1 + $0x18] sm:$0xff] (!%p158_p3)   ;;  %v1053_v47 = vld [vmem:[%s1359_s2] ss:$0 sm:$0xff] (!%p158_p3) }
   0xe   : > { %s1366_s12 = smov (!%p189_p4, %s1218_s12), 1 }
   0xf   : > { %s1170_s24 = smul.u32 96, %s1366_s12  ;;  %s1056_s17 = sshll.u32 %s1366_s12, 5 }
  0x10   : > { %s206_s20 = scalar_lea.vmem %s1360_s3, %s1056_s17 }
  0x11   : > { %s1284_s27 = scalar_lea.vmem %s1357_s0, %s1170_s24 }
  0x12   : > { %v217_v4 = vld [vmem:[%s1284_s27 + $0x1] sm:$0xff]  ;;  %v218_v5 = vld [vmem:[%s1284_s27 + $0x11] sm:$0xff] }
  0x13   : > { %v1009_v6 = vld [vmem:[%s1284_s27 + $0x21] sm:$0xff]  ;;  %v221_v7 = vpack.c.bf16 %v218_v5, %v217_v4  ;;  %v220_v9 = vld [vmem:[%s1284_s27 + $0x31] sm:$0xff] }
  0x14   : > { %v502_v8 = vpack.c.bf16 %v1009_v6, %v218_v5  ;;  %v1011_v10 = vld [vmem:[%s1284_s27 + $0x41] sm:$0xff]  ;;  %v222_v12 = vpack.c.bf16 %v220_v9, %v1009_v6  ;;  %v210_v14 = vld [vmem:[%s1284_s27 + $0x10] sm:$0xff] }
  0x15   : > { %v209_v11 = vld [vmem:[%s1284_s27] sm:$0xff]  ;;  %v503_v13 = vpack.c.bf16 %v1011_v10, %v220_v9  ;;  %v1017_v15 = vld [vmem:[%s1284_s27 + $0x12] sm:$0xff]  ;;  %1086 = vmatprep.mubr.msk.bf16.mxu1 %vm232_vm0, %v221_v7 }
  0x16   : > { %v1018_v16 = vld [vmem:[%s1284_s27 + $0x22] sm:$0xff]  ;;  %1110 = vmatprep.mubr.msk.bf16.mxu0 %vm232_vm0, %v502_v8  ;;  %v213_v17 = vpack.c.bf16 %v210_v14, %v209_v11  ;;  %1087 = vmatmul.mubr.msk.bf16.vlgmr.msra.gmra.mrb[0].mxu1 %vm232_vm0, %v222_v12  ;;  %v212_v22 = vld [vmem:[%s1284_s27 + $0x30] sm:$0xff] }
  0x17   : > { %v576_v18 = vpack.c.bf16 %v1018_v16, %v1017_v15  ;;  %1111 = vmatmul.mubr.msk.bf16.vlgmr.msra.gmra.mrb[0].mxu0 %vm232_vm0, %v503_v13  ;;  %1091 = vmatpush3.bf16.msra.mxu1 %v1198_v3  ;;  %v211_v21 = vld [vmem:[%s1284_s27 + $0x20] sm:$0xff]  ;;  %v1019_v23 = vld [vmem:[%s1284_s27 + $0x32] sm:$0xff] }
  0x18   : > { %1115 = vmatpush3.bf16.msra.mxu0 %v1197_v2  ;;  %1092 = vmatprep.mubr.msk.bf16.mxu1 %vm232_vm0, %v213_v17  ;;  %v1020_v24 = vld [vmem:[%s1284_s27 + $0x42] sm:$0xff]  ;;  %v214_v26 = vpack.c.bf16 %v212_v22, %v211_v21  ;;  %v1029_v32 = vld [vmem:[%s1284_s27 + $0x50] sm:$0xff]  ;;  %v354_v33 = vpack.c.bf16 %v1019_v23, %v1018_v16  ;;  %v428_v35 = vpack.c.bf16 %v211_v21, %v210_v14 }
  0x19   : > { %1116 = vmatprep.mubr.msk.bf16.mxu0 %vm232_vm0, %v576_v18  ;;  %1120 = vmatprep.subr.bf16.mxu0 %v1199_v19  ;;  %v349_v25 = vld [vmem:[%s1284_s27 + $0x2] sm:$0xff]  ;;  %v577_v27 = vpack.c.bf16 %v1020_v24, %v1019_v23  ;;  %v1038_v37 = vld [vmem:[%s1284_s27 + $0x51] sm:$0xff] }
  0x1a   : > { %1096 = vmatprep.subr.bf16.mxu1 %v1200_v20  ;;  %v353_v28 = vpack.c.bf16 %v1017_v15, %v349_v25  ;;  %v1028_v31 = vld [vmem:[%s1284_s27 + $0x40] sm:$0xff]  ;;  %v726_v39 = vpack.c.bf16 %v1038_v37, %v1011_v10  ;;  %v1047_v40 = vld [vmem:[%s1284_s27 + $0x52] sm:$0xff] }
  0x1b   : > { %v652_v34 = vpack.c.bf16 %v1029_v32, %v1028_v31  ;;  %v429_v38 = vpack.c.bf16 %v1028_v31, %v212_v22  ;;  %v800_v41 = vpack.c.bf16 %v1047_v40, %v1020_v24 }
  0x22   : > { %1093 = vmatmul.mubr.msk.bf16.vlgmr.msra.gmra.mrb[0].mxu1 %vm232_vm0, %v214_v26 }
  0x23   : > { %1117 = vmatmul.mubr.msk.bf16.vlgmr.msra.gmra.mrb[0].mxu0 %vm232_vm0, %v577_v27  ;;  %1097 = vmatpush3.bf16.msra.mxu1 %v1200_v20 }
  0x24   : > { %1121 = vmatpush3.bf16.msra.mxu0 %v1199_v19  ;;  %1098 = vmatprep.mubr.msk.bf16.mxu1 %vm232_vm0, %v353_v28 }
  0x25   : > { %1122 = vmatprep.mubr.msk.bf16.mxu0 %vm232_vm0, %v214_v26  ;;  %1126 = vmatprep.subr.bf16.mxu0 %v1201_v29 }
  0x26   : > { %1102 = vmatprep.subr.bf16.mxu1 %v1202_v30 }
  0x2e   : > { %1099 = vmatmul.mubr.msk.bf16.vlgmr.msra.gmra.mrb[0].mxu1 %vm232_vm0, %v354_v33 }
  0x2f   : > { %1123 = vmatmul.mubr.msk.bf16.vlgmr.msra.gmra.mrb[0].mxu0 %vm232_vm0, %v652_v34  ;;  %1103 = vmatpush3.bf16.msra.mxu1 %v1202_v30 }
  0x30   : > { %1127 = vmatpush3.bf16.msra.mxu0 %v1201_v29  ;;  %1104 = vmatprep.mubr.msk.bf16.mxu1 %vm232_vm0, %v428_v35 }
  0x31   : > { %1128 = vmatprep.mubr.msk.bf16.mxu0 %vm232_vm0, %v222_v12  ;;  %1132 = vmatprep.subr.bf16.mxu0 %v1203_v36 }
  0x3a   : > { %1105 = vmatmul.mubr.msk.bf16.vlgmr.msra.gmra.mrb[0].mxu1 %vm232_vm0, %v429_v38 }
  0x3b   : > { %1129 = vmatmul.mubr.msk.bf16.vlgmr.msra.gmra.mrb[0].mxu0 %vm232_vm0, %v726_v39 }
  0x3c   : > { %1133 = vmatpush3.bf16.msra.mxu0 %v1203_v36  ;;  %1134 = vmatprep.mubr.msk.bf16.mxu0 %vm232_vm0, %v354_v33 }
  0x47   : > { %1135 = vmatmul.mubr.msk.bf16.vlgmr.msra.gmra.mrb[0].mxu0 %vm232_vm0, %v800_v41 }
 0x10d   : > { %v1106_v42 = vpop.f32.mrb[0].mxu1 }
 0x10e   : > { %v479_v43 = vpop.f32.mrb[1].mxu1 }
 0x10f   : > { %v1107_v44 = vpop.f32.mrb[2].mxu1 }
 0x110   : > { %v482_v45 = vpop.f32.mrb[3].mxu1 }
 0x11a   : > { %v1136_v46 = vpop.f32.mrb[0].mxu0 }
 0x11b   : > { %v1138_v48 = vadd.f32 %v1136_v46, %v1106_v42  ;;  %v850_v49 = vpop.f32.mrb[1].mxu0 }
 0x11c   : > { %v1139_v50 = vadd.f32 %v850_v49, %v479_v43  ;;  %v1137_v51 = vpop.f32.mrb[2].mxu0 }
 0x11d   : > { %v878_v52 = vadd.f32 %v1138_v48, %v1053_v47  ;;  %v1140_v53 = vadd.f32 %v1137_v51, %v1107_v44  ;;  %v853_v54 = vpop.f32.mrb[3].mxu0 }
 0x11e   : > { %v876_v55 = vadd.f32 %v1139_v50, %v1053_v47  ;;  %v1141_v56 = vadd.f32 %v853_v54, %v482_v45 }
 0x11f   : > { %v882_v57 = vmax.f32 %v878_v52, 0.0  ;;  %v879_v58 = vadd.f32 %v1140_v53, %v1053_v47 }
 0x120   : > { %v880_v59 = vmax.f32 %v876_v55, 0.0  ;;  %v877_v60 = vadd.f32 %v1141_v56, %v1053_v47 }
 0x121   : > { %886 = vst.msk [vmem:[%s206_s20 + $0x10] sm:$0xff] %vm232_vm0, %v882_v57  ;;  %v883_v61 = vmax.f32 %v879_v58, 0.0 }
 0x122   : > { %884 = vst.msk [vmem:[%s206_s20] sm:$0xff] %vm232_vm0, %v880_v59  ;;  %v881_v62 = vmax.f32 %v877_v60, 0.0 }
 0x123   : > { %887 = vst.msk [vmem:[%s206_s20 + $0x18] sm:$0xff] %vm232_vm0, %v883_v61 }
 0x124   : > { %885 = vst.msk [vmem:[%s206_s20 + $0x8] sm:$0xff] %vm232_vm0, %v881_v62 }
 0x125 PF: > { %s13_s14 = sadd.s32 1, %s1226_s14   ;;  %s1361_s12 = smov %s1222_s13 }
 0x126   : > { %p10_p5 = scmp.ge.s32.totalorder %s13_s14, 4   ;;  %s1362_s13 = smov %s1364_s15 }
 0x128   :  { %12 = sbr.rel (!%p10_p5) target bundleno = 2 (0x2), region = 72 }

</bundles_post_ra>
